<compile_context>
chip_gen: v7x
topology: tpu7x:2x2x1
jax: 0.10.0
libtpu: 0.0.40
codegen_flags: <defaults>
</compile_context>

<pallas_src>
import numpy as np
import jax
import jax.numpy as jnp
from jax.experimental import pallas as pl
from jax.experimental.pallas import tpu as pltpu

K = 3          # ConvBlock uses kernel_size=3, padding=1
EPS = 1e-5     # nn.InstanceNorm2d default eps


def _instance_norm_relu(h):
    """h: (H*W, C). InstanceNorm2d(affine=False) over spatial dims, then ReLU."""
    mean = jnp.mean(h, axis=0, keepdims=True)
    hc = h - mean
    var = jnp.mean(hc * hc, axis=0, keepdims=True)
    return jnp.maximum(hc * jax.lax.rsqrt(var + EPS), 0.0)


def convblock_kernel(x_ref, w1_ref, b1_ref, w2_ref, b2_ref, o_ref,
                     xpad_ref, cols1_ref, hpad_ref, cols2_ref):
    """One batch element of ConvBlock, fully fused in VMEM.

    x_ref  : (1, H, W, Cin)   NHWC input tile
    w1_ref : (K*K*Cin, C)     conv1 weight in im2col-matmul layout, rows (ky,kx,cin)
    b1_ref : (1, C)
    w2_ref : (K*K*C, C)       conv2 weight in im2col-matmul layout
    b2_ref : (1, C)
    o_ref  : (1, C, H*W)      lane-dense output (reshaped to NCHW outside)
    scratch: zero-padded activations + im2col slabs (VMEM)
    """
    H, W, Cin = x_ref.shape[1], x_ref.shape[2], x_ref.shape[3]
    C = o_ref.shape[1]
    HW = H * W

    # ---- zero-pad input into VMEM scratch (padding=1) ------------------------
    xpad_ref[...] = jnp.zeros_like(xpad_ref)
    xpad_ref[1:H + 1, 1:W + 1, :] = x_ref[0]

    # ---- conv1: im2col slab + one MXU matmul + bias + InstanceNorm + ReLU ----
    for t in range(K * K):                       # static unroll over 9 taps
        ky, kx = divmod(t, K)
        cols1_ref[:, :, t * Cin:(t + 1) * Cin] = xpad_ref[ky:ky + H, kx:kx + W, :]
    cols1 = cols1_ref[...].reshape(HW, K * K * Cin)
    h = jnp.dot(cols1, w1_ref[...], preferred_element_type=jnp.float32)
    h = _instance_norm_relu(h + b1_ref[...])     # (HW, C)
    # TODO(synk): Dropout2d is identity in eval mode; training-mode channel
    # dropout (with 1/(1-p) scaling) is not implemented here.

    # ---- conv2: pad intermediate in VMEM, im2col, one MXU matmul -------------
    hpad_ref[...] = jnp.zeros_like(hpad_ref)
    hpad_ref[1:H + 1, 1:W + 1, :] = h.reshape(H, W, C)
    for t in range(K * K):
        ky, kx = divmod(t, K)
        cols2_ref[:, :, t * C:(t + 1) * C] = hpad_ref[ky:ky + H, kx:kx + W, :]
    cols2 = cols2_ref[...].reshape(HW, K * K * C)
    h2 = jnp.dot(cols2, w2_ref[...], preferred_element_type=jnp.float32)
    h2 = _instance_norm_relu(h2 + b2_ref[...])   # (HW, C)

    # ---- lane-dense write: (C, HW) puts H*W=256 on the 128-lane axis ---------
    o_ref[0] = jnp.transpose(h2)


@jax.jit
def convblock_forward(x, w1, b1, w2, b2):
    """ConvBlock forward. x: (B, Cin, H, W) NCHW; weights in PyTorch OIHW layout."""
    B, Cin, H, W = x.shape
    C = w1.shape[0]
    HW = H * W
    KK = K * K

    # Layout plumbing (tiny, outside the kernel): NHWC input, matmul-layout weights.
    x_nhwc = jnp.transpose(x, (0, 2, 3, 1))
    w1_mat = jnp.transpose(w1, (2, 3, 1, 0)).reshape(KK * Cin, C)   # rows: (ky,kx,cin)
    w2_mat = jnp.transpose(w2, (2, 3, 1, 0)).reshape(KK * C, C)
    b1_row = b1.reshape(1, C)
    b2_row = b2.reshape(1, C)

    out_flat = pl.pallas_call(
        convblock_kernel,
        out_shape=jax.ShapeDtypeStruct((B, C, HW), jnp.float32),
        grid_spec=pltpu.PrefetchScalarGridSpec(
            num_scalar_prefetch=0,
            grid=(B,),
            in_specs=[
                pl.BlockSpec((1, H, W, Cin), lambda b: (b, 0, 0, 0)),
                pl.BlockSpec((KK * Cin, C), lambda b: (0, 0)),
                pl.BlockSpec((1, C), lambda b: (0, 0)),
                pl.BlockSpec((KK * C, C), lambda b: (0, 0)),
                pl.BlockSpec((1, C), lambda b: (0, 0)),
            ],
            out_specs=pl.BlockSpec((1, C, HW), lambda b: (b, 0, 0)),
            scratch_shapes=[
                pltpu.VMEM((H + 2, W + 2, Cin), jnp.float32),   # padded input
                pltpu.VMEM((H, W, KK * Cin), jnp.float32),      # im2col slab 1
                pltpu.VMEM((H + 2, W + 2, C), jnp.float32),     # padded intermediate
                pltpu.VMEM((H, W, KK * C), jnp.float32),        # im2col slab 2
            ],
        ),
        compiler_params=pltpu.CompilerParams(
            dimension_semantics=("parallel",)),
    )(x_nhwc, w1_mat, b1_row, w2_mat, b2_row)

    return out_flat.reshape(B, C, H, W)   # pure metadata reshape -> NCHW


# ----------------------------------------------------------------------------
# Pure-JAX reference (for verification)
# ----------------------------------------------------------------------------
def reference_forward(x, w1, b1, w2, b2):
    def conv(h, w, b):
        o = jax.lax.conv_general_dilated(
            h, w, window_strides=(1, 1), padding="SAME",
            dimension_numbers=("NCHW", "OIHW", "NCHW"),
            precision=jax.lax.Precision.HIGHEST)
        return o + b.reshape(1, -1, 1, 1)

    def inorm_relu(h):
        mean = jnp.mean(h, axis=(2, 3), keepdims=True)
        var = jnp.mean((h - mean) ** 2, axis=(2, 3), keepdims=True)
        return jnp.maximum((h - mean) * jax.lax.rsqrt(var + EPS), 0.0)

    h = inorm_relu(conv(x, w1, b1))     # Dropout2d: identity in eval mode
    h = inorm_relu(conv(h, w2, b2))
    return h


# ----------------------------------------------------------------------------
if __name__ == "__main__":
    B, in_chans, out_chans, H, W = 2, 4, 32, 16, 16
    drop_prob = 0.0   # Dropout2d is identity in eval-mode forward

    key = jax.random.PRNGKey(0)
    ks = jax.random.split(key, 5)

    def uinit(k, shape, fan_in):
        bound = 1.0 / np.sqrt(fan_in)
        return jax.random.uniform(k, shape, jnp.float32, -bound, bound)

    x = jax.random.normal(ks[0], (B, in_chans, H, W), jnp.float32)
    w1 = uinit(ks[1], (out_chans, in_chans, K, K), in_chans * K * K)   # OIHW
    b1 = uinit(ks[2], (out_chans,), in_chans * K * K)
    w2 = uinit(ks[3], (out_chans, out_chans, K, K), out_chans * K * K)
    b2 = uinit(ks[4], (out_chans,), out_chans * K * K)

    out = jax.block_until_ready(convblock_forward(x, w1, b1, w2, b2))
    ref = jax.block_until_ready(reference_forward(x, w1, b1, w2, b2))

    np.testing.assert_allclose(np.asarray(out), np.asarray(ref),
                               rtol=1e-4, atol=1e-4)
    print("KERNEL_OK")
</pallas_src>

<mosaic_0001>
module attributes {stable_mosaic.version = 11 : i64} {
  func.func @convblock_kernel(%arg0: i32, %arg1: memref<1x16x16x4xf32, #tpu.memory_space<vmem>>, %arg2: memref<36x32xf32, #tpu.memory_space<vmem>>, %arg3: memref<1x32xf32, #tpu.memory_space<vmem>>, %arg4: memref<288x32xf32, #tpu.memory_space<vmem>>, %arg5: memref<1x32xf32, #tpu.memory_space<vmem>>, %arg6: memref<1x32x256xf32, #tpu.memory_space<vmem>>, %arg7: memref<18x18x4xf32, #tpu.memory_space<vmem>>, %arg8: memref<16x16x36xf32, #tpu.memory_space<vmem>>, %arg9: memref<18x18x32xf32, #tpu.memory_space<vmem>>, %arg10: memref<16x16x288xf32, #tpu.memory_space<vmem>>) attributes {dimension_semantics = [#tpu.dimension_semantics<parallel>], iteration_bounds = array<i64: 2>, scalar_prefetch = 0 : i64, scratch_operands = 4 : i64, tpu.core_type = #tpu.core_type<tc>, window_params = [{transform_indices = @transform_0, window_bounds = array<i64: 1, 16, 16, 4>}, {pipeline_mode = #tpu.pipeline_mode<synchronous>, transform_indices = @transform_1, window_bounds = array<i64: 36, 32>}, {pipeline_mode = #tpu.pipeline_mode<synchronous>, transform_indices = @transform_2, window_bounds = array<i64: 1, 32>}, {pipeline_mode = #tpu.pipeline_mode<synchronous>, transform_indices = @transform_3, window_bounds = array<i64: 288, 32>}, {pipeline_mode = #tpu.pipeline_mode<synchronous>, transform_indices = @transform_4, window_bounds = array<i64: 1, 32>}, {transform_indices = @transform_5, window_bounds = array<i64: 1, 32, 256>}]} {
    %cst = arith.constant 0.000000e+00 : f32
    %0 = vector.broadcast %cst : f32 to vector<18x18x4xf32>
    %c0 = arith.constant 0 : index
    %c0_0 = arith.constant 0 : index
    %c0_1 = arith.constant 0 : index
    %1 = vector.load %arg7[%c0, %c0_0, %c0_1] : memref<18x18x4xf32, #tpu.memory_space<vmem>>, vector<18x18x4xf32>
    tpu.vector_store %arg7[%c0, %c0_0, %c0_1], %0 {strides = array<i32>} : memref<18x18x4xf32, #tpu.memory_space<vmem>>, vector<18x18x4xf32>,
    %c0_2 = arith.constant 0 : index
    %c0_3 = arith.constant 0 : index
    %c0_4 = arith.constant 0 : index
    %c0_5 = arith.constant 0 : index
    %2 = vector.load %arg1[%c0_2, %c0_3, %c0_4, %c0_5] : memref<1x16x16x4xf32, #tpu.memory_space<vmem>>, vector<1x16x16x4xf32>
    %3 = vector.shape_cast %2 : vector<1x16x16x4xf32> to vector<16x16x4xf32>
    %c1 = arith.constant 1 : index
    %c1_6 = arith.constant 1 : index
    %c0_7 = arith.constant 0 : index
    %4 = vector.load %arg7[%c1, %c1_6, %c0_7] : memref<18x18x4xf32, #tpu.memory_space<vmem>>, vector<16x16x4xf32>
    tpu.vector_store %arg7[%c1, %c1_6, %c0_7], %3 {strides = array<i32>} : memref<18x18x4xf32, #tpu.memory_space<vmem>>, vector<16x16x4xf32>,
    %c0_8 = arith.constant 0 : index
    %c0_9 = arith.constant 0 : index
    %c0_10 = arith.constant 0 : index
    %5 = vector.load %arg7[%c0_8, %c0_9, %c0_10] : memref<18x18x4xf32, #tpu.memory_space<vmem>>, vector<16x16x4xf32>
    %c0_11 = arith.constant 0 : index
    %c0_12 = arith.constant 0 : index
    %c0_13 = arith.constant 0 : index
    %6 = vector.load %arg8[%c0_11, %c0_12, %c0_13] : memref<16x16x36xf32, #tpu.memory_space<vmem>>, vector<16x16x4xf32>
    tpu.vector_store %arg8[%c0_11, %c0_12, %c0_13], %5 {strides = array<i32>} : memref<16x16x36xf32, #tpu.memory_space<vmem>>, vector<16x16x4xf32>,
    %c0_14 = arith.constant 0 : index
    %c1_15 = arith.constant 1 : index
    %c0_16 = arith.constant 0 : index
    %7 = vector.load %arg7[%c0_14, %c1_15, %c0_16] : memref<18x18x4xf32, #tpu.memory_space<vmem>>, vector<16x16x4xf32>
    %c0_17 = arith.constant 0 : index
    %c0_18 = arith.constant 0 : index
    %c4 = arith.constant 4 : index
    %8 = vector.load %arg8[%c0_17, %c0_18, %c4] : memref<16x16x36xf32, #tpu.memory_space<vmem>>, vector<16x16x4xf32>
    tpu.vector_store %arg8[%c0_17, %c0_18, %c4], %7 {strides = array<i32>} : memref<16x16x36xf32, #tpu.memory_space<vmem>>, vector<16x16x4xf32>,
    %c0_19 = arith.constant 0 : index
    %c2 = arith.constant 2 : index
    %c0_20 = arith.constant 0 : index
    %9 = vector.load %arg7[%c0_19, %c2, %c0_20] : memref<18x18x4xf32, #tpu.memory_space<vmem>>, vector<16x16x4xf32>
    %c0_21 = arith.constant 0 : index
    %c0_22 = arith.constant 0 : index
    %c8 = arith.constant 8 : index
    %10 = vector.load %arg8[%c0_21, %c0_22, %c8] : memref<16x16x36xf32, #tpu.memory_space<vmem>>, vector<16x16x4xf32>
    tpu.vector_store %arg8[%c0_21, %c0_22, %c8], %9 {strides = array<i32>} : memref<16x16x36xf32, #tpu.memory_space<vmem>>, vector<16x16x4xf32>,
    %c1_23 = arith.constant 1 : index
    %c0_24 = arith.constant 0 : index
    %c0_25 = arith.constant 0 : index
    %11 = vector.load %arg7[%c1_23, %c0_24, %c0_25] : memref<18x18x4xf32, #tpu.memory_space<vmem>>, vector<16x16x4xf32>
    %c0_26 = arith.constant 0 : index
    %c0_27 = arith.constant 0 : index
    %c12 = arith.constant 12 : index
    %12 = vector.load %arg8[%c0_26, %c0_27, %c12] : memref<16x16x36xf32, #tpu.memory_space<vmem>>, vector<16x16x4xf32>
    tpu.vector_store %arg8[%c0_26, %c0_27, %c12], %11 {strides = array<i32>} : memref<16x16x36xf32, #tpu.memory_space<vmem>>, vector<16x16x4xf32>,
    %c1_28 = arith.constant 1 : index
    %c1_29 = arith.constant 1 : index
    %c0_30 = arith.constant 0 : index
    %13 = vector.load %arg7[%c1_28, %c1_29, %c0_30] : memref<18x18x4xf32, #tpu.memory_space<vmem>>, vector<16x16x4xf32>
    %c0_31 = arith.constant 0 : index
    %c0_32 = arith.constant 0 : index
    %c16 = arith.constant 16 : index
    %14 = vector.load %arg8[%c0_31, %c0_32, %c16] : memref<16x16x36xf32, #tpu.memory_space<vmem>>, vector<16x16x4xf32>
    tpu.vector_store %arg8[%c0_31, %c0_32, %c16], %13 {strides = array<i32>} : memref<16x16x36xf32, #tpu.memory_space<vmem>>, vector<16x16x4xf32>,
    %c1_33 = arith.constant 1 : index
    %c2_34 = arith.constant 2 : index
    %c0_35 = arith.constant 0 : index
    %15 = vector.load %arg7[%c1_33, %c2_34, %c0_35] : memref<18x18x4xf32, #tpu.memory_space<vmem>>, vector<16x16x4xf32>
    %c0_36 = arith.constant 0 : index
    %c0_37 = arith.constant 0 : index
    %c20 = arith.constant 20 : index
    %16 = vector.load %arg8[%c0_36, %c0_37, %c20] : memref<16x16x36xf32, #tpu.memory_space<vmem>>, vector<16x16x4xf32>
    tpu.vector_store %arg8[%c0_36, %c0_37, %c20], %15 {strides = array<i32>} : memref<16x16x36xf32, #tpu.memory_space<vmem>>, vector<16x16x4xf32>,
    %c2_38 = arith.constant 2 : index
    %c0_39 = arith.constant 0 : index
    %c0_40 = arith.constant 0 : index
    %17 = vector.load %arg7[%c2_38, %c0_39, %c0_40] : memref<18x18x4xf32, #tpu.memory_space<vmem>>, vector<16x16x4xf32>
    %c0_41 = arith.constant 0 : index
    %c0_42 = arith.constant 0 : index
    %c24 = arith.constant 24 : index
    %18 = vector.load %arg8[%c0_41, %c0_42, %c24] : memref<16x16x36xf32, #tpu.memory_space<vmem>>, vector<16x16x4xf32>
    tpu.vector_store %arg8[%c0_41, %c0_42, %c24], %17 {strides = array<i32>} : memref<16x16x36xf32, #tpu.memory_space<vmem>>, vector<16x16x4xf32>,
    %c2_43 = arith.constant 2 : index
    %c1_44 = arith.constant 1 : index
    %c0_45 = arith.constant 0 : index
    %19 = vector.load %arg7[%c2_43, %c1_44, %c0_45] : memref<18x18x4xf32, #tpu.memory_space<vmem>>, vector<16x16x4xf32>
    %c0_46 = arith.constant 0 : index
    %c0_47 = arith.constant 0 : index
    %c28 = arith.constant 28 : index
    %20 = vector.load %arg8[%c0_46, %c0_47, %c28] : memref<16x16x36xf32, #tpu.memory_space<vmem>>, vector<16x16x4xf32>
    tpu.vector_store %arg8[%c0_46, %c0_47, %c28], %19 {strides = array<i32>} : memref<16x16x36xf32, #tpu.memory_space<vmem>>, vector<16x16x4xf32>,
    %c2_48 = arith.constant 2 : index
    %c2_49 = arith.constant 2 : index
    %c0_50 = arith.constant 0 : index
    %21 = vector.load %arg7[%c2_48, %c2_49, %c0_50] : memref<18x18x4xf32, #tpu.memory_space<vmem>>, vector<16x16x4xf32>
    %c0_51 = arith.constant 0 : index
    %c0_52 = arith.constant 0 : index
    %c32 = arith.constant 32 : index
    %22 = vector.load %arg8[%c0_51, %c0_52, %c32] : memref<16x16x36xf32, #tpu.memory_space<vmem>>, vector<16x16x4xf32>
    tpu.vector_store %arg8[%c0_51, %c0_52, %c32], %21 {strides = array<i32>} : memref<16x16x36xf32, #tpu.memory_space<vmem>>, vector<16x16x4xf32>,
    %c0_53 = arith.constant 0 : index
    %c0_54 = arith.constant 0 : index
    %c0_55 = arith.constant 0 : index
    %23 = vector.load %arg8[%c0_53, %c0_54, %c0_55] : memref<16x16x36xf32, #tpu.memory_space<vmem>>, vector<16x16x36xf32>
    %24 = vector.shape_cast %23 : vector<16x16x36xf32> to vector<256x36xf32>
    %c0_56 = arith.constant 0 : index
    %c0_57 = arith.constant 0 : index
    %25 = vector.load %arg2[%c0_56, %c0_57] : memref<36x32xf32, #tpu.memory_space<vmem>>, vector<36x32xf32>
    %cst_58 = arith.constant dense<0.000000e+00> : vector<256x32xf32>
    %26 = tpu.matmul %24, %25, %cst_58 {dimension_numbers = #tpu.dot_dimension_numbers<[1], [0], [0], [1], [0, 0, 1, 1], [], []>} : vector<256x36xf32>, vector<36x32xf32>, vector<256x32xf32> -> vector<256x32xf32>
    %c0_59 = arith.constant 0 : index
    %c0_60 = arith.constant 0 : index
    %27 = vector.load %arg3[%c0_59, %c0_60] : memref<1x32xf32, #tpu.memory_space<vmem>>, vector<1x32xf32>
    %28 = vector.broadcast %27 : vector<1x32xf32> to vector<256x32xf32>
    %29 = arith.addf %26, %28 : vector<256x32xf32>
    %cst_61 = arith.constant dense<0.000000e+00> : vector<32xf32>
    %30 = vector.multi_reduction <add>, %29, %cst_61 [0] : vector<256x32xf32> to vector<32xf32>
    %31 = vector.shape_cast %30 : vector<32xf32> to vector<1x32xf32>
    %cst_62 = arith.constant 2.560000e+02 : f32
    %32 = vector.broadcast %cst_62 : f32 to vector<1x32xf32>
    %33 = arith.divf %31, %32 : vector<1x32xf32>
    %34 = vector.broadcast %33 : vector<1x32xf32> to vector<256x32xf32>
    %35 = arith.subf %29, %34 : vector<256x32xf32>
    %36 = arith.mulf %35, %35 : vector<256x32xf32>
    %cst_63 = arith.constant dense<0.000000e+00> : vector<32xf32>
    %37 = vector.multi_reduction <add>, %36, %cst_63 [0] : vector<256x32xf32> to vector<32xf32>
    %38 = vector.shape_cast %37 : vector<32xf32> to vector<1x32xf32>
    %cst_64 = arith.constant 2.560000e+02 : f32
    %39 = vector.broadcast %cst_64 : f32 to vector<1x32xf32>
    %40 = arith.divf %38, %39 : vector<1x32xf32>
    %cst_65 = arith.constant 9.99999974E-6 : f32
    %41 = vector.broadcast %cst_65 : f32 to vector<1x32xf32>
    %42 = arith.addf %40, %41 : vector<1x32xf32>
    %43 = math.rsqrt %42 : vector<1x32xf32>
    %44 = vector.broadcast %43 : vector<1x32xf32> to vector<256x32xf32>
    %45 = arith.mulf %35, %44 : vector<256x32xf32>
    %cst_66 = arith.constant 0.000000e+00 : f32
    %46 = vector.broadcast %cst_66 : f32 to vector<256x32xf32>
    %47 = arith.maximumf %45, %46 : vector<256x32xf32>
    %cst_67 = arith.constant 0.000000e+00 : f32
    %48 = vector.broadcast %cst_67 : f32 to vector<18x18x32xf32>
    %c0_68 = arith.constant 0 : index
    %c0_69 = arith.constant 0 : index
    %c0_70 = arith.constant 0 : index
    %49 = vector.load %arg9[%c0_68, %c0_69, %c0_70] : memref<18x18x32xf32, #tpu.memory_space<vmem>>, vector<18x18x32xf32>
    tpu.vector_store %arg9[%c0_68, %c0_69, %c0_70], %48 {strides = array<i32>} : memref<18x18x32xf32, #tpu.memory_space<vmem>>, vector<18x18x32xf32>,
    %50 = vector.shape_cast %47 : vector<256x32xf32> to vector<16x16x32xf32>
    %c1_71 = arith.constant 1 : index
    %c1_72 = arith.constant 1 : index
    %c0_73 = arith.constant 0 : index
    %51 = vector.load %arg9[%c1_71, %c1_72, %c0_73] : memref<18x18x32xf32, #tpu.memory_space<vmem>>, vector<16x16x32xf32>
    tpu.vector_store %arg9[%c1_71, %c1_72, %c0_73], %50 {strides = array<i32>} : memref<18x18x32xf32, #tpu.memory_space<vmem>>, vector<16x16x32xf32>,
    %c0_74 = arith.constant 0 : index
    %c0_75 = arith.constant 0 : index
    %c0_76 = arith.constant 0 : index
    %52 = vector.load %arg9[%c0_74, %c0_75, %c0_76] : memref<18x18x32xf32, #tpu.memory_space<vmem>>, vector<16x16x32xf32>
    %c0_77 = arith.constant 0 : index
    %c0_78 = arith.constant 0 : index
    %c0_79 = arith.constant 0 : index
    %53 = vector.load %arg10[%c0_77, %c0_78, %c0_79] : memref<16x16x288xf32, #tpu.memory_space<vmem>>, vector<16x16x32xf32>
    tpu.vector_store %arg10[%c0_77, %c0_78, %c0_79], %52 {strides = array<i32>} : memref<16x16x288xf32, #tpu.memory_space<vmem>>, vector<16x16x32xf32>,
    %c0_80 = arith.constant 0 : index
    %c1_81 = arith.constant 1 : index
    %c0_82 = arith.constant 0 : index
    %54 = vector.load %arg9[%c0_80, %c1_81, %c0_82] : memref<18x18x32xf32, #tpu.memory_space<vmem>>, vector<16x16x32xf32>
    %c0_83 = arith.constant 0 : index
    %c0_84 = arith.constant 0 : index
    %c32_85 = arith.constant 32 : index
    %55 = vector.load %arg10[%c0_83, %c0_84, %c32_85] : memref<16x16x288xf32, #tpu.memory_space<vmem>>, vector<16x16x32xf32>
    tpu.vector_store %arg10[%c0_83, %c0_84, %c32_85], %54 {strides = array<i32>} : memref<16x16x288xf32, #tpu.memory_space<vmem>>, vector<16x16x32xf32>,
    %c0_86 = arith.constant 0 : index
    %c2_87 = arith.constant 2 : index
    %c0_88 = arith.constant 0 : index
    %56 = vector.load %arg9[%c0_86, %c2_87, %c0_88] : memref<18x18x32xf32, #tpu.memory_space<vmem>>, vector<16x16x32xf32>
    %c0_89 = arith.constant 0 : index
    %c0_90 = arith.constant 0 : index
    %c64 = arith.constant 64 : index
    %57 = vector.load %arg10[%c0_89, %c0_90, %c64] : memref<16x16x288xf32, #tpu.memory_space<vmem>>, vector<16x16x32xf32>
    tpu.vector_store %arg10[%c0_89, %c0_90, %c64], %56 {strides = array<i32>} : memref<16x16x288xf32, #tpu.memory_space<vmem>>, vector<16x16x32xf32>,
    %c1_91 = arith.constant 1 : index
    %c0_92 = arith.constant 0 : index
    %c0_93 = arith.constant 0 : index
    %58 = vector.load %arg9[%c1_91, %c0_92, %c0_93] : memref<18x18x32xf32, #tpu.memory_space<vmem>>, vector<16x16x32xf32>
    %c0_94 = arith.constant 0 : index
    %c0_95 = arith.constant 0 : index
    %c96 = arith.constant 96 : index
    %59 = vector.load %arg10[%c0_94, %c0_95, %c96] : memref<16x16x288xf32, #tpu.memory_space<vmem>>, vector<16x16x32xf32>
    tpu.vector_store %arg10[%c0_94, %c0_95, %c96], %58 {strides = array<i32>} : memref<16x16x288xf32, #tpu.memory_space<vmem>>, vector<16x16x32xf32>,
    %c1_96 = arith.constant 1 : index
    %c1_97 = arith.constant 1 : index
    %c0_98 = arith.constant 0 : index
    %60 = vector.load %arg9[%c1_96, %c1_97, %c0_98] : memref<18x18x32xf32, #tpu.memory_space<vmem>>, vector<16x16x32xf32>
    %c0_99 = arith.constant 0 : index
    %c0_100 = arith.constant 0 : index
    %c128 = arith.constant 128 : index
    %61 = vector.load %arg10[%c0_99, %c0_100, %c128] : memref<16x16x288xf32, #tpu.memory_space<vmem>>, vector<16x16x32xf32>
    tpu.vector_store %arg10[%c0_99, %c0_100, %c128], %60 {strides = array<i32>} : memref<16x16x288xf32, #tpu.memory_space<vmem>>, vector<16x16x32xf32>,
    %c1_101 = arith.constant 1 : index
    %c2_102 = arith.constant 2 : index
    %c0_103 = arith.constant 0 : index
    %62 = vector.load %arg9[%c1_101, %c2_102, %c0_103] : memref<18x18x32xf32, #tpu.memory_space<vmem>>, vector<16x16x32xf32>
    %c0_104 = arith.constant 0 : index
    %c0_105 = arith.constant 0 : index
    %c160 = arith.constant 160 : index
    %63 = vector.load %arg10[%c0_104, %c0_105, %c160] : memref<16x16x288xf32, #tpu.memory_space<vmem>>, vector<16x16x32xf32>
    tpu.vector_store %arg10[%c0_104, %c0_105, %c160], %62 {strides = array<i32>} : memref<16x16x288xf32, #tpu.memory_space<vmem>>, vector<16x16x32xf32>,
    %c2_106 = arith.constant 2 : index
    %c0_107 = arith.constant 0 : index
    %c0_108 = arith.constant 0 : index
    %64 = vector.load %arg9[%c2_106, %c0_107, %c0_108] : memref<18x18x32xf32, #tpu.memory_space<vmem>>, vector<16x16x32xf32>
    %c0_109 = arith.constant 0 : index
    %c0_110 = arith.constant 0 : index
    %c192 = arith.constant 192 : index
    %65 = vector.load %arg10[%c0_109, %c0_110, %c192] : memref<16x16x288xf32, #tpu.memory_space<vmem>>, vector<16x16x32xf32>
    tpu.vector_store %arg10[%c0_109, %c0_110, %c192], %64 {strides = array<i32>} : memref<16x16x288xf32, #tpu.memory_space<vmem>>, vector<16x16x32xf32>,
    %c2_111 = arith.constant 2 : index
    %c1_112 = arith.constant 1 : index
    %c0_113 = arith.constant 0 : index
    %66 = vector.load %arg9[%c2_111, %c1_112, %c0_113] : memref<18x18x32xf32, #tpu.memory_space<vmem>>, vector<16x16x32xf32>
    %c0_114 = arith.constant 0 : index
    %c0_115 = arith.constant 0 : index
    %c224 = arith.constant 224 : index
    %67 = vector.load %arg10[%c0_114, %c0_115, %c224] : memref<16x16x288xf32, #tpu.memory_space<vmem>>, vector<16x16x32xf32>
    tpu.vector_store %arg10[%c0_114, %c0_115, %c224], %66 {strides = array<i32>} : memref<16x16x288xf32, #tpu.memory_space<vmem>>, vector<16x16x32xf32>,
    %c2_116 = arith.constant 2 : index
    %c2_117 = arith.constant 2 : index
    %c0_118 = arith.constant 0 : index
    %68 = vector.load %arg9[%c2_116, %c2_117, %c0_118] : memref<18x18x32xf32, #tpu.memory_space<vmem>>, vector<16x16x32xf32>
    %c0_119 = arith.constant 0 : index
    %c0_120 = arith.constant 0 : index
    %c256 = arith.constant 256 : index
    %69 = vector.load %arg10[%c0_119, %c0_120, %c256] : memref<16x16x288xf32, #tpu.memory_space<vmem>>, vector<16x16x32xf32>
    tpu.vector_store %arg10[%c0_119, %c0_120, %c256], %68 {strides = array<i32>} : memref<16x16x288xf32, #tpu.memory_space<vmem>>, vector<16x16x32xf32>,
    %c0_121 = arith.constant 0 : index
    %c0_122 = arith.constant 0 : index
    %c0_123 = arith.constant 0 : index
    %70 = vector.load %arg10[%c0_121, %c0_122, %c0_123] : memref<16x16x288xf32, #tpu.memory_space<vmem>>, vector<16x16x288xf32>
    %71 = vector.shape_cast %70 : vector<16x16x288xf32> to vector<256x288xf32>
    %c0_124 = arith.constant 0 : index
    %c0_125 = arith.constant 0 : index
    %72 = vector.load %arg4[%c0_124, %c0_125] : memref<288x32xf32, #tpu.memory_space<vmem>>, vector<288x32xf32>
    %cst_126 = arith.constant dense<0.000000e+00> : vector<256x32xf32>
    %73 = tpu.matmul %71, %72, %cst_126 {dimension_numbers = #tpu.dot_dimension_numbers<[1], [0], [0], [1], [0, 0, 1, 1], [], []>} : vector<256x288xf32>, vector<288x32xf32>, vector<256x32xf32> -> vector<256x32xf32>
    %c0_127 = arith.constant 0 : index
    %c0_128 = arith.constant 0 : index
    %74 = vector.load %arg5[%c0_127, %c0_128] : memref<1x32xf32, #tpu.memory_space<vmem>>, vector<1x32xf32>
    %75 = vector.broadcast %74 : vector<1x32xf32> to vector<256x32xf32>
    %76 = arith.addf %73, %75 : vector<256x32xf32>
    %cst_129 = arith.constant dense<0.000000e+00> : vector<32xf32>
    %77 = vector.multi_reduction <add>, %76, %cst_129 [0] : vector<256x32xf32> to vector<32xf32>
    %78 = vector.shape_cast %77 : vector<32xf32> to vector<1x32xf32>
    %cst_130 = arith.constant 2.560000e+02 : f32
    %79 = vector.broadcast %cst_130 : f32 to vector<1x32xf32>
    %80 = arith.divf %78, %79 : vector<1x32xf32>
    %81 = vector.broadcast %80 : vector<1x32xf32> to vector<256x32xf32>
    %82 = arith.subf %76, %81 : vector<256x32xf32>
    %83 = arith.mulf %82, %82 : vector<256x32xf32>
    %cst_131 = arith.constant dense<0.000000e+00> : vector<32xf32>
    %84 = vector.multi_reduction <add>, %83, %cst_131 [0] : vector<256x32xf32> to vector<32xf32>
    %85 = vector.shape_cast %84 : vector<32xf32> to vector<1x32xf32>
    %cst_132 = arith.constant 2.560000e+02 : f32
    %86 = vector.broadcast %cst_132 : f32 to vector<1x32xf32>
    %87 = arith.divf %85, %86 : vector<1x32xf32>
    %cst_133 = arith.constant 9.99999974E-6 : f32
    %88 = vector.broadcast %cst_133 : f32 to vector<1x32xf32>
    %89 = arith.addf %87, %88 : vector<1x32xf32>
    %90 = math.rsqrt %89 : vector<1x32xf32>
    %91 = vector.broadcast %90 : vector<1x32xf32> to vector<256x32xf32>
    %92 = arith.mulf %82, %91 : vector<256x32xf32>
    %cst_134 = arith.constant 0.000000e+00 : f32
    %93 = vector.broadcast %cst_134 : f32 to vector<256x32xf32>
    %94 = arith.maximumf %92, %93 : vector<256x32xf32>
    %95 = tpu.transpose %94, [1, 0] : vector<256x32xf32> -> vector<32x256xf32>
    %c0_135 = arith.constant 0 : index
    %c0_136 = arith.constant 0 : index
    %c0_137 = arith.constant 0 : index
    %96 = vector.load %arg6[%c0_135, %c0_136, %c0_137] : memref<1x32x256xf32, #tpu.memory_space<vmem>>, vector<1x32x256xf32>
    %97 = vector.shape_cast %96 : vector<1x32x256xf32> to vector<32x256xf32>
    %98 = vector.shape_cast %95 : vector<32x256xf32> to vector<1x32x256xf32>
    tpu.vector_store %arg6[%c0_135, %c0_136, %c0_137], %98 {strides = array<i32>} : memref<1x32x256xf32, #tpu.memory_space<vmem>>, vector<1x32x256xf32>,
    return
  }
  func.func @transform_0(%arg0: i32) -> (i32, i32, i32, i32) {
    %c0_i32 = arith.constant 0 : i32
    %c0_i32_0 = arith.constant 0 : i32
    %c0_i32_1 = arith.constant 0 : i32
    %c0_i32_2 = arith.constant 0 : i32
    return %arg0, %c0_i32, %c0_i32_0, %c0_i32_1 : i32, i32, i32, i32
  }
  func.func @transform_1(%arg0: i32) -> (i32, i32) {
    %c0_i32 = arith.constant 0 : i32
    %c0_i32_0 = arith.constant 0 : i32
    %c0_i32_1 = arith.constant 0 : i32
    return %c0_i32, %c0_i32_0 : i32, i32
  }
  func.func @transform_2(%arg0: i32) -> (i32, i32) {
    %c0_i32 = arith.constant 0 : i32
    %c0_i32_0 = arith.constant 0 : i32
    %c0_i32_1 = arith.constant 0 : i32
    return %c0_i32, %c0_i32_0 : i32, i32
  }
  func.func @transform_3(%arg0: i32) -> (i32, i32) {
    %c0_i32 = arith.constant 0 : i32
    %c0_i32_0 = arith.constant 0 : i32
    %c0_i32_1 = arith.constant 0 : i32
    return %c0_i32, %c0_i32_0 : i32, i32
  }
  func.func @transform_4(%arg0: i32) -> (i32, i32) {
    %c0_i32 = arith.constant 0 : i32
    %c0_i32_0 = arith.constant 0 : i32
    %c0_i32_1 = arith.constant 0 : i32
    return %c0_i32, %c0_i32_0 : i32, i32
  }
  func.func @transform_5(%arg0: i32) -> (i32, i32, i32) {
    %c0_i32 = arith.constant 0 : i32
    %c0_i32_0 = arith.constant 0 : i32
    %c0_i32_1 = arith.constant 0 : i32
    return %arg0, %c0_i32, %c0_i32_0 : i32, i32, i32
  }
}

</mosaic_0001>

<bundles_post_ra>
// kernel: convblock_forward.1
= control target key start
LH: loop header
LB: loop body
LE: loop exit
PB: predicated region body
PF: predicated region fallthrough
CT: control target
= control target key end

     0   :  { %s5552_s18 = smov 0   ;;  %s8664_s0 = inlined_call_operand.vmem [shape: f32[2,16,16,4], index: 0, kind: input, shape index: {}]   ;;  %s8665_s1 = inlined_call_operand.vmem [shape: f32[36,32], index: 1, kind: input, shape index: {}]   ;;  %s8666_s2 = inlined_call_operand.vmem [shape: f32[1,32], index: 2, kind: input, shape index: {}]   ;;  %s8667_s3 = inlined_call_operand.vmem [shape: f32[288,32], index: 3, kind: input, shape index: {}]   ;;  %s8668_s4 = inlined_call_operand.vmem [shape: f32[1,32], index: 4, kind: input, shape index: {}]   ;;  %s8669_s5 = inlined_call_operand.vmem [shape: f32[2,32,256], index: 5, kind: output, shape index: {}]  }
   0x1 LB: > { %s5115_s19 = sadd.s32 4294967295, %s5508_s18   ;;  %p5119_p0 = scmp.ge.s32.totalorder %s5508_s18, 1  ;;  %s5508_s18 = sphi %s5552_s18, %s15_s18  }
   0x2   : > { %p187_p1 = scmp.lt.s32.totalorder %s5508_s18, 3 }
   0x4   : > { %p188_p2 = pnand %p5119_p0, %p187_p1 }
   0x6   : > { %191 = sbr.rel (%p188_p2) target bundleno = 2006 (0x7d6), region = 40 }
   0xd   : > { %vm225_vm0 = vcmask 31744   ;;  %vm228_vm1 = vcmask 25600   ;;  %v5510_v0 = vmov 0.0   ;;  %p215_p3 = scmp.lt.s32.totalorder %s5115_s19, 1  ;;  %s5511_s24 = smov 8   ;;  %v1987_v35 = vld [vmem:[%s8665_s1] sm:$0xff] }
   0xe   : > { %226 = vst.msk [vmem:[#allocation2] sm:$0xff] %vm225_vm0, %v5510_v0  ;;  %227 = vst.msk [vmem:[#allocation2 + $0x8] sm:$0xff] %vm225_vm0, %v5510_v0  ;;  %s5512_s25 = smov 4   ;;  %s5513_s26 = smov 12   ;;  %v1988_v36 = vld [vmem:[%s8665_s1 + $0x8] sm:$0xff]  ;;  %v1989_v39 = vld [vmem:[%s8665_s1 + $0x10] sm:$0xff] }
   0xf   : > { %230 = vst.msk [vmem:[#allocation2 + $0x18] sm:$0xff] %vm225_vm0, %v5510_v0  ;;  %231 = vst.msk [vmem:[#allocation2 + $0x20] sm:$0xff] %vm225_vm0, %v5510_v0  ;;  %s8712_s19 = smov (!%p215_p3, %s5115_s19), 1  ;;  %s5514_s27 = smov 16   ;;  %v5382_v38 = vpack.c.bf16 %v1988_v36, %v1987_v35  ;;  %v1990_v40 = vld [vmem:[%s8665_s1 + $0x18] sm:$0xff]  ;;  %vm2096_vm2 = vcmask 1043456  }
  0x10   : > { %233 = vst.msk [vmem:[#allocation2 + $0x30] sm:$0xff] %vm225_vm0, %v5510_v0  ;;  %234 = vst.msk [vmem:[#allocation2 + $0x38] sm:$0xff] %vm225_vm0, %v5510_v0  ;;  %s5193_s20 = sshll.u32 %s8712_s19, 8  ;;  %s5515_s28 = smov 20   ;;  %v5386_v41 = vpack.c.bf16 %v1990_v40, %v1989_v39  ;;  %v1991_v44 = vld [vmem:[%s8665_s1 + $0x20] sm:$0xf] }
  0x11   : > { %236 = vst.msk [vmem:[#allocation2 + $0x48] sm:$0xff] %vm225_vm0, %v5510_v0  ;;  %237 = vst.msk [vmem:[#allocation2 + $0x50] sm:$0xff] %vm225_vm0, %v5510_v0  ;;  %s5678_s23 = scalar_lea.vmem %s8664_s0, %s5193_s20  ;;  %s5516_s29 = smov 24   ;;  %5383 = vmatprep.subr.bf16.mxu0 %v5382_v38  ;;  %vm570_vm3 = vcmask 64544   ;;  %vm763_vm4 = vcmask 97344   ;;  %vm956_vm5 = vcmask 130144  }
  0x12   : > { %239 = vst.msk [vmem:[#allocation2 + $0x60] sm:$0xff] %vm225_vm0, %v5510_v0  ;;  %240 = vst.msk [vmem:[#allocation2 + $0x68] sm:$0xff] %vm225_vm0, %v5510_v0  ;;  %v281_v1 = vld [vmem:[%s5678_s23] sm:$0xff]  ;;  %v282_v2 = vld [vmem:[%s5678_s23 + $0x8] sm:$0xff]  ;;  %s5517_s9 = smov 28   ;;  %5385 = vmatpush3.bf16.msra.mxu0 %v5382_v38  ;;  %s5518_s14 = smov 32  }
  0x13   : > { %242 = vst.msk [vmem:[#allocation2 + $0x78] sm:$0xff] %vm225_vm0, %v5510_v0  ;;  %243 = vst.msk [vmem:[#allocation2 + $0x80] sm:$0xff] %vm225_vm0, %v5510_v0  ;;  %v283_v3 = vld [vmem:[%s5678_s23 + $0x10] sm:$0xff]  ;;  %v284_v8 = vld [vmem:[%s5678_s23 + $0x18] sm:$0xff]  ;;  %5387 = vmatprep.subr.bf16.mxu0 %v5386_v41  ;;  %vm1149_vm6 = vcmask 162944   ;;  %vm1342_vm7 = vcmask 195744  }
  0x14   : > { %245 = vst.msk [vmem:[#allocation2 + $0x90] sm:$0xff] %vm225_vm0, %v5510_v0  ;;  %246 = vst.msk [vmem:[#allocation2 + $0x98] sm:$0xff] %vm225_vm0, %v5510_v0  ;;  %v285_v9 = vld [vmem:[%s5678_s23 + $0x20] sm:$0xff]  ;;  %v286_v10 = vld [vmem:[%s5678_s23 + $0x28] sm:$0xff]  ;;  %vm1536_vm8 = vcmask 228544   ;;  %vm1729_vm9 = vcmask 261344  }
  0x15   : > { %248 = vst.msk [vmem:[#allocation2 + $0xa8] sm:$0xff] %vm225_vm0, %v5510_v0  ;;  %249 = vst.msk [vmem:[#allocation2 + $0xb0] sm:$0xff] %vm225_vm0, %v5510_v0  ;;  %v603_v4 = vld [vmem:[#allocation2 + $0x2] sm:$0xff]  ;;  %v287_v11 = vld [vmem:[%s5678_s23 + $0x30] sm:$0xff]  ;;  %vm1922_vm10 = vcmask 294144   ;;  %vm1999_vm11 = vcmask 293888  }
  0x16   : > { %251 = vst.msk [vmem:[#allocation2 + $0xc0] sm:$0xff] %vm225_vm0, %v5510_v0  ;;  %252 = vst.msk [vmem:[#allocation2 + $0xc8] sm:$0xff] %vm225_vm0, %v5510_v0  ;;  %v410_v5 = vld [vmem:[#allocation2 + $0x1] sm:$0xff]  ;;  %667 = vrot.lane.b32.xlu1 %v603_v4, %s5511_s24  ;;  %v288_v12 = vld [vmem:[%s5678_s23 + $0x38] sm:$0xff]  ;;  %5389 = vmatpush3.bf16.msra.mxu0 %v5386_v41  ;;  %vm2325_vm12 = vcmask 261120   ;;  %vm2599_vm13 = vcmask 254976  }
  0x17   : > { %254 = vst.msk [vmem:[#allocation2 + $0xd8] sm:$0xff] %vm225_vm0, %v5510_v0  ;;  %255 = vst.msk [vmem:[#allocation2 + $0xe0] sm:$0xff] %vm225_vm0, %v5510_v0  ;;  %474 = vrot.lane.b32.xlu0 %v410_v5, %s5512_s25  ;;  %v346_v13 = vld [vmem:[#allocation2] sm:$0xff]  ;;  %v347_v14 = vld [vmem:[#allocation2 + $0x8] sm:$0xff]  ;;  %5276 = vmatprep.subr.msk.mxu0 %vm2096_vm2, %v1991_v44  ;;  %vm2909_vm14 = vcmask 523520   ;;  %vm3102_vm15 = vcmask 785920  }
  0x18   : > { %257 = vst.msk [vmem:[#allocation2 + $0xf0] sm:$0xff] %vm225_vm0, %v5510_v0  ;;  %258 = vst.msk [vmem:[#allocation2 + $0xf8] sm:$0xff] %vm225_vm0, %v5510_v0  ;;  %v289_v15 = vld [vmem:[%s5678_s23 + $0x40] sm:$0xff]  ;;  %v290_v16 = vld [vmem:[%s5678_s23 + $0x48] sm:$0xff]  ;;  %s5194_s30 = sshll.u32 %s8712_s19, 6 }
  0x19   : > { %260 = vst.msk [vmem:[#allocation2 + $0x108] sm:$0xff] %vm225_vm0, %v5510_v0  ;;  %261 = vst.msk [vmem:[#allocation2 + $0x110] sm:$0xff] %vm225_vm0, %v5510_v0  ;;  %v291_v30 = vld [vmem:[%s5678_s23 + $0x50] sm:$0xff]  ;;  %v292_v32 = vld [vmem:[%s5678_s23 + $0x58] sm:$0xff]  ;;  %s224_s8 = scalar_lea.vmem %s8669_s5, %s5194_s30 }
  0x1a   : > { %263 = vst.msk [vmem:[#allocation2 + $0x120] sm:$0xff] %vm225_vm0, %v5510_v0  ;;  %264 = vst.msk [vmem:[#allocation2 + $0x128] sm:$0xff] %vm225_vm0, %v5510_v0  ;;  %5277 = vmatpush3.msk.msra.mxu0 %vm2096_vm2, %v1991_v44  ;;  %v293_v46 = vld [vmem:[%s5678_s23 + $0x60] sm:$0xff]  ;;  %v294_v48 = vld [vmem:[%s5678_s23 + $0x68] sm:$0xff] }
  0x1b   : > { %266 = vst.msk [vmem:[#allocation2 + $0x138] sm:$0xff] %vm225_vm0, %v5510_v0  ;;  %267 = vst.msk [vmem:[#allocation2 + $0x140] sm:$0xff] %vm225_vm0, %v5510_v0  ;;  %v295_v54 = vld [vmem:[%s5678_s23 + $0x70] sm:$0xff]  ;;  %v296_v56 = vld [vmem:[%s5678_s23 + $0x78] sm:$0xff] }
  0x1c   : > { %269 = vst.msk [vmem:[#allocation2 + $0x150] sm:$0xff] %vm225_vm0, %v5510_v0  ;;  %270 = vst.msk [vmem:[#allocation2 + $0x158] sm:$0xff] %vm225_vm0, %v5510_v0  ;;  %v297_v62 = vld [vmem:[%s5678_s23 + $0x80] sm:$0xff]  ;;  %v298_v5 = vld [vmem:[%s5678_s23 + $0x88] sm:$0xff] }
  0x1d   : > { %272 = vst.msk [vmem:[#allocation2 + $0x168] sm:$0xff] %vm225_vm0, %v5510_v0  ;;  %273 = vst.msk [vmem:[#allocation2 + $0x170] sm:$0xff] %vm225_vm0, %v5510_v0 }
  0x1e   : > { %275 = vst.msk [vmem:[#allocation2 + $0x180] sm:$0xff] %vm225_vm0, %v5510_v0  ;;  %276 = vst.msk [vmem:[#allocation2 + $0x188] sm:$0xff] %vm225_vm0, %v5510_v0 }
  0x1f   : > { %278 = vst.msk [vmem:[#allocation2 + $0x198] sm:$0xff] %vm225_vm0, %v5510_v0  ;;  %279 = vst.msk [vmem:[#allocation2 + $0x1a0] sm:$0xff] %vm225_vm0, %v5510_v0 }
  0x20   : > { %229 = vst.msk [vmem:[#allocation2 + $0x10] sm:$0x3] %vm228_vm1, %v5510_v0  ;;  %232 = vst.msk [vmem:[#allocation2 + $0x28] sm:$0x3] %vm228_vm1, %v5510_v0 }
  0x21   : > { %235 = vst.msk [vmem:[#allocation2 + $0x40] sm:$0x3] %vm228_vm1, %v5510_v0  ;;  %238 = vst.msk [vmem:[#allocation2 + $0x58] sm:$0x3] %vm228_vm1, %v5510_v0 }
  0x22   : > { %241 = vst.msk [vmem:[#allocation2 + $0x70] sm:$0x3] %vm228_vm1, %v5510_v0  ;;  %244 = vst.msk [vmem:[#allocation2 + $0x88] sm:$0x3] %vm228_vm1, %v5510_v0 }
  0x23   : > { %247 = vst.msk [vmem:[#allocation2 + $0xa0] sm:$0x3] %vm228_vm1, %v5510_v0  ;;  %250 = vst.msk [vmem:[#allocation2 + $0xb8] sm:$0x3] %vm228_vm1, %v5510_v0 }
  0x24   : > { %253 = vst.msk [vmem:[#allocation2 + $0xd0] sm:$0x3] %vm228_vm1, %v5510_v0  ;;  %256 = vst.msk [vmem:[#allocation2 + $0xe8] sm:$0x3] %vm228_vm1, %v5510_v0 }
  0x25   : > { %259 = vst.msk [vmem:[#allocation2 + $0x100] sm:$0x3] %vm228_vm1, %v5510_v0  ;;  %262 = vst.msk [vmem:[#allocation2 + $0x118] sm:$0x3] %vm228_vm1, %v5510_v0 }
  0x26   : > { %265 = vst.msk [vmem:[#allocation2 + $0x130] sm:$0x3] %vm228_vm1, %v5510_v0  ;;  %268 = vst.msk [vmem:[#allocation2 + $0x148] sm:$0x3] %vm228_vm1, %v5510_v0 }
  0x27   : > { %271 = vst.msk [vmem:[#allocation2 + $0x160] sm:$0x3] %vm228_vm1, %v5510_v0  ;;  %274 = vst.msk [vmem:[#allocation2 + $0x178] sm:$0x3] %vm228_vm1, %v5510_v0  ;;  %v604_v6 = vld [vmem:[#allocation2 + $0xa] sm:$0xff] }
  0x28   : > { %277 = vst.msk [vmem:[#allocation2 + $0x190] sm:$0x3] %vm228_vm1, %v5510_v0  ;;  %280 = vst.msk [vmem:[#allocation2 + $0x1a8] sm:$0x3] %vm228_vm1, %v5510_v0  ;;  %v411_v7 = vld [vmem:[#allocation2 + $0x9] sm:$0xff]  ;;  %669 = vrot.lane.b32.xlu1 %v604_v6, %s5511_s24 }
  0x29   : > { %314 = vst.msk [vmem:[#allocation2 + $0x19] sm:$0xff] %vm225_vm0, %v281_v1  ;;  %315 = vst.msk [vmem:[#allocation2 + $0x21] sm:$0xff] %vm225_vm0, %v282_v2  ;;  %476 = vrot.lane.b32.xlu0 %v411_v7, %s5512_s25 }
  0x2a   : > { %316 = vst.msk [vmem:[#allocation2 + $0x31] sm:$0xff] %vm225_vm0, %v283_v3  ;;  %317 = vst.msk [vmem:[#allocation2 + $0x39] sm:$0xff] %vm225_vm0, %v284_v8 }
  0x2b   : > { %318 = vst.msk [vmem:[#allocation2 + $0x49] sm:$0xff] %vm225_vm0, %v285_v9  ;;  %319 = vst.msk [vmem:[#allocation2 + $0x51] sm:$0xff] %vm225_vm0, %v286_v10 }
  0x2c   : > { %320 = vst.msk [vmem:[#allocation2 + $0x61] sm:$0xff] %vm225_vm0, %v287_v11  ;;  %321 = vst.msk [vmem:[#allocation2 + $0x69] sm:$0xff] %vm225_vm0, %v288_v12 }
  0x2d   : > { %378 = vst.msk [vmem:[#allocation3] sm:$0xff] %vm225_vm0, %v346_v13  ;;  %379 = vst.msk [vmem:[#allocation3 + $0x8] sm:$0xff] %vm225_vm0, %v347_v14 }
  0x2e   : > { %322 = vst.msk [vmem:[#allocation2 + $0x79] sm:$0xff] %vm225_vm0, %v289_v15  ;;  %323 = vst.msk [vmem:[#allocation2 + $0x81] sm:$0xff] %vm225_vm0, %v290_v16 }
  0x2f   : > { %324 = vst.msk [vmem:[#allocation2 + $0x91] sm:$0xff] %vm225_vm0, %v291_v30  ;;  %325 = vst.msk [vmem:[#allocation2 + $0x99] sm:$0xff] %vm225_vm0, %v292_v32 }
  0x30   : > { %v797_v17 = vld [vmem:[#allocation2 + $0x20] sm:$0xff]  ;;  %v796_v18 = vld [vmem:[#allocation2 + $0x18] sm:$0xff]  ;;  %326 = vst.msk [vmem:[#allocation2 + $0xa9] sm:$0xff] %vm225_vm0, %v293_v46  ;;  %327 = vst.msk [vmem:[#allocation2 + $0xb1] sm:$0xff] %vm225_vm0, %v294_v48 }
  0x31   : > { %380 = vst.msk [vmem:[#allocation3 + $0x10] sm:$0xff] %vm225_vm0, %v796_v18  ;;  %381 = vst.msk [vmem:[#allocation3 + $0x18] sm:$0xff] %vm225_vm0, %v797_v17  ;;  %862 = vrot.lane.b32.xlu1 %v797_v17, %s5513_s26  ;;  %860 = vrot.lane.b32.xlu0 %v796_v18, %s5513_s26  ;;  %v1376_v19 = vld [vmem:[#allocation2 + $0x30] sm:$0xff]  ;;  %v1377_v20 = vld [vmem:[#allocation2 + $0x38] sm:$0xff] }
  0x32   : > { %v989_v21 = vld [vmem:[#allocation2 + $0x19] sm:$0xff]  ;;  %382 = vst.msk [vmem:[#allocation3 + $0x20] sm:$0xff] %vm225_vm0, %v1376_v19  ;;  %383 = vst.msk [vmem:[#allocation3 + $0x28] sm:$0xff] %vm225_vm0, %v1377_v20  ;;  %v5712_v22 = vld [vmem:[#allocation2 + $0x48] sm:$0xff] }
  0x33   : > { %v5714_v23 = vld [vmem:[#allocation2 + $0x50] sm:$0xff]  ;;  %384 = vst.msk [vmem:[#allocation3 + $0x30] sm:$0xff] %vm225_vm0, %v5712_v22  ;;  %v5722_v24 = vld [vmem:[#allocation2 + $0x60] sm:$0xff]  ;;  %v5724_v25 = vld [vmem:[#allocation2 + $0x68] sm:$0xff] }
  0x34   : > { %385 = vst.msk [vmem:[#allocation3 + $0x38] sm:$0xff] %vm225_vm0, %v5714_v23  ;;  %v990_v26 = vld [vmem:[#allocation2 + $0x21] sm:$0xff]  ;;  %386 = vst.msk [vmem:[#allocation3 + $0x40] sm:$0xff] %vm225_vm0, %v5722_v24  ;;  %v1569_v34 = vld [vmem:[#allocation2 + $0x31] sm:$0xff] }
  0x35   : > { %1053 = vrot.lane.b32.xlu0 %v989_v21, %s5514_s27  ;;  %478 = vrot.lane.b32.xlu1 %v989_v21, %s5512_s25  ;;  %v1182_v27 = vld [vmem:[#allocation2 + $0x1a] sm:$0xff]  ;;  %387 = vst.msk [vmem:[#allocation3 + $0x48] sm:$0xff] %vm225_vm0, %v5724_v25  ;;  %v1183_v31 = vld [vmem:[#allocation2 + $0x22] sm:$0xff]  ;;  %v1762_v43 = vld [vmem:[#allocation2 + $0x32] sm:$0xff] }
  0x36   : > { %v5730_v28 = vld [vmem:[#allocation2 + $0x78] sm:$0xff]  ;;  %v5732_v29 = vld [vmem:[#allocation2 + $0x80] sm:$0xff]  ;;  %v5747_v33 = vld [vmem:[#allocation2 + $0x90] sm:$0xff]  ;;  %328 = vst.msk [vmem:[#allocation2 + $0xc1] sm:$0xff] %vm225_vm0, %v295_v54 }
  0x37   : > { %388 = vst.msk [vmem:[#allocation3 + $0x50] sm:$0xff] %vm225_vm0, %v5730_v28  ;;  %389 = vst.msk [vmem:[#allocation3 + $0x58] sm:$0xff] %vm225_vm0, %v5732_v29  ;;  %v5760_v37 = vld [vmem:[#allocation2 + $0x98] sm:$0xff]  ;;  %v5787_v47 = vld [vmem:[#allocation2 + $0xa8] sm:$0xff] }
  0x38   : > { %390 = vst.msk [vmem:[#allocation3 + $0x60] sm:$0xff] %vm225_vm0, %v5747_v33  ;;  %391 = vst.msk [vmem:[#allocation3 + $0x68] sm:$0xff] %vm225_vm0, %v5760_v37  ;;  %v1570_v42 = vld [vmem:[#allocation2 + $0x39] sm:$0xff]  ;;  %v1571_v49 = vld [vmem:[#allocation2 + $0x49] sm:$0xff] }
  0x39   : > { %1055 = vrot.lane.b32.xlu0 %v990_v26, %s5514_s27  ;;  %1246 = vrot.lane.b32.xlu1 %v1182_v27, %s5515_s28  ;;  %v1763_v45 = vld [vmem:[#allocation2 + $0x3a] sm:$0xff]  ;;  %392 = vst.msk [vmem:[#allocation3 + $0x70] sm:$0xff] %vm225_vm0, %v5787_v47  ;;  %v5799_v50 = vld [vmem:[#allocation2 + $0xb0] sm:$0xff]  ;;  %329 = vst.msk [vmem:[#allocation2 + $0xc9] sm:$0xff] %vm225_vm0, %v296_v56 }
  0x3a   : > { %393 = vst.msk [vmem:[#allocation3 + $0x78] sm:$0xff] %vm225_vm0, %v5799_v50  ;;  %v1572_v51 = vld [vmem:[#allocation2 + $0x51] sm:$0xff]  ;;  %v1573_v57 = vld [vmem:[#allocation2 + $0x61] sm:$0xff]  ;;  %v1574_v59 = vld [vmem:[#allocation2 + $0x69] sm:$0xff] }
  0x3b   : > { %v1764_v52 = vld [vmem:[#allocation2 + $0x4a] sm:$0xff]  ;;  %v1765_v53 = vld [vmem:[#allocation2 + $0x52] sm:$0xff]  ;;  %v1766_v60 = vld [vmem:[#allocation2 + $0x62] sm:$0xff]  ;;  %330 = vst.msk [vmem:[#allocation2 + $0xd9] sm:$0xff] %vm225_vm0, %v297_v62 }
  0x3c   : > { %v1767_v61 = vld [vmem:[#allocation2 + $0x6a] sm:$0xff]  ;;  %331 = vst.msk [vmem:[#allocation2 + $0xe1] sm:$0xff] %vm225_vm0, %v298_v5  ;;  %v1575_v8 = vld [vmem:[#allocation2 + $0x79] sm:$0xff]  ;;  %v1576_v14 = vld [vmem:[#allocation2 + $0x81] sm:$0xff] }
  0x3d   : > { %480 = vrot.lane.b32.xlu0 %v990_v26, %s5512_s25  ;;  %671 = vrot.lane.b32.xlu1 %v1182_v27, %s5511_s24  ;;  %v5819_v55 = vld [vmem:[#allocation2 + $0xc0] sm:$0xff]  ;;  %v1577_v32 = vld [vmem:[#allocation2 + $0x91] sm:$0xff]  ;;  %v1579_v62 = vld [vmem:[#allocation2 + $0xa9] sm:$0xff]  ;;  %2602 = vst.msk [vmem:[#allocation4 + $0x20] sm:$0xff] %vm2325_vm12, %v5510_v0 }
  0x3e   : > { %394 = vst.msk [vmem:[#allocation3 + $0x80] sm:$0xff] %vm225_vm0, %v5819_v55  ;;  %v1768_v15 = vld [vmem:[#allocation2 + $0x7a] sm:$0xff]  ;;  %v1770_v41 = vld [vmem:[#allocation2 + $0x92] sm:$0xff] }
  0x3f   : > { %v1578_v40 = vld [vmem:[#allocation2 + $0x99] sm:$0xff]  ;;  %2597 = vst.msk [vmem:[#allocation4] sm:$0xff] %vm2325_vm12, %v5510_v0  ;;  %2598 = vst.msk [vmem:[#allocation4 + $0x8] sm:$0xff] %vm2325_vm12, %v5510_v0 }
  0x40   : > { %v5831_v58 = vld [vmem:[#allocation2 + $0xc8] sm:$0xff]  ;;  %2601 = vst.msk [vmem:[#allocation4 + $0x18] sm:$0xff] %vm2325_vm12, %v5510_v0  ;;  %2604 = vst.msk [vmem:[#allocation4 + $0x30] sm:$0xff] %vm2325_vm12, %v5510_v0 }
  0x41   : > { %1248 = vrot.lane.b32.xlu0 %v1183_v31, %s5515_s28  ;;  %1440 = vrot.lane.b32.xlu1 %v1376_v19, %s5516_s29  ;;  %395 = vst.msk [vmem:[#allocation3 + $0x88] sm:$0xff] %vm225_vm0, %v5831_v58 }
  0x42   : > { %v5854_v4 = vld [vmem:[#allocation2 + $0xd8] sm:$0xff]  ;;  %2605 = vst.msk [vmem:[#allocation4 + $0x38] sm:$0xff] %vm2325_vm12, %v5510_v0  ;;  %2607 = vst.msk [vmem:[#allocation4 + $0x48] sm:$0xff] %vm2325_vm12, %v5510_v0 }
  0x43   : > { %396 = vst.msk [vmem:[#allocation3 + $0x90] sm:$0xff] %vm225_vm0, %v5854_v4  ;;  %v5871_v11 = vld [vmem:[#allocation2 + $0xe0] sm:$0xff] }
  0x44   : > { %397 = vst.msk [vmem:[#allocation3 + $0x98] sm:$0xff] %vm225_vm0, %v5871_v11 }
  0x45   : > { %673 = vrot.lane.b32.xlu0 %v1183_v31, %s5511_s24  ;;  %864 = vrot.lane.b32.xlu1 %v1376_v19, %s5513_s26  ;;  %2608 = vst.msk [vmem:[#allocation4 + $0x50] sm:$0xff] %vm2325_vm12, %v5510_v0  ;;  %2610 = vst.msk [vmem:[#allocation4 + $0x60] sm:$0xff] %vm2325_vm12, %v5510_v0 }
  0x46   : > { %2611 = vst.msk [vmem:[#allocation4 + $0x68] sm:$0xff] %vm2325_vm12, %v5510_v0  ;;  %2613 = vst.msk [vmem:[#allocation4 + $0x78] sm:$0xff] %vm2325_vm12, %v5510_v0 }
  0x47   : > { %2614 = vst.msk [vmem:[#allocation4 + $0x80] sm:$0xff] %vm2325_vm12, %v5510_v0  ;;  %2616 = vst.msk [vmem:[#allocation4 + $0x90] sm:$0xff] %vm2325_vm12, %v5510_v0 }
  0x48   : > { %2617 = vst.msk [vmem:[#allocation4 + $0x98] sm:$0xff] %vm2325_vm12, %v5510_v0  ;;  %2619 = vst.msk [vmem:[#allocation4 + $0xa8] sm:$0xff] %vm2325_vm12, %v5510_v0 }
  0x49   : > { %1442 = vrot.lane.b32.xlu0 %v1377_v20, %s5516_s29  ;;  %1633 = vrot.lane.b32.xlu1 %v1569_v34, %s5517_s9  ;;  %2620 = vst.msk [vmem:[#allocation4 + $0xb0] sm:$0xff] %vm2325_vm12, %v5510_v0  ;;  %2622 = vst.msk [vmem:[#allocation4 + $0xc0] sm:$0xff] %vm2325_vm12, %v5510_v0 }
  0x4a   : > { %2623 = vst.msk [vmem:[#allocation4 + $0xc8] sm:$0xff] %vm2325_vm12, %v5510_v0  ;;  %2625 = vst.msk [vmem:[#allocation4 + $0xd8] sm:$0xff] %vm2325_vm12, %v5510_v0 }
  0x4b   : > { %2626 = vst.msk [vmem:[#allocation4 + $0xe0] sm:$0xff] %vm2325_vm12, %v5510_v0  ;;  %2628 = vst.msk [vmem:[#allocation4 + $0xf0] sm:$0xff] %vm2325_vm12, %v5510_v0 }
  0x4c   : > { %2629 = vst.msk [vmem:[#allocation4 + $0xf8] sm:$0xff] %vm2325_vm12, %v5510_v0  ;;  %2631 = vst.msk [vmem:[#allocation4 + $0x108] sm:$0xff] %vm2325_vm12, %v5510_v0 }
  0x4d   : > { %866 = vrot.lane.b32.xlu0 %v1377_v20, %s5513_s26  ;;  %1057 = vrot.lane.b32.xlu1 %v1569_v34, %s5514_s27  ;;  %v1769_v20 = vld [vmem:[#allocation2 + $0x82] sm:$0xff]  ;;  %2632 = vst.msk [vmem:[#allocation4 + $0x110] sm:$0xff] %vm2325_vm12, %v5510_v0  ;;  %2634 = vst.msk [vmem:[#allocation4 + $0x120] sm:$0xff] %vm2325_vm12, %v5510_v0 }
  0x4e   : > { %2635 = vst.msk [vmem:[#allocation4 + $0x128] sm:$0xff] %vm2325_vm12, %v5510_v0  ;;  %2637 = vst.msk [vmem:[#allocation4 + $0x138] sm:$0xff] %vm2325_vm12, %v5510_v0 }
  0x4f   : > { %2638 = vst.msk [vmem:[#allocation4 + $0x140] sm:$0xff] %vm2325_vm12, %v5510_v0  ;;  %2640 = vst.msk [vmem:[#allocation4 + $0x150] sm:$0xff] %vm2325_vm12, %v5510_v0 }
  0x50   : > { %2641 = vst.msk [vmem:[#allocation4 + $0x158] sm:$0xff] %vm2325_vm12, %v5510_v0  ;;  %2643 = vst.msk [vmem:[#allocation4 + $0x168] sm:$0xff] %vm2325_vm12, %v5510_v0 }
  0x51   : > { %1635 = vrot.lane.b32.xlu0 %v1570_v42, %s5517_s9  ;;  %1826 = vrot.lane.b32.xlu1 %v1762_v43, %s5518_s14  ;;  %2644 = vst.msk [vmem:[#allocation4 + $0x170] sm:$0xff] %vm2325_vm12, %v5510_v0  ;;  %2646 = vst.msk [vmem:[#allocation4 + $0x180] sm:$0xff] %vm2325_vm12, %v5510_v0 }
  0x52   : > { %2647 = vst.msk [vmem:[#allocation4 + $0x188] sm:$0xff] %vm2325_vm12, %v5510_v0  ;;  %2649 = vst.msk [vmem:[#allocation4 + $0x198] sm:$0xff] %vm2325_vm12, %v5510_v0 }
  0x53   : > { %2650 = vst.msk [vmem:[#allocation4 + $0x1a0] sm:$0xff] %vm2325_vm12, %v5510_v0 }
  0x54   : > { %2603 = vst.msk [vmem:[#allocation4 + $0x28] sm:$0x3] %vm2599_vm13, %v5510_v0  ;;  %2600 = vst.msk [vmem:[#allocation4 + $0x10] sm:$0x3] %vm2599_vm13, %v5510_v0 }
  0x55   : > { %482 = vrot.lane.b32.xlu0 %v1569_v34, %s5512_s25  ;;  %1059 = vrot.lane.b32.xlu1 %v1570_v42, %s5514_s27  ;;  %2606 = vst.msk [vmem:[#allocation4 + $0x40] sm:$0x3] %vm2599_vm13, %v5510_v0  ;;  %2609 = vst.msk [vmem:[#allocation4 + $0x58] sm:$0x3] %vm2599_vm13, %v5510_v0 }
  0x56   : > { %2612 = vst.msk [vmem:[#allocation4 + $0x70] sm:$0x3] %vm2599_vm13, %v5510_v0  ;;  %2615 = vst.msk [vmem:[#allocation4 + $0x88] sm:$0x3] %vm2599_vm13, %v5510_v0 }
  0x57   : > { %2618 = vst.msk [vmem:[#allocation4 + $0xa0] sm:$0x3] %vm2599_vm13, %v5510_v0  ;;  %2621 = vst.msk [vmem:[#allocation4 + $0xb8] sm:$0x3] %vm2599_vm13, %v5510_v0 }
  0x58   : > { %2624 = vst.msk [vmem:[#allocation4 + $0xd0] sm:$0x3] %vm2599_vm13, %v5510_v0  ;;  %2627 = vst.msk [vmem:[#allocation4 + $0xe8] sm:$0x3] %vm2599_vm13, %v5510_v0 }
  0x59   : > { %1250 = vrot.lane.b32.xlu0 %v1762_v43, %s5515_s28  ;;  %1828 = vrot.lane.b32.xlu1 %v1763_v45, %s5518_s14  ;;  %2630 = vst.msk [vmem:[#allocation4 + $0x100] sm:$0x3] %vm2599_vm13, %v5510_v0  ;;  %2633 = vst.msk [vmem:[#allocation4 + $0x118] sm:$0x3] %vm2599_vm13, %v5510_v0 }
  0x5a   : > { %2636 = vst.msk [vmem:[#allocation4 + $0x130] sm:$0x3] %vm2599_vm13, %v5510_v0  ;;  %2639 = vst.msk [vmem:[#allocation4 + $0x148] sm:$0x3] %vm2599_vm13, %v5510_v0 }
  0x5b   : > { %2642 = vst.msk [vmem:[#allocation4 + $0x160] sm:$0x3] %vm2599_vm13, %v5510_v0  ;;  %2645 = vst.msk [vmem:[#allocation4 + $0x178] sm:$0x3] %vm2599_vm13, %v5510_v0 }
  0x5c   : > { %2648 = vst.msk [vmem:[#allocation4 + $0x190] sm:$0x3] %vm2599_vm13, %v5510_v0  ;;  %2651 = vst.msk [vmem:[#allocation4 + $0x1a8] sm:$0x3] %vm2599_vm13, %v5510_v0 }
  0x5d   : > { %484 = vrot.lane.b32.xlu0 %v1570_v42, %s5512_s25  ;;  %675 = vrot.lane.b32.xlu1 %v1762_v43, %s5511_s24 }
  0x61   : > { %1252 = vrot.lane.b32.xlu0 %v1763_v45, %s5515_s28  ;;  %1444 = vrot.lane.b32.xlu1 %v5712_v22, %s5516_s29 }
  0x65   : > { %677 = vrot.lane.b32.xlu0 %v1763_v45, %s5511_s24  ;;  %868 = vrot.lane.b32.xlu1 %v5712_v22, %s5513_s26 }
  0x69   : > { %1446 = vrot.lane.b32.xlu0 %v5714_v23, %s5516_s29  ;;  %1637 = vrot.lane.b32.xlu1 %v1571_v49, %s5517_s9 }
  0x6d   : > { %870 = vrot.lane.b32.xlu0 %v5714_v23, %s5513_s26  ;;  %1061 = vrot.lane.b32.xlu1 %v1571_v49, %s5514_s27  ;;  %v299_v23 = vld [vmem:[%s5678_s23 + $0x90] sm:$0xff] }
  0x6e   : > { %332 = vst.msk [vmem:[#allocation2 + $0xf1] sm:$0xff] %vm225_vm0, %v299_v23 }
  0x71   : > { %1639 = vrot.lane.b32.xlu0 %v1572_v51, %s5517_s9  ;;  %1830 = vrot.lane.b32.xlu1 %v1764_v52, %s5518_s14 }
  0x75   : > { %486 = vrot.lane.b32.xlu0 %v1571_v49, %s5512_s25  ;;  %1063 = vrot.lane.b32.xlu1 %v1572_v51, %s5514_s27 }
  0x79   : > { %1254 = vrot.lane.b32.xlu0 %v1764_v52, %s5515_s28  ;;  %1832 = vrot.lane.b32.xlu1 %v1765_v53, %s5518_s14 }
  0x7d   : > { %488 = vrot.lane.b32.xlu0 %v1572_v51, %s5512_s25  ;;  %679 = vrot.lane.b32.xlu1 %v1764_v52, %s5511_s24  ;;  %v301_v51 = vld [vmem:[%s5678_s23 + $0xa0] sm:$0xff] }
  0x7e   : > { %334 = vst.msk [vmem:[#allocation2 + $0x109] sm:$0xff] %vm225_vm0, %v301_v51 }
  0x81   : > { %1256 = vrot.lane.b32.xlu0 %v1765_v53, %s5515_s28  ;;  %1448 = vrot.lane.b32.xlu1 %v5722_v24, %s5516_s29 }
  0x85   : > { %681 = vrot.lane.b32.xlu0 %v1765_v53, %s5511_s24  ;;  %872 = vrot.lane.b32.xlu1 %v5722_v24, %s5513_s26 }
  0x88   : > { %v668_v63 = vpop.permute.xlu1 %667 }
  0x89   : > { %1450 = vrot.lane.b32.xlu0 %v5724_v25, %s5516_s29  ;;  %1641 = vrot.lane.b32.xlu1 %v1573_v57, %s5517_s9  ;;  %v475_v1 = vpop.permute.xlu0 %474 }
  0x8a   : > { %571 = vst.msk [vmem:[#allocation3] sm:$0xff] %vm570_vm3, %v475_v1 }
  0x8b   : > { %764 = vst.msk [vmem:[#allocation3] sm:$0xff] %vm763_vm4, %v668_v63 }
  0x8d   : > { %874 = vrot.lane.b32.xlu0 %v5724_v25, %s5513_s26  ;;  %1065 = vrot.lane.b32.xlu1 %v1573_v57, %s5514_s27 }
  0x91   : > { %1643 = vrot.lane.b32.xlu0 %v1574_v59, %s5517_s9  ;;  %1834 = vrot.lane.b32.xlu1 %v1766_v60, %s5518_s14 }
  0x95   : > { %490 = vrot.lane.b32.xlu0 %v1573_v57, %s5512_s25  ;;  %1067 = vrot.lane.b32.xlu1 %v1574_v59, %s5514_s27  ;;  %v5953_v57 = vld [vmem:[#allocation2 + $0x108] sm:$0xff] }
  0x96   : > { %400 = vst.msk [vmem:[#allocation3 + $0xb0] sm:$0xff] %vm225_vm0, %v5953_v57 }
  0x99   : > { %1258 = vrot.lane.b32.xlu0 %v1766_v60, %s5515_s28  ;;  %1836 = vrot.lane.b32.xlu1 %v1767_v61, %s5518_s14 }
  0x9a   : > { %v670_v2 = vpop.permute.xlu1 %669 }
  0x9b   : > { %v477_v3 = vpop.permute.xlu0 %476 }
  0x9c   : > { %572 = vst.msk [vmem:[#allocation3 + $0x8] sm:$0xff] %vm570_vm3, %v477_v3 }
  0x9d   : > { %492 = vrot.lane.b32.xlu0 %v1574_v59, %s5512_s25  ;;  %683 = vrot.lane.b32.xlu1 %v1766_v60, %s5511_s24  ;;  %765 = vst.msk [vmem:[#allocation3 + $0x8] sm:$0xff] %vm763_vm4, %v670_v2  ;;  %v302_v59 = vld [vmem:[%s5678_s23 + $0xa8] sm:$0xff] }
  0x9e   : > { %335 = vst.msk [vmem:[#allocation2 + $0x111] sm:$0xff] %vm225_vm0, %v302_v59 }
  0xa1   : > { %1260 = vrot.lane.b32.xlu0 %v1767_v61, %s5515_s28  ;;  %1452 = vrot.lane.b32.xlu1 %v5730_v28, %s5516_s29 }
  0xa3   : > { %v863_v6 = vpop.permute.xlu1 %862  ;;  %v861_v7 = vpop.permute.xlu0 %860 }
  0xa4   : > { %958 = vst.msk [vmem:[#allocation3 + $0x8] sm:$0xff] %vm956_vm5, %v863_v6  ;;  %957 = vst.msk [vmem:[#allocation3] sm:$0xff] %vm956_vm5, %v861_v7  ;;  %v1580_v6 = vld [vmem:[#allocation2 + $0xb1] sm:$0xff] }
  0xa5   : > { %685 = vrot.lane.b32.xlu0 %v1767_v61, %s5511_s24  ;;  %876 = vrot.lane.b32.xlu1 %v5730_v28, %s5513_s26  ;;  %v5903_v28 = vld [vmem:[#allocation2 + $0xf0] sm:$0xff] }
  0xa6   : > { %398 = vst.msk [vmem:[#allocation3 + $0xa0] sm:$0xff] %vm225_vm0, %v5903_v28  ;;  %v5969_v2 = vld [vmem:[#allocation2 + $0x110] sm:$0xff] }
  0xa7   : > { %v1054_v9 = vpop.permute.xlu0 %1053  ;;  %v479_v10 = vpop.permute.xlu1 %478  ;;  %401 = vst.msk [vmem:[#allocation3 + $0xb8] sm:$0xff] %vm225_vm0, %v5969_v2  ;;  %v1772_v7 = vld [vmem:[#allocation2 + $0xaa] sm:$0xff] }
  0xa8   : > { %1150 = vst.msk [vmem:[#allocation3] sm:$0xff] %vm1149_vm6, %v1054_v9 }
  0xa9   : > { %573 = vst.msk [vmem:[#allocation3 + $0x10] sm:$0xff] %vm570_vm3, %v479_v10  ;;  %1454 = vrot.lane.b32.xlu0 %v5732_v29, %s5516_s29  ;;  %1645 = vrot.lane.b32.xlu1 %v1575_v8, %s5517_s9 }
  0xab   : > { %v1056_v12 = vpop.permute.xlu0 %1055  ;;  %v1247_v13 = vpop.permute.xlu1 %1246 }
  0xac   : > { %1151 = vst.msk [vmem:[#allocation3 + $0x8] sm:$0xff] %vm1149_vm6, %v1056_v12 }
  0xad   : > { %1343 = vst.msk [vmem:[#allocation3] sm:$0xff] %vm1342_vm7, %v1247_v13  ;;  %878 = vrot.lane.b32.xlu0 %v5732_v29, %s5513_s26  ;;  %1069 = vrot.lane.b32.xlu1 %v1575_v8, %s5514_s27  ;;  %v300_v29 = vld [vmem:[%s5678_s23 + $0x98] sm:$0xff] }
  0xae   : > { %333 = vst.msk [vmem:[#allocation2 + $0xf9] sm:$0xff] %vm225_vm0, %v300_v29 }
  0xaf   : > { %v481_v16 = vpop.permute.xlu0 %480  ;;  %v672_v17 = vpop.permute.xlu1 %671 }
  0xb0   : > { %574 = vst.msk [vmem:[#allocation3 + $0x18] sm:$0xff] %vm570_vm3, %v481_v16  ;;  %v303_v16 = vld [vmem:[%s5678_s23 + $0xb0] sm:$0xff] }
  0xb1   : > { %766 = vst.msk [vmem:[#allocation3 + $0x10] sm:$0xff] %vm763_vm4, %v672_v17  ;;  %1647 = vrot.lane.b32.xlu0 %v1576_v14, %s5517_s9  ;;  %1838 = vrot.lane.b32.xlu1 %v1768_v15, %s5518_s14 }
  0xb2   : > { %336 = vst.msk [vmem:[#allocation2 + $0x121] sm:$0xff] %vm225_vm0, %v303_v16 }
  0xb3   : > { %v1249_v18 = vpop.permute.xlu0 %1248  ;;  %v1441_v19 = vpop.permute.xlu1 %1440 }
  0xb4   : > { %1344 = vst.msk [vmem:[#allocation3 + $0x8] sm:$0xff] %vm1342_vm7, %v1249_v18 }
  0xb5   : > { %1537 = vst.msk [vmem:[#allocation3] sm:$0xff] %vm1536_vm8, %v1441_v19  ;;  %494 = vrot.lane.b32.xlu0 %v1575_v8, %s5512_s25  ;;  %1071 = vrot.lane.b32.xlu1 %v1576_v14, %s5514_s27  ;;  %v5919_v36 = vld [vmem:[#allocation2 + $0xf8] sm:$0xff] }
  0xb6   : > { %399 = vst.msk [vmem:[#allocation3 + $0xa8] sm:$0xff] %vm225_vm0, %v5919_v36 }
  0xb7   : > { %v674_v21 = vpop.permute.xlu0 %673  ;;  %v865_v22 = vpop.permute.xlu1 %864 }
  0xb8   : > { %767 = vst.msk [vmem:[#allocation3 + $0x18] sm:$0xff] %vm763_vm4, %v674_v21 }
  0xb9   : > { %959 = vst.msk [vmem:[#allocation3 + $0x10] sm:$0xff] %vm956_vm5, %v865_v22  ;;  %1262 = vrot.lane.b32.xlu0 %v1768_v15, %s5515_s28  ;;  %1840 = vrot.lane.b32.xlu1 %v1769_v20, %s5518_s14  ;;  %v6003_v21 = vld [vmem:[#allocation2 + $0x120] sm:$0xff]  ;;  %v304_v22 = vld [vmem:[%s5678_s23 + $0xb8] sm:$0xff] }
  0xba   : > { %337 = vst.msk [vmem:[#allocation2 + $0x129] sm:$0xff] %vm225_vm0, %v304_v22  ;;  %402 = vst.msk [vmem:[#allocation3 + $0xc0] sm:$0xff] %vm225_vm0, %v6003_v21 }
  0xbb   : > { %v1443_v24 = vpop.permute.xlu0 %1442  ;;  %v1634_v25 = vpop.permute.xlu1 %1633 }
  0xbc   : > { %1538 = vst.msk [vmem:[#allocation3 + $0x8] sm:$0xff] %vm1536_vm8, %v1443_v24 }
  0xbd   : > { %1730 = vst.msk [vmem:[#allocation3] sm:$0xff] %vm1729_vm9, %v1634_v25  ;;  %496 = vrot.lane.b32.xlu0 %v1576_v14, %s5512_s25  ;;  %687 = vrot.lane.b32.xlu1 %v1768_v15, %s5511_s24  ;;  %v1581_v25 = vld [vmem:[#allocation2 + $0xc1] sm:$0xff] }
  0xbf   : > { %v867_v26 = vpop.permute.xlu0 %866  ;;  %v1058_v27 = vpop.permute.xlu1 %1057 }
  0xc0   : > { %960 = vst.msk [vmem:[#allocation3 + $0x18] sm:$0xff] %vm956_vm5, %v867_v26 }
  0xc1   : > { %1152 = vst.msk [vmem:[#allocation3 + $0x10] sm:$0xff] %vm1149_vm6, %v1058_v27  ;;  %1264 = vrot.lane.b32.xlu0 %v1769_v20, %s5515_s28  ;;  %1456 = vrot.lane.b32.xlu1 %v5747_v33, %s5516_s29  ;;  %v6019_v29 = vld [vmem:[#allocation2 + $0x128] sm:$0xff] }
  0xc2   : > { %403 = vst.msk [vmem:[#allocation3 + $0xc8] sm:$0xff] %vm225_vm0, %v6019_v29 }
  0xc3   : > { %v1636_v30 = vpop.permute.xlu0 %1635  ;;  %v1827_v31 = vpop.permute.xlu1 %1826 }
  0xc4   : > { %1731 = vst.msk [vmem:[#allocation3 + $0x8] sm:$0xff] %vm1729_vm9, %v1636_v30 }
  0xc5   : > { %1923 = vst.msk [vmem:[#allocation3] sm:$0xff] %vm1922_vm10, %v1827_v31  ;;  %689 = vrot.lane.b32.xlu0 %v1769_v20, %s5511_s24  ;;  %880 = vrot.lane.b32.xlu1 %v5747_v33, %s5513_s26 }
  0xc7   : > { %v483_v34 = vpop.permute.xlu0 %482  ;;  %v1060_v35 = vpop.permute.xlu1 %1059 }
  0xc8   : > { %575 = vst.msk [vmem:[#allocation3 + $0x20] sm:$0xff] %vm570_vm3, %v483_v34  ;;  %v1774_v34 = vld [vmem:[#allocation2 + $0xc2] sm:$0xff] }
  0xc9   : > { %1153 = vst.msk [vmem:[#allocation3 + $0x18] sm:$0xff] %vm1149_vm6, %v1060_v35  ;;  %1458 = vrot.lane.b32.xlu0 %v5760_v37, %s5516_s29  ;;  %1649 = vrot.lane.b32.xlu1 %v1577_v32, %s5517_s9 }
  0xcb   : > { %v1251_v38 = vpop.permute.xlu0 %1250  ;;  %v1829_v33 = vpop.permute.xlu1 %1828 }
  0xcc   : > { %v1955_v39 = vld [vmem:[#allocation3] sm:$0xff]  ;;  %1345 = vst.msk [vmem:[#allocation3 + $0x10] sm:$0xff] %vm1342_vm7, %v1251_v38 }
  0xcd   : > { %1924 = vst.msk [vmem:[#allocation3 + $0x8] sm:$0xff] %vm1922_vm10, %v1829_v33  ;;  %5278 = vmatprep.mubr.msk.f32.mxu0 %vm1999_vm11, %v1955_v39  ;;  %882 = vrot.lane.b32.xlu0 %v5760_v37, %s5513_s26  ;;  %v1771_v37 = vld [vmem:[#allocation2 + $0x9a] sm:$0xff] }
  0xce   : > { %1073 = vrot.lane.b32.xlu1 %v1577_v32, %s5514_s27 }
  0xcf   : > { %v485_v42 = vpop.permute.xlu0 %484  ;;  %v676_v43 = vpop.permute.xlu1 %675 }
  0xd0   : > { %576 = vst.msk [vmem:[#allocation3 + $0x28] sm:$0xff] %vm570_vm3, %v485_v42 }
  0xd1   : > { %768 = vst.msk [vmem:[#allocation3 + $0x20] sm:$0xff] %vm763_vm4, %v676_v43  ;;  %1651 = vrot.lane.b32.xlu0 %v1578_v40, %s5517_s9  ;;  %v305_v43 = vld [vmem:[%s5678_s23 + $0xc0] sm:$0xff] }
  0xd2   : > { %1842 = vrot.lane.b32.xlu1 %v1770_v41, %s5518_s14  ;;  %338 = vst.msk [vmem:[#allocation2 + $0x139] sm:$0xff] %vm225_vm0, %v305_v43 }
  0xd3   : > { %v1253_v44 = vpop.permute.xlu0 %1252  ;;  %v1445_v45 = vpop.permute.xlu1 %1444 }
  0xd4   : > { %v1956_v46 = vld [vmem:[#allocation3 + $0x8] sm:$0xff]  ;;  %1346 = vst.msk [vmem:[#allocation3 + $0x18] sm:$0xff] %vm1342_vm7, %v1253_v44 }
  0xd5   : > { %1539 = vst.msk [vmem:[#allocation3 + $0x10] sm:$0xff] %vm1536_vm8, %v1445_v45  ;;  %5279 = vmatmul.mubr.msk.f32.vlgmr.msra.gmra.mrb[0].mxu0 %vm1999_vm11, %v1956_v46  ;;  %498 = vrot.lane.b32.xlu0 %v1577_v32, %s5512_s25  ;;  %v1582_v32 = vld [vmem:[#allocation2 + $0xc9] sm:$0xff] }
  0xd6   : > { %1075 = vrot.lane.b32.xlu1 %v1578_v40, %s5514_s27 }
  0xd7   : > { %v678_v48 = vpop.permute.xlu0 %677  ;;  %v869_v49 = vpop.permute.xlu1 %868 }
  0xd8   : > { %769 = vst.msk [vmem:[#allocation3 + $0x28] sm:$0xff] %vm763_vm4, %v678_v48 }
  0xd9   : > { %961 = vst.msk [vmem:[#allocation3 + $0x20] sm:$0xff] %vm956_vm5, %v869_v49  ;;  %1266 = vrot.lane.b32.xlu0 %v1770_v41, %s5515_s28  ;;  %v6053_v48 = vld [vmem:[#allocation2 + $0x138] sm:$0xff]  ;;  %v306_v49 = vld [vmem:[%s5678_s23 + $0xc8] sm:$0xff] }
  0xda   : > { %1844 = vrot.lane.b32.xlu1 %v1771_v37, %s5518_s14  ;;  %404 = vst.msk [vmem:[#allocation3 + $0xd0] sm:$0xff] %vm225_vm0, %v6053_v48  ;;  %339 = vst.msk [vmem:[#allocation2 + $0x141] sm:$0xff] %vm225_vm0, %v306_v49 }
  0xdb   : > { %v1447_v52 = vpop.permute.xlu0 %1446  ;;  %v1638_v53 = vpop.permute.xlu1 %1637 }
  0xdc   : > { %1540 = vst.msk [vmem:[#allocation3 + $0x18] sm:$0xff] %vm1536_vm8, %v1447_v52 }
  0xdd   : > { %1732 = vst.msk [vmem:[#allocation3 + $0x10] sm:$0xff] %vm1729_vm9, %v1638_v53  ;;  %500 = vrot.lane.b32.xlu0 %v1578_v40, %s5512_s25  ;;  %v6067_v53 = vld [vmem:[#allocation2 + $0xd9] sm:$0xff] }
  0xde   : > { %691 = vrot.lane.b32.xlu1 %v1770_v41, %s5511_s24 }
  0xdf   : > { %v871_v54 = vpop.permute.xlu0 %870  ;;  %v1062_v56 = vpop.permute.xlu1 %1061 }
  0xe0   : > { %962 = vst.msk [vmem:[#allocation3 + $0x28] sm:$0xff] %vm956_vm5, %v871_v54 }
  0xe1   : > { %1154 = vst.msk [vmem:[#allocation3 + $0x20] sm:$0xff] %vm1149_vm6, %v1062_v56  ;;  %1268 = vrot.lane.b32.xlu0 %v1771_v37, %s5515_s28 }
  0xe2   : > { %1460 = vrot.lane.b32.xlu1 %v5787_v47, %s5516_s29 }
  0xe3   : > { %v1640_v60 = vpop.permute.xlu0 %1639  ;;  %v1831_v61 = vpop.permute.xlu1 %1830 }
  0xe4   : > { %1733 = vst.msk [vmem:[#allocation3 + $0x18] sm:$0xff] %vm1729_vm9, %v1640_v60 }
  0xe5   : > { %1925 = vst.msk [vmem:[#allocation3 + $0x10] sm:$0xff] %vm1922_vm10, %v1831_v61  ;;  %693 = vrot.lane.b32.xlu0 %v1771_v37, %s5511_s24 }
  0xe6   : > { %884 = vrot.lane.b32.xlu1 %v5787_v47, %s5513_s26 }
  0xe7   : > { %v487_v63 = vpop.permute.xlu0 %486  ;;  %v1064_v1 = vpop.permute.xlu1 %1063 }
  0xe8   : > { %577 = vst.msk [vmem:[#allocation3 + $0x30] sm:$0xff] %vm570_vm3, %v487_v63  ;;  %v1776_v63 = vld [vmem:[#allocation2 + $0xda] sm:$0xff] }
  0xe9   : > { %1155 = vst.msk [vmem:[#allocation3 + $0x28] sm:$0xff] %vm1149_vm6, %v1064_v1  ;;  %1462 = vrot.lane.b32.xlu0 %v5799_v50, %s5516_s29 }
  0xea   : > { %1653 = vrot.lane.b32.xlu1 %v1579_v62, %s5517_s9 }
  0xeb   : > { %v1255_v3 = vpop.permute.xlu0 %1254  ;;  %v1833_v5 = vpop.permute.xlu1 %1832 }
  0xec   : > { %v1957_v47 = vld [vmem:[#allocation3 + $0x10] sm:$0xff]  ;;  %1347 = vst.msk [vmem:[#allocation3 + $0x20] sm:$0xff] %vm1342_vm7, %v1255_v3 }
  0xed   : > { %1926 = vst.msk [vmem:[#allocation3 + $0x18] sm:$0xff] %vm1922_vm10, %v1833_v5  ;;  %5281 = vmatprep.mubr.msk.f32.mxu0 %vm1999_vm11, %v1957_v47  ;;  %886 = vrot.lane.b32.xlu0 %v5799_v50, %s5513_s26  ;;  %v1773_v50 = vld [vmem:[#allocation2 + $0xb2] sm:$0xff] }
  0xee   : > { %1077 = vrot.lane.b32.xlu1 %v1579_v62, %s5514_s27 }
  0xef   : > { %v489_v8 = vpop.permute.xlu0 %488  ;;  %v680_v9 = vpop.permute.xlu1 %679 }
  0xf0   : > { %578 = vst.msk [vmem:[#allocation3 + $0x38] sm:$0xff] %vm570_vm3, %v489_v8  ;;  %v307_v8 = vld [vmem:[%s5678_s23 + $0xd0] sm:$0xff] }
  0xf1   : > { %770 = vst.msk [vmem:[#allocation3 + $0x30] sm:$0xff] %vm763_vm4, %v680_v9  ;;  %1655 = vrot.lane.b32.xlu0 %v1580_v6, %s5517_s9 }
  0xf2   : > { %1846 = vrot.lane.b32.xlu1 %v1772_v7, %s5518_s14  ;;  %340 = vst.msk [vmem:[#allocation2 + $0x151] sm:$0xff] %vm225_vm0, %v307_v8  ;;  %v1589_v8 = vld [vmem:[#allocation2 + $0x121] sm:$0xff] }
  0xf3   : > { %v1257_v10 = vpop.permute.xlu0 %1256  ;;  %v1449_v12 = vpop.permute.xlu1 %1448 }
  0xf4   : > { %v1958_v13 = vld [vmem:[#allocation3 + $0x18] sm:$0xff]  ;;  %1348 = vst.msk [vmem:[#allocation3 + $0x28] sm:$0xff] %vm1342_vm7, %v1257_v10 }
  0xf5   : > { %1541 = vst.msk [vmem:[#allocation3 + $0x20] sm:$0xff] %vm1536_vm8, %v1449_v12  ;;  %5282 = vmatmul.mubr.msk.f32.gmra.mrb[2].mxu0 %vm1999_vm11, %v1958_v13  ;;  %502 = vrot.lane.b32.xlu0 %v1579_v62, %s5512_s25  ;;  %v1584_v62 = vld [vmem:[#allocation2 + $0xe1] sm:$0xff] }
  0xf6   : > { %1079 = vrot.lane.b32.xlu1 %v1580_v6, %s5514_s27 }
  0xf7   : > { %v682_v14 = vpop.permute.xlu0 %681  ;;  %v873_v15 = vpop.permute.xlu1 %872 }
  0xf8   : > { %771 = vst.msk [vmem:[#allocation3 + $0x38] sm:$0xff] %vm763_vm4, %v682_v14  ;;  %v308_v14 = vld [vmem:[%s5678_s23 + $0xd8] sm:$0xff] }
  0xf9   : > { %963 = vst.msk [vmem:[#allocation3 + $0x30] sm:$0xff] %vm956_vm5, %v873_v15  ;;  %1270 = vrot.lane.b32.xlu0 %v1772_v7, %s5515_s28 }
  0xfa   : > { %1848 = vrot.lane.b32.xlu1 %v1773_v50, %s5518_s14  ;;  %341 = vst.msk [vmem:[#allocation2 + $0x159] sm:$0xff] %vm225_vm0, %v308_v14 }
  0xfb   : > { %v1451_v17 = vpop.permute.xlu0 %1450  ;;  %v1642_v18 = vpop.permute.xlu1 %1641 }
  0xfc   : > { %1542 = vst.msk [vmem:[#allocation3 + $0x28] sm:$0xff] %vm1536_vm8, %v1451_v17  ;;  %v1585_v17 = vld [vmem:[#allocation2 + $0xf1] sm:$0xff] }
  0xfd   : > { %1734 = vst.msk [vmem:[#allocation3 + $0x20] sm:$0xff] %vm1729_vm9, %v1642_v18  ;;  %504 = vrot.lane.b32.xlu0 %v1580_v6, %s5512_s25 }
  0xfe   : > { %695 = vrot.lane.b32.xlu1 %v1772_v7, %s5511_s24 }
  0xff   : > { %v875_v19 = vpop.permute.xlu0 %874  ;;  %v1066_v20 = vpop.permute.xlu1 %1065 }
 0x100   : > { %964 = vst.msk [vmem:[#allocation3 + $0x38] sm:$0xff] %vm956_vm5, %v875_v19 }
 0x101   : > { %1156 = vst.msk [vmem:[#allocation3 + $0x30] sm:$0xff] %vm1149_vm6, %v1066_v20  ;;  %1272 = vrot.lane.b32.xlu0 %v1773_v50, %s5515_s28  ;;  %v6235_v20 = vld [vmem:[#allocation2 + $0x158] sm:$0xff] }
 0x102   : > { %1464 = vrot.lane.b32.xlu1 %v5819_v55, %s5516_s29  ;;  %407 = vst.msk [vmem:[#allocation3 + $0xe8] sm:$0xff] %vm225_vm0, %v6235_v20 }
 0x103   : > { %v1644_v23 = vpop.permute.xlu0 %1643  ;;  %v1835_v24 = vpop.permute.xlu1 %1834 }
 0x104   : > { %1735 = vst.msk [vmem:[#allocation3 + $0x28] sm:$0xff] %vm1729_vm9, %v1644_v23 }
 0x105   : > { %1927 = vst.msk [vmem:[#allocation3 + $0x20] sm:$0xff] %vm1922_vm10, %v1835_v24  ;;  %697 = vrot.lane.b32.xlu0 %v1773_v50, %s5511_s24  ;;  %v6219_v50 = vld [vmem:[#allocation2 + $0x150] sm:$0xff]  ;;  %v1586_v24 = vld [vmem:[#allocation2 + $0xf9] sm:$0xff] }
 0x106   : > { %888 = vrot.lane.b32.xlu1 %v5819_v55, %s5513_s26  ;;  %406 = vst.msk [vmem:[#allocation3 + $0xe0] sm:$0xff] %vm225_vm0, %v6219_v50 }
 0x107   : > { %v491_v26 = vpop.permute.xlu0 %490  ;;  %v1068_v27 = vpop.permute.xlu1 %1067 }
 0x108   : > { %579 = vst.msk [vmem:[#allocation3 + $0x40] sm:$0xff] %vm570_vm3, %v491_v26 }
 0x109   : > { %1157 = vst.msk [vmem:[#allocation3 + $0x38] sm:$0xff] %vm1149_vm6, %v1068_v27  ;;  %1466 = vrot.lane.b32.xlu0 %v5831_v58, %s5516_s29 }
 0x10a   : > { %1657 = vrot.lane.b32.xlu1 %v1581_v25, %s5517_s9 }
 0x10b   : > { %v1259_v30 = vpop.permute.xlu0 %1258  ;;  %v1837_v31 = vpop.permute.xlu1 %1836 }
 0x10c   : > { %v1959_v55 = vld [vmem:[#allocation3 + $0x20] sm:$0xff]  ;;  %1349 = vst.msk [vmem:[#allocation3 + $0x30] sm:$0xff] %vm1342_vm7, %v1259_v30 }
 0x10d   : > { %1928 = vst.msk [vmem:[#allocation3 + $0x28] sm:$0xff] %vm1922_vm10, %v1837_v31  ;;  %5284 = vmatprep.mubr.msk.f32.mxu0 %vm1999_vm11, %v1959_v55  ;;  %890 = vrot.lane.b32.xlu0 %v5831_v58, %s5513_s26  ;;  %v1775_v58 = vld [vmem:[#allocation2 + $0xca] sm:$0xff] }
 0x10e   : > { %1081 = vrot.lane.b32.xlu1 %v1581_v25, %s5514_s27 }
 0x10f   : > { %v493_v35 = vpop.permute.xlu0 %492  ;;  %v684_v38 = vpop.permute.xlu1 %683 }
 0x110   : > { %580 = vst.msk [vmem:[#allocation3 + $0x48] sm:$0xff] %vm570_vm3, %v493_v35  ;;  %v309_v35 = vld [vmem:[%s5678_s23 + $0xe0] sm:$0xff] }
 0x111   : > { %772 = vst.msk [vmem:[#allocation3 + $0x40] sm:$0xff] %vm763_vm4, %v684_v38  ;;  %1659 = vrot.lane.b32.xlu0 %v1582_v32, %s5517_s9 }
 0x112   : > { %1850 = vrot.lane.b32.xlu1 %v1774_v34, %s5518_s14  ;;  %342 = vst.msk [vmem:[#allocation2 + $0x169] sm:$0xff] %vm225_vm0, %v309_v35 }
 0x113   : > { %v1261_v33 = vpop.permute.xlu0 %1260  ;;  %v1453_v39 = vpop.permute.xlu1 %1452 }
 0x114   : > { %v1960_v40 = vld [vmem:[#allocation3 + $0x28] sm:$0xff]  ;;  %1350 = vst.msk [vmem:[#allocation3 + $0x38] sm:$0xff] %vm1342_vm7, %v1261_v33 }
 0x115   : > { %1543 = vst.msk [vmem:[#allocation3 + $0x30] sm:$0xff] %vm1536_vm8, %v1453_v39  ;;  %5285 = vmatmul.mubr.msk.f32.gmra.mrb[4].mxu0 %vm1999_vm11, %v1960_v40  ;;  %506 = vrot.lane.b32.xlu0 %v1581_v25, %s5512_s25  ;;  %v1778_v25 = vld [vmem:[#allocation2 + $0xf2] sm:$0xff] }
 0x116   : > { %1083 = vrot.lane.b32.xlu1 %v1582_v32, %s5514_s27 }
 0x117   : > { %v686_v41 = vpop.permute.xlu0 %685  ;;  %v877_v42 = vpop.permute.xlu1 %876 }
 0x118   : > { %773 = vst.msk [vmem:[#allocation3 + $0x48] sm:$0xff] %vm763_vm4, %v686_v41  ;;  %v310_v41 = vld [vmem:[%s5678_s23 + $0xe8] sm:$0xff] }
 0x119   : > { %965 = vst.msk [vmem:[#allocation3 + $0x40] sm:$0xff] %vm956_vm5, %v877_v42  ;;  %1274 = vrot.lane.b32.xlu0 %v1774_v34, %s5515_s28 }
 0x11a   : > { %1852 = vrot.lane.b32.xlu1 %v1775_v58, %s5518_s14  ;;  %343 = vst.msk [vmem:[#allocation2 + $0x171] sm:$0xff] %vm225_vm0, %v310_v41 }
 0x11b   : > { %v1455_v44 = vpop.permute.xlu0 %1454  ;;  %v1646_v45 = vpop.permute.xlu1 %1645 }
 0x11c   : > { %1544 = vst.msk [vmem:[#allocation3 + $0x38] sm:$0xff] %vm1536_vm8, %v1455_v44  ;;  %v1587_v44 = vld [vmem:[#allocation2 + $0x109] sm:$0xff] }
 0x11d   : > { %1736 = vst.msk [vmem:[#allocation3 + $0x30] sm:$0xff] %vm1729_vm9, %v1646_v45  ;;  %508 = vrot.lane.b32.xlu0 %v1582_v32, %s5512_s25 }
 0x11e   : > { %699 = vrot.lane.b32.xlu1 %v1774_v34, %s5511_s24 }
 0x11f   : > { %v879_v46 = vpop.permute.xlu0 %878  ;;  %v1070_v37 = vpop.permute.xlu1 %1069 }
 0x120   : > { %966 = vst.msk [vmem:[#allocation3 + $0x48] sm:$0xff] %vm956_vm5, %v879_v46 }
 0x121   : > { %1158 = vst.msk [vmem:[#allocation3 + $0x40] sm:$0xff] %vm1149_vm6, %v1070_v37  ;;  %1276 = vrot.lane.b32.xlu0 %v1775_v58, %s5515_s28  ;;  %v6285_v37 = vld [vmem:[#allocation2 + $0x170] sm:$0xff] }
 0x122   : > { %1468 = vrot.lane.b32.xlu1 %v5854_v4, %s5516_s29  ;;  %409 = vst.msk [vmem:[#allocation3 + $0xf8] sm:$0xff] %vm225_vm0, %v6285_v37 }
 0x123   : > { %v1648_v51 = vpop.permute.xlu0 %1647  ;;  %v1839_v52 = vpop.permute.xlu1 %1838 }
 0x124   : > { %1737 = vst.msk [vmem:[#allocation3 + $0x38] sm:$0xff] %vm1729_vm9, %v1648_v51 }
 0x125   : > { %1929 = vst.msk [vmem:[#allocation3 + $0x30] sm:$0xff] %vm1922_vm10, %v1839_v52  ;;  %701 = vrot.lane.b32.xlu0 %v1775_v58, %s5511_s24  ;;  %v6269_v58 = vld [vmem:[#allocation2 + $0x168] sm:$0xff]  ;;  %v1588_v52 = vld [vmem:[#allocation2 + $0x111] sm:$0xff] }
 0x126   : > { %892 = vrot.lane.b32.xlu1 %v5854_v4, %s5513_s26  ;;  %v6147_v4 = vld [vmem:[#allocation2 + $0x140] sm:$0xff]  ;;  %408 = vst.msk [vmem:[#allocation3 + $0xf0] sm:$0xff] %vm225_vm0, %v6269_v58 }
 0x127   : > { %v495_v54 = vpop.permute.xlu0 %494  ;;  %v1072_v56 = vpop.permute.xlu1 %1071  ;;  %405 = vst.msk [vmem:[#allocation3 + $0xd8] sm:$0xff] %vm225_vm0, %v6147_v4 }
 0x128   : > { %581 = vst.msk [vmem:[#allocation3 + $0x50] sm:$0xff] %vm570_vm3, %v495_v54 }
 0x129   : > { %1159 = vst.msk [vmem:[#allocation3 + $0x48] sm:$0xff] %vm1149_vm6, %v1072_v56  ;;  %1470 = vrot.lane.b32.xlu0 %v5871_v11, %s5516_s29 }
 0x12a   : > { %1661 = vrot.lane.b32.xlu1 %v6067_v53, %s5517_s9 }
 0x12b   : > { %v1263_v59 = vpop.permute.xlu0 %1262  ;;  %v1841_v60 = vpop.permute.xlu1 %1840 }
 0x12c   : > { %v1961_v61 = vld [vmem:[#allocation3 + $0x30] sm:$0xff]  ;;  %1351 = vst.msk [vmem:[#allocation3 + $0x40] sm:$0xff] %vm1342_vm7, %v1263_v59 }
 0x12d   : > { %1930 = vst.msk [vmem:[#allocation3 + $0x38] sm:$0xff] %vm1922_vm10, %v1841_v60  ;;  %5287 = vmatprep.mubr.msk.f32.mxu0 %vm1999_vm11, %v1961_v61  ;;  %894 = vrot.lane.b32.xlu0 %v5871_v11, %s5513_s26  ;;  %v1777_v11 = vld [vmem:[#allocation2 + $0xe2] sm:$0xff] }
 0x12e   : > { %1085 = vrot.lane.b32.xlu1 %v6067_v53, %s5514_s27 }
 0x12f   : > { %v497_v1 = vpop.permute.xlu0 %496  ;;  %v688_v3 = vpop.permute.xlu1 %687 }
 0x130   : > { %582 = vst.msk [vmem:[#allocation3 + $0x58] sm:$0xff] %vm570_vm3, %v497_v1  ;;  %v311_v1 = vld [vmem:[%s5678_s23 + $0xf0] sm:$0xff] }
 0x131   : > { %774 = vst.msk [vmem:[#allocation3 + $0x50] sm:$0xff] %vm763_vm4, %v688_v3  ;;  %1663 = vrot.lane.b32.xlu0 %v1584_v62, %s5517_s9 }
 0x132   : > { %1854 = vrot.lane.b32.xlu1 %v1776_v63, %s5518_s14  ;;  %344 = vst.msk [vmem:[#allocation2 + $0x181] sm:$0xff] %vm225_vm0, %v311_v1 }
 0x133   : > { %v1265_v0 = vpop.permute.xlu0 %1264  ;;  %v1457_v5 = vpop.permute.xlu1 %1456 }
 0x134   : > { %v1962_v47 = vld [vmem:[#allocation3 + $0x38] sm:$0xff]  ;;  %1352 = vst.msk [vmem:[#allocation3 + $0x48] sm:$0xff] %vm1342_vm7, %v1265_v0 }
 0x135   : > { %1545 = vst.msk [vmem:[#allocation3 + $0x40] sm:$0xff] %vm1536_vm8, %v1457_v5  ;;  %5288 = vmatmul.mubr.msk.f32.gmra.mrb[6].mxu0 %vm1999_vm11, %v1962_v47  ;;  %510 = vrot.lane.b32.xlu0 %v6067_v53, %s5512_s25  ;;  %v1780_v53 = vld [vmem:[#allocation2 + $0x10a] sm:$0xff] }
 0x136   : > { %1087 = vrot.lane.b32.xlu1 %v1584_v62, %s5514_s27 }
 0x137   : > { %v690_v6 = vpop.permute.xlu0 %689  ;;  %v881_v7 = vpop.permute.xlu1 %880 }
 0x138   : > { %775 = vst.msk [vmem:[#allocation3 + $0x58] sm:$0xff] %vm763_vm4, %v690_v6 }
 0x139   : > { %967 = vst.msk [vmem:[#allocation3 + $0x50] sm:$0xff] %vm956_vm5, %v881_v7  ;;  %1278 = vrot.lane.b32.xlu0 %v1776_v63, %s5515_s28 }
 0x13a   : > { %1856 = vrot.lane.b32.xlu1 %v1777_v11, %s5518_s14 }
 0x13b   : > { %v1459_v9 = vpop.permute.xlu0 %1458  ;;  %v1650_v10 = vpop.permute.xlu1 %1649 }
 0x13c   : > { %1546 = vst.msk [vmem:[#allocation3 + $0x48] sm:$0xff] %vm1536_vm8, %v1459_v9 }
 0x13d   : > { %1738 = vst.msk [vmem:[#allocation3 + $0x40] sm:$0xff] %vm1729_vm9, %v1650_v10  ;;  %512 = vrot.lane.b32.xlu0 %v1584_v62, %s5512_s25 }
 0x13e   : > { %703 = vrot.lane.b32.xlu1 %v1776_v63, %s5511_s24 }
 0x13f   : > { %v883_v12 = vpop.permute.xlu0 %882 }
 0x140   : > { %v1074_v13 = vpop.permute.xlu1 %1073  ;;  %968 = vst.msk [vmem:[#allocation3 + $0x58] sm:$0xff] %vm956_vm5, %v883_v12 }
 0x141   : > { %1160 = vst.msk [vmem:[#allocation3 + $0x50] sm:$0xff] %vm1149_vm6, %v1074_v13  ;;  %1280 = vrot.lane.b32.xlu0 %v1777_v11, %s5515_s28 }
 0x142   : > { %1472 = vrot.lane.b32.xlu1 %v5903_v28, %s5516_s29 }
 0x143   : > { %v1652_v15 = vpop.permute.xlu0 %1651 }
 0x144   : > { %v1843_v16 = vpop.permute.xlu1 %1842  ;;  %1739 = vst.msk [vmem:[#allocation3 + $0x48] sm:$0xff] %vm1729_vm9, %v1652_v15  ;;  %v1782_v15 = vld [vmem:[#allocation2 + $0x122] sm:$0xff] }
 0x145   : > { %1931 = vst.msk [vmem:[#allocation3 + $0x40] sm:$0xff] %vm1922_vm10, %v1843_v16  ;;  %705 = vrot.lane.b32.xlu0 %v1777_v11, %s5511_s24  ;;  %v312_v11 = vld [vmem:[%s5678_s23 + $0xf8] sm:$0xff] }
 0x146   : > { %896 = vrot.lane.b32.xlu1 %v5903_v28, %s5513_s26  ;;  %345 = vst.msk [vmem:[#allocation2 + $0x189] sm:$0xff] %vm225_vm0, %v312_v11  ;;  %vm3295_vm0 = vcmask 1048320  }
 0x147   : > { %v499_v18 = vpop.permute.xlu0 %498 }
 0x148   : > { %v1076_v19 = vpop.permute.xlu1 %1075  ;;  %583 = vst.msk [vmem:[#allocation3 + $0x60] sm:$0xff] %vm570_vm3, %v499_v18 }
 0x149   : > { %1161 = vst.msk [vmem:[#allocation3 + $0x58] sm:$0xff] %vm1149_vm6, %v1076_v19  ;;  %1474 = vrot.lane.b32.xlu0 %v5919_v36, %s5516_s29 }
 0x14a   : > { %1665 = vrot.lane.b32.xlu1 %v1585_v17, %s5517_s9 }
 0x14b   : > { %v1267_v22 = vpop.permute.xlu0 %1266 }
 0x14c   : > { %v1845_v23 = vpop.permute.xlu1 %1844  ;;  %v1963_v28 = vld [vmem:[#allocation3 + $0x40] sm:$0xff]  ;;  %1353 = vst.msk [vmem:[#allocation3 + $0x50] sm:$0xff] %vm1342_vm7, %v1267_v22 }
 0x14d   : > { %1932 = vst.msk [vmem:[#allocation3 + $0x48] sm:$0xff] %vm1922_vm10, %v1845_v23  ;;  %5290 = vmatprep.mubr.msk.f32.mxu0 %vm1999_vm11, %v1963_v28  ;;  %898 = vrot.lane.b32.xlu0 %v5919_v36, %s5513_s26  ;;  %v1779_v36 = vld [vmem:[#allocation2 + $0xfa] sm:$0xff] }
 0x14e   : > { %1089 = vrot.lane.b32.xlu1 %v1585_v17, %s5514_s27 }
 0x14f   : > { %v501_v26 = vpop.permute.xlu0 %500 }
 0x150   : > { %v692_v27 = vpop.permute.xlu1 %691  ;;  %584 = vst.msk [vmem:[#allocation3 + $0x68] sm:$0xff] %vm570_vm3, %v501_v26 }
 0x151   : > { %776 = vst.msk [vmem:[#allocation3 + $0x60] sm:$0xff] %vm763_vm4, %v692_v27  ;;  %1667 = vrot.lane.b32.xlu0 %v1586_v24, %s5517_s9 }
 0x152   : > { %1858 = vrot.lane.b32.xlu1 %v1778_v25, %s5518_s14 }
 0x153   : > { %v1269_v30 = vpop.permute.xlu0 %1268 }
 0x154   : > { %v1461_v31 = vpop.permute.xlu1 %1460  ;;  %v1964_v55 = vld [vmem:[#allocation3 + $0x48] sm:$0xff]  ;;  %1354 = vst.msk [vmem:[#allocation3 + $0x58] sm:$0xff] %vm1342_vm7, %v1269_v30 }
 0x155   : > { %1547 = vst.msk [vmem:[#allocation3 + $0x50] sm:$0xff] %vm1536_vm8, %v1461_v31  ;;  %5291 = vmatmul.mubr.msk.f32.gmra.mrb[8].mxu0 %vm1999_vm11, %v1964_v55  ;;  %514 = vrot.lane.b32.xlu0 %v1585_v17, %s5512_s25  ;;  %v1591_v55 = vld [vmem:[#allocation2 + $0x139] sm:$0xff] }
 0x156   : > { %1091 = vrot.lane.b32.xlu1 %v1586_v24, %s5514_s27 }
 0x157   : > { %v694_v32 = vpop.permute.xlu0 %693 }
 0x158   : > { %v885_v34 = vpop.permute.xlu1 %884  ;;  %777 = vst.msk [vmem:[#allocation3 + $0x68] sm:$0xff] %vm763_vm4, %v694_v32 }
 0x159   : > { %969 = vst.msk [vmem:[#allocation3 + $0x60] sm:$0xff] %vm956_vm5, %v885_v34  ;;  %1282 = vrot.lane.b32.xlu0 %v1778_v25, %s5515_s28 }
 0x15a   : > { %1860 = vrot.lane.b32.xlu1 %v1779_v36, %s5518_s14 }
 0x15b   : > { %v1463_v38 = vpop.permute.xlu0 %1462 }
 0x15c   : > { %v1654_v33 = vpop.permute.xlu1 %1653  ;;  %1548 = vst.msk [vmem:[#allocation3 + $0x58] sm:$0xff] %vm1536_vm8, %v1463_v38 }
 0x15d   : > { %1740 = vst.msk [vmem:[#allocation3 + $0x50] sm:$0xff] %vm1729_vm9, %v1654_v33  ;;  %516 = vrot.lane.b32.xlu0 %v1586_v24, %s5512_s25 }
 0x15e   : > { %707 = vrot.lane.b32.xlu1 %v1778_v25, %s5511_s24 }
 0x15f   : > { %v887_v39 = vpop.permute.xlu0 %886 }
 0x160   : > { %v1078_v40 = vpop.permute.xlu1 %1077  ;;  %970 = vst.msk [vmem:[#allocation3 + $0x68] sm:$0xff] %vm956_vm5, %v887_v39  ;;  %v1592_v39 = vld [vmem:[#allocation2 + $0x141] sm:$0xff] }
 0x161   : > { %1162 = vst.msk [vmem:[#allocation3 + $0x60] sm:$0xff] %vm1149_vm6, %v1078_v40  ;;  %1284 = vrot.lane.b32.xlu0 %v1779_v36, %s5515_s28  ;;  %v1784_v40 = vld [vmem:[#allocation2 + $0x13a] sm:$0xff] }
 0x162   : > { %1476 = vrot.lane.b32.xlu1 %v5953_v57, %s5516_s29 }
 0x163   : > { %v1656_v42 = vpop.permute.xlu0 %1655 }
 0x164   : > { %v1847_v43 = vpop.permute.xlu1 %1846  ;;  %1741 = vst.msk [vmem:[#allocation3 + $0x58] sm:$0xff] %vm1729_vm9, %v1656_v42 }
 0x165   : > { %1933 = vst.msk [vmem:[#allocation3 + $0x50] sm:$0xff] %vm1922_vm10, %v1847_v43  ;;  %709 = vrot.lane.b32.xlu0 %v1779_v36, %s5511_s24 }
 0x166   : > { %900 = vrot.lane.b32.xlu1 %v5953_v57, %s5513_s26 }
 0x167   : > { %v503_v45 = vpop.permute.xlu0 %502 }
 0x168   : > { %v1080_v46 = vpop.permute.xlu1 %1079  ;;  %585 = vst.msk [vmem:[#allocation3 + $0x70] sm:$0xff] %vm570_vm3, %v503_v45 }
 0x169   : > { %1163 = vst.msk [vmem:[#allocation3 + $0x68] sm:$0xff] %vm1149_vm6, %v1080_v46  ;;  %1478 = vrot.lane.b32.xlu0 %v5969_v2, %s5516_s29  ;;  %v1785_v46 = vld [vmem:[#allocation2 + $0x142] sm:$0xff] }
 0x16a   : > { %1669 = vrot.lane.b32.xlu1 %v1587_v44, %s5517_s9 }
 0x16b   : > { %v1271_v49 = vpop.permute.xlu0 %1270 }
 0x16c   : > { %v1849_v51 = vpop.permute.xlu1 %1848  ;;  %v1965_v57 = vld [vmem:[#allocation3 + $0x50] sm:$0xff]  ;;  %1355 = vst.msk [vmem:[#allocation3 + $0x60] sm:$0xff] %vm1342_vm7, %v1271_v49 }
 0x16d   : > { %1934 = vst.msk [vmem:[#allocation3 + $0x58] sm:$0xff] %vm1922_vm10, %v1849_v51  ;;  %5293 = vmatprep.mubr.msk.f32.mxu0 %vm1999_vm11, %v1965_v57  ;;  %902 = vrot.lane.b32.xlu0 %v5969_v2, %s5513_s26  ;;  %v1781_v2 = vld [vmem:[#allocation2 + $0x112] sm:$0xff] }
 0x16e   : > { %1093 = vrot.lane.b32.xlu1 %v1587_v44, %s5514_s27 }
 0x16f   : > { %v505_v54 = vpop.permute.xlu0 %504 }
 0x170   : > { %v696_v56 = vpop.permute.xlu1 %695  ;;  %586 = vst.msk [vmem:[#allocation3 + $0x78] sm:$0xff] %vm570_vm3, %v505_v54 }
 0x171   : > { %778 = vst.msk [vmem:[#allocation3 + $0x70] sm:$0xff] %vm763_vm4, %v696_v56  ;;  %1671 = vrot.lane.b32.xlu0 %v1588_v52, %s5517_s9 }
 0x172   : > { %1862 = vrot.lane.b32.xlu1 %v1780_v53, %s5518_s14 }
 0x173   : > { %v1273_v59 = vpop.permute.xlu0 %1272 }
 0x174   : > { %v1465_v60 = vpop.permute.xlu1 %1464  ;;  %v1966_v61 = vld [vmem:[#allocation3 + $0x58] sm:$0xff]  ;;  %1356 = vst.msk [vmem:[#allocation3 + $0x68] sm:$0xff] %vm1342_vm7, %v1273_v59 }
 0x175   : > { %1549 = vst.msk [vmem:[#allocation3 + $0x60] sm:$0xff] %vm1536_vm8, %v1465_v60  ;;  %5294 = vmatmul.mubr.msk.f32.gmra.mrb[10].mxu0 %vm1999_vm11, %v1966_v61  ;;  %518 = vrot.lane.b32.xlu0 %v1587_v44, %s5512_s25  ;;  %v1593_v61 = vld [vmem:[#allocation2 + $0x151] sm:$0xff] }
 0x176   : > { %1095 = vrot.lane.b32.xlu1 %v1588_v52, %s5514_s27 }
 0x177   : > { %v698_v62 = vpop.permute.xlu0 %697 }
 0x178   : > { %v889_v63 = vpop.permute.xlu1 %888  ;;  %779 = vst.msk [vmem:[#allocation3 + $0x78] sm:$0xff] %vm763_vm4, %v698_v62 }
 0x179   : > { %971 = vst.msk [vmem:[#allocation3 + $0x70] sm:$0xff] %vm956_vm5, %v889_v63  ;;  %1286 = vrot.lane.b32.xlu0 %v1780_v53, %s5515_s28 }
 0x17a   : > { %1864 = vrot.lane.b32.xlu1 %v1781_v2, %s5518_s14 }
 0x17b   : > { %v1467_v3 = vpop.permute.xlu0 %1466 }
 0x17c   : > { %v1658_v0 = vpop.permute.xlu1 %1657  ;;  %1550 = vst.msk [vmem:[#allocation3 + $0x68] sm:$0xff] %vm1536_vm8, %v1467_v3  ;;  %v1594_v3 = vld [vmem:[#allocation2 + $0x159] sm:$0xff] }
 0x17d   : > { %1742 = vst.msk [vmem:[#allocation3 + $0x60] sm:$0xff] %vm1729_vm9, %v1658_v0  ;;  %520 = vrot.lane.b32.xlu0 %v1588_v52, %s5512_s25 }
 0x17e   : > { %711 = vrot.lane.b32.xlu1 %v1780_v53, %s5511_s24 }
 0x17f   : > { %v891_v5 = vpop.permute.xlu0 %890 }
 0x180   : > { %v1082_v47 = vpop.permute.xlu1 %1081  ;;  %972 = vst.msk [vmem:[#allocation3 + $0x78] sm:$0xff] %vm956_vm5, %v891_v5  ;;  %v1786_v5 = vld [vmem:[#allocation2 + $0x152] sm:$0xff] }
 0x181   : > { %1164 = vst.msk [vmem:[#allocation3 + $0x70] sm:$0xff] %vm1149_vm6, %v1082_v47  ;;  %1288 = vrot.lane.b32.xlu0 %v1781_v2, %s5515_s28 }
 0x182   : > { %1480 = vrot.lane.b32.xlu1 %v6003_v21, %s5516_s29 }
 0x183   : > { %v1660_v6 = vpop.permute.xlu0 %1659 }
 0x184   : > { %v1851_v7 = vpop.permute.xlu1 %1850  ;;  %1743 = vst.msk [vmem:[#allocation3 + $0x68] sm:$0xff] %vm1729_vm9, %v1660_v6 }
 0x185   : > { %1935 = vst.msk [vmem:[#allocation3 + $0x60] sm:$0xff] %vm1922_vm10, %v1851_v7  ;;  %713 = vrot.lane.b32.xlu0 %v1781_v2, %s5511_s24 }
 0x186   : > { %904 = vrot.lane.b32.xlu1 %v6003_v21, %s5513_s26  ;;  %v1590_v21 = vld [vmem:[#allocation2 + $0x129] sm:$0xff] }
 0x187   : > { %v507_v9 = vpop.permute.xlu0 %506 }
 0x188   : > { %v1084_v10 = vpop.permute.xlu1 %1083  ;;  %587 = vst.msk [vmem:[#allocation3 + $0x80] sm:$0xff] %vm570_vm3, %v507_v9 }
 0x189   : > { %1165 = vst.msk [vmem:[#allocation3 + $0x78] sm:$0xff] %vm1149_vm6, %v1084_v10  ;;  %1482 = vrot.lane.b32.xlu0 %v6019_v29, %s5516_s29 }
 0x18a   : > { %1673 = vrot.lane.b32.xlu1 %v1589_v8, %s5517_s9 }
 0x18b   : > { %v1275_v12 = vpop.permute.xlu0 %1274 }
 0x18c   : > { %v1853_v13 = vpop.permute.xlu1 %1852  ;;  %v1967_v14 = vld [vmem:[#allocation3 + $0x60] sm:$0xff]  ;;  %1357 = vst.msk [vmem:[#allocation3 + $0x70] sm:$0xff] %vm1342_vm7, %v1275_v12 }
 0x18d   : > { %1936 = vst.msk [vmem:[#allocation3 + $0x68] sm:$0xff] %vm1922_vm10, %v1853_v13  ;;  %5296 = vmatprep.mubr.msk.f32.mxu0 %vm1999_vm11, %v1967_v14  ;;  %906 = vrot.lane.b32.xlu0 %v6019_v29, %s5513_s26  ;;  %v1783_v29 = vld [vmem:[#allocation2 + $0x12a] sm:$0xff] }
 0x18e   : > { %1097 = vrot.lane.b32.xlu1 %v1589_v8, %s5514_s27 }
 0x18f   : > { %v509_v16 = vpop.permute.xlu0 %508 }
 0x190   : > { %v700_v17 = vpop.permute.xlu1 %699  ;;  %588 = vst.msk [vmem:[#allocation3 + $0x88] sm:$0xff] %vm570_vm3, %v509_v16 }
 0x191   : > { %780 = vst.msk [vmem:[#allocation3 + $0x80] sm:$0xff] %vm763_vm4, %v700_v17  ;;  %1675 = vrot.lane.b32.xlu0 %v1590_v21, %s5517_s9 }
 0x192   : > { %1866 = vrot.lane.b32.xlu1 %v1782_v15, %s5518_s14 }
 0x193   : > { %v1277_v18 = vpop.permute.xlu0 %1276 }
 0x194   : > { %v1469_v19 = vpop.permute.xlu1 %1468  ;;  %v1968_v22 = vld [vmem:[#allocation3 + $0x68] sm:$0xff]  ;;  %1358 = vst.msk [vmem:[#allocation3 + $0x78] sm:$0xff] %vm1342_vm7, %v1277_v18  ;;  %v1595_v18 = vld [vmem:[#allocation2 + $0x169] sm:$0xff] }
 0x195   : > { %1551 = vst.msk [vmem:[#allocation3 + $0x70] sm:$0xff] %vm1536_vm8, %v1469_v19  ;;  %5297 = vmatmul.mubr.msk.f32.gmra.mrb[12].mxu0 %vm1999_vm11, %v1968_v22  ;;  %522 = vrot.lane.b32.xlu0 %v1589_v8, %s5512_s25  ;;  %v1787_v8 = vld [vmem:[#allocation2 + $0x15a] sm:$0xff] }
 0x196   : > { %1099 = vrot.lane.b32.xlu1 %v1590_v21, %s5514_s27 }
 0x197   : > { %v702_v23 = vpop.permute.xlu0 %701 }
 0x198   : > { %v893_v28 = vpop.permute.xlu1 %892  ;;  %781 = vst.msk [vmem:[#allocation3 + $0x88] sm:$0xff] %vm763_vm4, %v702_v23 }
 0x199   : > { %973 = vst.msk [vmem:[#allocation3 + $0x80] sm:$0xff] %vm956_vm5, %v893_v28  ;;  %1290 = vrot.lane.b32.xlu0 %v1782_v15, %s5515_s28  ;;  %v1596_v28 = vld [vmem:[#allocation2 + $0x171] sm:$0xff] }
 0x19a   : > { %1868 = vrot.lane.b32.xlu1 %v1783_v29, %s5518_s14 }
 0x19b   : > { %v1471_v24 = vpop.permute.xlu0 %1470 }
 0x19c   : > { %v1662_v25 = vpop.permute.xlu1 %1661  ;;  %1552 = vst.msk [vmem:[#allocation3 + $0x78] sm:$0xff] %vm1536_vm8, %v1471_v24 }
 0x19d   : > { %1744 = vst.msk [vmem:[#allocation3 + $0x70] sm:$0xff] %vm1729_vm9, %v1662_v25  ;;  %524 = vrot.lane.b32.xlu0 %v1590_v21, %s5512_s25  ;;  %v1788_v25 = vld [vmem:[#allocation2 + $0x16a] sm:$0xff] }
 0x19e   : > { %715 = vrot.lane.b32.xlu1 %v1782_v15, %s5511_s24 }
 0x19f   : > { %v895_v26 = vpop.permute.xlu0 %894 }
 0x1a0   : > { %v1086_v27 = vpop.permute.xlu1 %1085  ;;  %974 = vst.msk [vmem:[#allocation3 + $0x88] sm:$0xff] %vm956_vm5, %v895_v26 }
 0x1a1   : > { %1166 = vst.msk [vmem:[#allocation3 + $0x80] sm:$0xff] %vm1149_vm6, %v1086_v27  ;;  %1292 = vrot.lane.b32.xlu0 %v1783_v29, %s5515_s28 }
 0x1a2   : > { %1484 = vrot.lane.b32.xlu1 %v6053_v48, %s5516_s29 }
 0x1a3   : > { %v1664_v30 = vpop.permute.xlu0 %1663 }
 0x1a4   : > { %v1855_v31 = vpop.permute.xlu1 %1854  ;;  %1745 = vst.msk [vmem:[#allocation3 + $0x78] sm:$0xff] %vm1729_vm9, %v1664_v30 }
 0x1a5   : > { %1937 = vst.msk [vmem:[#allocation3 + $0x70] sm:$0xff] %vm1922_vm10, %v1855_v31  ;;  %717 = vrot.lane.b32.xlu0 %v1783_v29, %s5511_s24 }
 0x1a6   : > { %908 = vrot.lane.b32.xlu1 %v6053_v48, %s5513_s26 }
 0x1a7   : > { %v511_v36 = vpop.permute.xlu0 %510 }
 0x1a8   : > { %v6364_v32 = vpop.f32.mrb[0].mxu0  ;;  %589 = vst.msk [vmem:[#allocation3 + $0x90] sm:$0xff] %vm570_vm3, %v511_v36  ;;  %v1088_v34 = vpop.permute.xlu1 %1087 }
 0x1a9   : > { %v6367_v35 = vpop.f32.mrb[1].mxu0  ;;  %1167 = vst.msk [vmem:[#allocation3 + $0x88] sm:$0xff] %vm1149_vm6, %v1088_v34  ;;  %1486 = vrot.lane.b32.xlu0 %v6147_v4, %s5516_s29 }
 0x1aa   : > { %1677 = vrot.lane.b32.xlu1 %v1591_v55, %s5517_s9 }
 0x1ab   : > { %v1279_v38 = vpop.permute.xlu0 %1278 }
 0x1ac   : > { %v1969_v33 = vld [vmem:[#allocation3 + $0x70] sm:$0xff]  ;;  %1359 = vst.msk [vmem:[#allocation3 + $0x80] sm:$0xff] %vm1342_vm7, %v1279_v38  ;;  %v1857_v48 = vpop.permute.xlu1 %1856 }
 0x1ad   : > { %5299 = vmatprep.mubr.msk.f32.mxu0 %vm1999_vm11, %v1969_v33  ;;  %1938 = vst.msk [vmem:[#allocation3 + $0x78] sm:$0xff] %vm1922_vm10, %v1857_v48  ;;  %910 = vrot.lane.b32.xlu0 %v6147_v4, %s5513_s26  ;;  %v1404_v48 = vld [vmem:[#allocation2 + $0x180] sm:$0xff] }
 0x1ae   : > { %1101 = vrot.lane.b32.xlu1 %v1591_v55, %s5514_s27 }
 0x1af   : > { %v513_v41 = vpop.permute.xlu0 %512 }
 0x1b0   : > { %590 = vst.msk [vmem:[#allocation3 + $0x98] sm:$0xff] %vm570_vm3, %v513_v41  ;;  %v704_v42 = vpop.permute.xlu1 %703 }
 0x1b1   : > { %782 = vst.msk [vmem:[#allocation3 + $0x90] sm:$0xff] %vm763_vm4, %v704_v42  ;;  %1679 = vrot.lane.b32.xlu0 %v1592_v39, %s5517_s9  ;;  %v1405_v42 = vld [vmem:[#allocation2 + $0x188] sm:$0xff] }
 0x1b2   : > { %1870 = vrot.lane.b32.xlu1 %v1784_v40, %s5518_s14 }
 0x1b3   : > { %v1281_v43 = vpop.permute.xlu0 %1280 }
 0x1b4   : > { %1360 = vst.msk [vmem:[#allocation3 + $0x88] sm:$0xff] %vm1342_vm7, %v1281_v43  ;;  %v1473_v44 = vpop.permute.xlu1 %1472  ;;  %v1970_v45 = vld [vmem:[#allocation3 + $0x78] sm:$0xff] }
 0x1b5   : > { %1553 = vst.msk [vmem:[#allocation3 + $0x80] sm:$0xff] %vm1536_vm8, %v1473_v44  ;;  %5300 = vmatmul.mubr.msk.f32.gmra.mrb[14].mxu0 %vm1999_vm11, %v1970_v45  ;;  %526 = vrot.lane.b32.xlu0 %v1591_v55, %s5512_s25  ;;  %v1789_v55 = vld [vmem:[#allocation2 + $0x172] sm:$0xff]  ;;  %v1597_v45 = vld [vmem:[#allocation2 + $0x181] sm:$0xff] }
 0x1b6   : > { %1103 = vrot.lane.b32.xlu1 %v1592_v39, %s5514_s27 }
 0x1b7   : > { %v706_v4 = vpop.permute.xlu0 %705 }
 0x1b8   : > { %783 = vst.msk [vmem:[#allocation3 + $0x98] sm:$0xff] %vm763_vm4, %v706_v4  ;;  %v897_v49 = vpop.permute.xlu1 %896 }
 0x1b9   : > { %975 = vst.msk [vmem:[#allocation3 + $0x90] sm:$0xff] %vm956_vm5, %v897_v49  ;;  %1294 = vrot.lane.b32.xlu0 %v1784_v40, %s5515_s28 }
 0x1ba   : > { %1872 = vrot.lane.b32.xlu1 %v1785_v46, %s5518_s14 }
 0x1bb   : > { %v1475_v51 = vpop.permute.xlu0 %1474 }
 0x1bc   : > { %1554 = vst.msk [vmem:[#allocation3 + $0x88] sm:$0xff] %vm1536_vm8, %v1475_v51  ;;  %v1666_v57 = vpop.permute.xlu1 %1665 }
 0x1bd   : > { %1746 = vst.msk [vmem:[#allocation3 + $0x80] sm:$0xff] %vm1729_vm9, %v1666_v57  ;;  %528 = vrot.lane.b32.xlu0 %v1592_v39, %s5512_s25 }
 0x1be   : > { %719 = vrot.lane.b32.xlu1 %v1784_v40, %s5511_s24 }
 0x1bf   : > { %v899_v52 = vpop.permute.xlu0 %898 }
 0x1c0   : > { %976 = vst.msk [vmem:[#allocation3 + $0x98] sm:$0xff] %vm956_vm5, %v899_v52  ;;  %v1090_v53 = vpop.permute.xlu1 %1089  ;;  %v1598_v52 = vld [vmem:[#allocation2 + $0x189] sm:$0xff] }
 0x1c1   : > { %1168 = vst.msk [vmem:[#allocation3 + $0x90] sm:$0xff] %vm1149_vm6, %v1090_v53  ;;  %1296 = vrot.lane.b32.xlu0 %v1785_v46, %s5515_s28 }
 0x1c2   : > { %1488 = vrot.lane.b32.xlu1 %v6219_v50, %s5516_s29 }
 0x1c3   : > { %v1668_v54 = vpop.permute.xlu0 %1667 }
 0x1c4   : > { %1747 = vst.msk [vmem:[#allocation3 + $0x88] sm:$0xff] %vm1729_vm9, %v1668_v54  ;;  %v1859_v56 = vpop.permute.xlu1 %1858  ;;  %v1790_v54 = vld [vmem:[#allocation2 + $0x182] sm:$0xff] }
 0x1c5   : > { %1939 = vst.msk [vmem:[#allocation3 + $0x80] sm:$0xff] %vm1922_vm10, %v1859_v56  ;;  %721 = vrot.lane.b32.xlu0 %v1785_v46, %s5511_s24 }
 0x1c6   : > { %912 = vrot.lane.b32.xlu1 %v6219_v50, %s5513_s26 }
 0x1c7   : > { %v515_v59 = vpop.permute.xlu0 %514 }
 0x1c8   : > { %v6406_v60 = vpop.f32.mrb[2].mxu0  ;;  %591 = vst.msk [vmem:[#allocation3 + $0xa0] sm:$0xff] %vm570_vm3, %v515_v59  ;;  %v1092_v2 = vpop.permute.xlu1 %1091 }
 0x1c9   : > { %v6409_v62 = vpop.f32.mrb[3].mxu0  ;;  %1169 = vst.msk [vmem:[#allocation3 + $0x98] sm:$0xff] %vm1149_vm6, %v1092_v2  ;;  %1490 = vrot.lane.b32.xlu0 %v6235_v20, %s5516_s29 }
 0x1ca   : > { %1681 = vrot.lane.b32.xlu1 %v1593_v61, %s5517_s9 }
 0x1cb   : > { %v1283_v63 = vpop.permute.xlu0 %1282 }
 0x1cc   : > { %1361 = vst.msk [vmem:[#allocation3 + $0x90] sm:$0xff] %vm1342_vm7, %v1283_v63  ;;  %v1861_v50 = vpop.permute.xlu1 %1860  ;;  %v1971_v1 = vld [vmem:[#allocation3 + $0x80] sm:$0xff] }
 0x1cd   : > { %1940 = vst.msk [vmem:[#allocation3 + $0x88] sm:$0xff] %vm1922_vm10, %v1861_v50  ;;  %914 = vrot.lane.b32.xlu0 %v6235_v20, %s5513_s26  ;;  %5302 = vmatprep.mubr.msk.f32.mxu0 %vm1999_vm11, %v1971_v1  ;;  %v1791_v63 = vld [vmem:[#allocation2 + $0x18a] sm:$0xff] }
 0x1ce   : > { %1105 = vrot.lane.b32.xlu1 %v1593_v61, %s5514_s27 }
 0x1cf   : > { %v517_v0 = vpop.permute.xlu0 %516 }
 0x1d0   : > { %592 = vst.msk [vmem:[#allocation3 + $0xa8] sm:$0xff] %vm570_vm3, %v517_v0  ;;  %v708_v47 = vpop.permute.xlu1 %707 }
 0x1d1   : > { %784 = vst.msk [vmem:[#allocation3 + $0xa0] sm:$0xff] %vm763_vm4, %v708_v47  ;;  %1683 = vrot.lane.b32.xlu0 %v1594_v3, %s5517_s9 }
 0x1d2   : > { %1874 = vrot.lane.b32.xlu1 %v1786_v5, %s5518_s14 }
 0x1d3   : > { %v1285_v11 = vpop.permute.xlu0 %1284 }
 0x1d4   : > { %1362 = vst.msk [vmem:[#allocation3 + $0x98] sm:$0xff] %vm1342_vm7, %v1285_v11  ;;  %v1477_v20 = vpop.permute.xlu1 %1476  ;;  %v1972_v6 = vld [vmem:[#allocation3 + $0x88] sm:$0xff] }
 0x1d5   : > { %1555 = vst.msk [vmem:[#allocation3 + $0x90] sm:$0xff] %vm1536_vm8, %v1477_v20  ;;  %5303 = vmatmul.mubr.msk.f32.gmra.mrb[16].mxu0 %vm1999_vm11, %v1972_v6  ;;  %530 = vrot.lane.b32.xlu0 %v1593_v61, %s5512_s25  ;;  %v1599_v11 = vld [vmem:[#allocation2 + $0x199] sm:$0xff]  ;;  %v1600_v6 = vld [vmem:[#allocation2 + $0x1a1] sm:$0xff] }
 0x1d6   : > { %1107 = vrot.lane.b32.xlu1 %v1594_v3, %s5514_s27 }
 0x1d7   : > { %v710_v7 = vpop.permute.xlu0 %709 }
 0x1d8   : > { %785 = vst.msk [vmem:[#allocation3 + $0xa8] sm:$0xff] %vm763_vm4, %v710_v7  ;;  %v901_v9 = vpop.permute.xlu1 %900 }
 0x1d9   : > { %977 = vst.msk [vmem:[#allocation3 + $0xa0] sm:$0xff] %vm956_vm5, %v901_v9  ;;  %1298 = vrot.lane.b32.xlu0 %v1786_v5, %s5515_s28 }
 0x1da   : > { %1876 = vrot.lane.b32.xlu1 %v1787_v8, %s5518_s14 }
 0x1db   : > { %v1479_v10 = vpop.permute.xlu0 %1478 }
 0x1dc   : > { %1556 = vst.msk [vmem:[#allocation3 + $0x98] sm:$0xff] %vm1536_vm8, %v1479_v10  ;;  %v1670_v12 = vpop.permute.xlu1 %1669  ;;  %v1793_v10 = vld [vmem:[#allocation2 + $0x1a2] sm:$0xff] }
 0x1dd   : > { %1748 = vst.msk [vmem:[#allocation3 + $0x90] sm:$0xff] %vm1729_vm9, %v1670_v12  ;;  %532 = vrot.lane.b32.xlu0 %v1594_v3, %s5512_s25  ;;  %v1406_v3 = vld [vmem:[#allocation2 + $0x198] sm:$0xff] }
 0x1de   : > { %723 = vrot.lane.b32.xlu1 %v1786_v5, %s5511_s24  ;;  %v1407_v5 = vld [vmem:[#allocation2 + $0x1a0] sm:$0xff] }
 0x1df   : > { %v903_v13 = vpop.permute.xlu0 %902 }
 0x1e0   : > { %978 = vst.msk [vmem:[#allocation3 + $0xa8] sm:$0xff] %vm956_vm5, %v903_v13  ;;  %v1094_v14 = vpop.permute.xlu1 %1093 }
 0x1e1   : > { %1170 = vst.msk [vmem:[#allocation3 + $0xa0] sm:$0xff] %vm1149_vm6, %v1094_v14  ;;  %1300 = vrot.lane.b32.xlu0 %v1787_v8, %s5515_s28 }
 0x1e2   : > { %1492 = vrot.lane.b32.xlu1 %v6269_v58, %s5516_s29 }
 0x1e3   : > { %v1672_v21 = vpop.permute.xlu0 %1671 }
 0x1e4   : > { %1749 = vst.msk [vmem:[#allocation3 + $0x98] sm:$0xff] %vm1729_vm9, %v1672_v21  ;;  %v1863_v15 = vpop.permute.xlu1 %1862 }
 0x1e5   : > { %1941 = vst.msk [vmem:[#allocation3 + $0x90] sm:$0xff] %vm1922_vm10, %v1863_v15  ;;  %725 = vrot.lane.b32.xlu0 %v1787_v8, %s5511_s24  ;;  %v1792_v8 = vld [vmem:[#allocation2 + $0x19a] sm:$0xff] }
 0x1e6   : > { %916 = vrot.lane.b32.xlu1 %v6269_v58, %s5513_s26 }
 0x1e7   : > { %v519_v16 = vpop.permute.xlu0 %518 }
 0x1e8   : > { %v6448_v17 = vpop.f32.mrb[4].mxu0  ;;  %593 = vst.msk [vmem:[#allocation3 + $0xb0] sm:$0xff] %vm570_vm3, %v519_v16  ;;  %v1096_v19 = vpop.permute.xlu1 %1095 }
 0x1e9   : > { %v6451_v22 = vpop.f32.mrb[5].mxu0  ;;  %1171 = vst.msk [vmem:[#allocation3 + $0xa8] sm:$0xff] %vm1149_vm6, %v1096_v19  ;;  %1494 = vrot.lane.b32.xlu0 %v6285_v37, %s5516_s29 }
 0x1ea   : > { %1685 = vrot.lane.b32.xlu1 %v1595_v18, %s5517_s9 }
 0x1eb   : > { %v1287_v29 = vpop.permute.xlu0 %1286 }
 0x1ec   : > { %1363 = vst.msk [vmem:[#allocation3 + $0xa0] sm:$0xff] %vm1342_vm7, %v1287_v29  ;;  %v1865_v58 = vpop.permute.xlu1 %1864  ;;  %v1973_v23 = vld [vmem:[#allocation3 + $0x90] sm:$0xff] }
 0x1ed   : > { %1942 = vst.msk [vmem:[#allocation3 + $0x98] sm:$0xff] %vm1922_vm10, %v1865_v58  ;;  %918 = vrot.lane.b32.xlu0 %v6285_v37, %s5513_s26  ;;  %5305 = vmatprep.mubr.msk.f32.mxu0 %vm1999_vm11, %v1973_v23 }
 0x1ee   : > { %1109 = vrot.lane.b32.xlu1 %v1595_v18, %s5514_s27 }
 0x1ef   : > { %v521_v24 = vpop.permute.xlu0 %520 }
 0x1f0   : > { %594 = vst.msk [vmem:[#allocation3 + $0xb8] sm:$0xff] %vm570_vm3, %v521_v24  ;;  %v712_v26 = vpop.permute.xlu1 %711 }
 0x1f1   : > { %786 = vst.msk [vmem:[#allocation3 + $0xb0] sm:$0xff] %vm763_vm4, %v712_v26  ;;  %1687 = vrot.lane.b32.xlu0 %v1596_v28, %s5517_s9 }
 0x1f2   : > { %1878 = vrot.lane.b32.xlu1 %v1788_v25, %s5518_s14 }
 0x1f3   : > { %v1289_v27 = vpop.permute.xlu0 %1288 }
 0x1f4   : > { %1364 = vst.msk [vmem:[#allocation3 + $0xa8] sm:$0xff] %vm1342_vm7, %v1289_v27  ;;  %v1481_v37 = vpop.permute.xlu1 %1480  ;;  %v1974_v30 = vld [vmem:[#allocation3 + $0x98] sm:$0xff] }
 0x1f5   : > { %1557 = vst.msk [vmem:[#allocation3 + $0xa0] sm:$0xff] %vm1536_vm8, %v1481_v37  ;;  %5306 = vmatmul.mubr.msk.f32.gmra.mrb[18].mxu0 %vm1999_vm11, %v1974_v30  ;;  %534 = vrot.lane.b32.xlu0 %v1595_v18, %s5512_s25 }
 0x1f6   : > { %1111 = vrot.lane.b32.xlu1 %v1596_v28, %s5514_s27 }
 0x1f7   : > { %v714_v31 = vpop.permute.xlu0 %713 }
 0x1f8   : > { %787 = vst.msk [vmem:[#allocation3 + $0xb8] sm:$0xff] %vm763_vm4, %v714_v31  ;;  %v905_v36 = vpop.permute.xlu1 %904 }
 0x1f9   : > { %979 = vst.msk [vmem:[#allocation3 + $0xb0] sm:$0xff] %vm956_vm5, %v905_v36  ;;  %1302 = vrot.lane.b32.xlu0 %v1788_v25, %s5515_s28 }
 0x1fa   : > { %1880 = vrot.lane.b32.xlu1 %v1789_v55, %s5518_s14 }
 0x1fb   : > { %v1483_v34 = vpop.permute.xlu0 %1482 }
 0x1fc   : > { %1558 = vst.msk [vmem:[#allocation3 + $0xa8] sm:$0xff] %vm1536_vm8, %v1483_v34  ;;  %v1674_v38 = vpop.permute.xlu1 %1673 }
 0x1fd   : > { %1750 = vst.msk [vmem:[#allocation3 + $0xa0] sm:$0xff] %vm1729_vm9, %v1674_v38  ;;  %536 = vrot.lane.b32.xlu0 %v1596_v28, %s5512_s25 }
 0x1fe   : > { %727 = vrot.lane.b32.xlu1 %v1788_v25, %s5511_s24 }
 0x1ff   : > { %v907_v33 = vpop.permute.xlu0 %906 }
 0x200   : > { %980 = vst.msk [vmem:[#allocation3 + $0xb8] sm:$0xff] %vm956_vm5, %v907_v33  ;;  %v1098_v39 = vpop.permute.xlu1 %1097 }
 0x201   : > { %1172 = vst.msk [vmem:[#allocation3 + $0xb0] sm:$0xff] %vm1149_vm6, %v1098_v39  ;;  %1304 = vrot.lane.b32.xlu0 %v1789_v55, %s5515_s28 }
 0x202   : > { %1496 = vrot.lane.b32.xlu1 %v1404_v48, %s5516_s29 }
 0x203   : > { %v1676_v40 = vpop.permute.xlu0 %1675 }
 0x204   : > { %1751 = vst.msk [vmem:[#allocation3 + $0xa8] sm:$0xff] %vm1729_vm9, %v1676_v40  ;;  %v1867_v41 = vpop.permute.xlu1 %1866 }
 0x205   : > { %1943 = vst.msk [vmem:[#allocation3 + $0xa0] sm:$0xff] %vm1922_vm10, %v1867_v41  ;;  %729 = vrot.lane.b32.xlu0 %v1789_v55, %s5511_s24 }
 0x206   : > { %920 = vrot.lane.b32.xlu1 %v1404_v48, %s5513_s26 }
 0x207   : > { %v523_v43 = vpop.permute.xlu0 %522 }
 0x208   : > { %v6488_v44 = vpop.f32.mrb[6].mxu0  ;;  %595 = vst.msk [vmem:[#allocation3 + $0xc0] sm:$0xff] %vm570_vm3, %v523_v43  ;;  %v1100_v4 = vpop.permute.xlu1 %1099 }
 0x209   : > { %v6491_v46 = vpop.f32.mrb[7].mxu0  ;;  %1173 = vst.msk [vmem:[#allocation3 + $0xb8] sm:$0xff] %vm1149_vm6, %v1100_v4  ;;  %1498 = vrot.lane.b32.xlu0 %v1405_v42, %s5516_s29 }
 0x20a   : > { %1689 = vrot.lane.b32.xlu1 %v1597_v45, %s5517_s9 }
 0x20b   : > { %v1291_v49 = vpop.permute.xlu0 %1290 }
 0x20c   : > { %1365 = vst.msk [vmem:[#allocation3 + $0xb0] sm:$0xff] %vm1342_vm7, %v1291_v49  ;;  %v1869_v51 = vpop.permute.xlu1 %1868  ;;  %v1975_v57 = vld [vmem:[#allocation3 + $0xa0] sm:$0xff] }
 0x20d   : > { %1944 = vst.msk [vmem:[#allocation3 + $0xa8] sm:$0xff] %vm1922_vm10, %v1869_v51  ;;  %922 = vrot.lane.b32.xlu0 %v1405_v42, %s5513_s26  ;;  %5308 = vmatprep.mubr.msk.f32.mxu0 %vm1999_vm11, %v1975_v57 }
 0x20e   : > { %1113 = vrot.lane.b32.xlu1 %v1597_v45, %s5514_s27 }
 0x20f   : > { %v525_v53 = vpop.permute.xlu0 %524 }
 0x210   : > { %596 = vst.msk [vmem:[#allocation3 + $0xc8] sm:$0xff] %vm570_vm3, %v525_v53  ;;  %v716_v56 = vpop.permute.xlu1 %715 }
 0x211   : > { %788 = vst.msk [vmem:[#allocation3 + $0xc0] sm:$0xff] %vm763_vm4, %v716_v56  ;;  %1691 = vrot.lane.b32.xlu0 %v1598_v52, %s5517_s9 }
 0x212   : > { %1882 = vrot.lane.b32.xlu1 %v1790_v54, %s5518_s14 }
 0x213   : > { %v1293_v59 = vpop.permute.xlu0 %1292 }
 0x214   : > { %1366 = vst.msk [vmem:[#allocation3 + $0xb8] sm:$0xff] %vm1342_vm7, %v1293_v59  ;;  %v1485_v61 = vpop.permute.xlu1 %1484  ;;  %v1976_v2 = vld [vmem:[#allocation3 + $0xa8] sm:$0xff] }
 0x215   : > { %1559 = vst.msk [vmem:[#allocation3 + $0xb0] sm:$0xff] %vm1536_vm8, %v1485_v61  ;;  %5309 = vmatmul.mubr.msk.f32.gmra.mrb[20].mxu0 %vm1999_vm11, %v1976_v2  ;;  %1115 = vrot.lane.b32.xlu0 %v1598_v52, %s5514_s27 }
 0x216   : > { %1306 = vrot.lane.b32.xlu1 %v1790_v54, %s5515_s28 }
 0x217   : > { %v718_v50 = vpop.permute.xlu0 %717 }
 0x218   : > { %789 = vst.msk [vmem:[#allocation3 + $0xc8] sm:$0xff] %vm763_vm4, %v718_v50  ;;  %v909_v1 = vpop.permute.xlu1 %908 }
 0x219   : > { %981 = vst.msk [vmem:[#allocation3 + $0xc0] sm:$0xff] %vm956_vm5, %v909_v1  ;;  %1884 = vrot.lane.b32.xlu0 %v1791_v63, %s5518_s14 }
 0x21a   : > { %1308 = vrot.lane.b32.xlu1 %v1791_v63, %s5515_s28 }
 0x21b   : > { %v1487_v0 = vpop.permute.xlu0 %1486 }
 0x21c   : > { %1560 = vst.msk [vmem:[#allocation3 + $0xb8] sm:$0xff] %vm1536_vm8, %v1487_v0  ;;  %v1678_v47 = vpop.permute.xlu1 %1677 }
 0x21d   : > { %1752 = vst.msk [vmem:[#allocation3 + $0xb0] sm:$0xff] %vm1729_vm9, %v1678_v47  ;;  %1500 = vrot.lane.b32.xlu0 %v1406_v3, %s5516_s29 }
 0x21e   : > { %1502 = vrot.lane.b32.xlu1 %v1407_v5, %s5516_s29  ;;  %s5520_s29 = smov 64  }
 0x21f   : > { %v911_v20 = vpop.permute.xlu0 %910 }
 0x220   : > { %982 = vst.msk [vmem:[#allocation3 + $0xc8] sm:$0xff] %vm956_vm5, %v911_v20  ;;  %v1102_v7 = vpop.permute.xlu1 %1101 }
 0x221   : > { %1174 = vst.msk [vmem:[#allocation3 + $0xc0] sm:$0xff] %vm1149_vm6, %v1102_v7  ;;  %1693 = vrot.lane.b32.xlu0 %v1599_v11, %s5517_s9 }
 0x222   : > { %1695 = vrot.lane.b32.xlu1 %v1600_v6, %s5517_s9  ;;  %s5521_s9 = smov 96  }
 0x223   : > { %v1680_v9 = vpop.permute.xlu0 %1679 }
 0x224   : > { %1753 = vst.msk [vmem:[#allocation3 + $0xb8] sm:$0xff] %vm1729_vm9, %v1680_v9  ;;  %v1871_v12 = vpop.permute.xlu1 %1870 }
 0x225   : > { %1945 = vst.msk [vmem:[#allocation3 + $0xb0] sm:$0xff] %vm1922_vm10, %v1871_v12  ;;  %1886 = vrot.lane.b32.xlu0 %v1792_v8, %s5518_s14 }
 0x226   : > { %1888 = vrot.lane.b32.xlu1 %v1793_v10, %s5518_s14 }
 0x227   : > { %v527_v13 = vpop.permute.xlu0 %526 }
 0x228   : > { %v6526_v14 = vpop.f32.mrb[8].mxu0  ;;  %597 = vst.msk [vmem:[#allocation3 + $0xd0] sm:$0xff] %vm570_vm3, %v527_v13  ;;  %v1104_v21 = vpop.permute.xlu1 %1103 }
 0x229   : > { %v6529_v15 = vpop.f32.mrb[9].mxu0  ;;  %1175 = vst.msk [vmem:[#allocation3 + $0xc8] sm:$0xff] %vm1149_vm6, %v1104_v21 }
 0x22b   : > { %v1295_v16 = vpop.permute.xlu0 %1294 }
 0x22c   : > { %1367 = vst.msk [vmem:[#allocation3 + $0xc0] sm:$0xff] %vm1342_vm7, %v1295_v16  ;;  %v1873_v18 = vpop.permute.xlu1 %1872  ;;  %v1977_v19 = vld [vmem:[#allocation3 + $0xb0] sm:$0xff] }
 0x22d   : > { %1946 = vst.msk [vmem:[#allocation3 + $0xb8] sm:$0xff] %vm1922_vm10, %v1873_v18  ;;  %5311 = vmatprep.mubr.msk.f32.mxu0 %vm1999_vm11, %v1977_v19 }
 0x22f   : > { %v529_v29 = vpop.permute.xlu0 %528 }
 0x230   : > { %598 = vst.msk [vmem:[#allocation3 + $0xd8] sm:$0xff] %vm570_vm3, %v529_v29  ;;  %v720_v58 = vpop.permute.xlu1 %719 }
 0x231   : > { %790 = vst.msk [vmem:[#allocation3 + $0xd0] sm:$0xff] %vm763_vm4, %v720_v58 }
 0x233   : > { %v1297_v23 = vpop.permute.xlu0 %1296 }
 0x234   : > { %1368 = vst.msk [vmem:[#allocation3 + $0xc8] sm:$0xff] %vm1342_vm7, %v1297_v23  ;;  %v1489_v28 = vpop.permute.xlu1 %1488  ;;  %v1978_v24 = vld [vmem:[#allocation3 + $0xb8] sm:$0xff] }
 0x235   : > { %1561 = vst.msk [vmem:[#allocation3 + $0xc0] sm:$0xff] %vm1536_vm8, %v1489_v28  ;;  %5312 = vmatmul.mubr.msk.f32.gmra.mrb[22].mxu0 %vm1999_vm11, %v1978_v24 }
 0x237   : > { %v722_v25 = vpop.permute.xlu0 %721 }
 0x238   : > { %791 = vst.msk [vmem:[#allocation3 + $0xd8] sm:$0xff] %vm763_vm4, %v722_v25  ;;  %v913_v26 = vpop.permute.xlu1 %912 }
 0x239   : > { %983 = vst.msk [vmem:[#allocation3 + $0xd0] sm:$0xff] %vm956_vm5, %v913_v26 }
 0x23b   : > { %v1491_v27 = vpop.permute.xlu0 %1490 }
 0x23c   : > { %1562 = vst.msk [vmem:[#allocation3 + $0xc8] sm:$0xff] %vm1536_vm8, %v1491_v27  ;;  %v1682_v37 = vpop.permute.xlu1 %1681 }
 0x23d   : > { %1754 = vst.msk [vmem:[#allocation3 + $0xc0] sm:$0xff] %vm1729_vm9, %v1682_v37 }
 0x23f   : > { %v915_v30 = vpop.permute.xlu0 %914 }
 0x240   : > { %984 = vst.msk [vmem:[#allocation3 + $0xd8] sm:$0xff] %vm956_vm5, %v915_v30  ;;  %v1106_v31 = vpop.permute.xlu1 %1105 }
 0x241   : > { %1176 = vst.msk [vmem:[#allocation3 + $0xd0] sm:$0xff] %vm1149_vm6, %v1106_v31 }
 0x243   : > { %v1684_v55 = vpop.permute.xlu0 %1683 }
 0x244   : > { %1755 = vst.msk [vmem:[#allocation3 + $0xc8] sm:$0xff] %vm1729_vm9, %v1684_v55  ;;  %v1875_v36 = vpop.permute.xlu1 %1874 }
 0x245   : > { %1947 = vst.msk [vmem:[#allocation3 + $0xc0] sm:$0xff] %vm1922_vm10, %v1875_v36 }
 0x247   : > { %v531_v34 = vpop.permute.xlu0 %530 }
 0x248   : > { %v6548_v38 = vpop.f32.mrb[10].mxu0  ;;  %599 = vst.msk [vmem:[#allocation3 + $0xe0] sm:$0xff] %vm570_vm3, %v531_v34  ;;  %v1108_v33 = vpop.permute.xlu1 %1107 }
 0x249   : > { %v6551_v48 = vpop.f32.mrb[11].mxu0  ;;  %1177 = vst.msk [vmem:[#allocation3 + $0xd8] sm:$0xff] %vm1149_vm6, %v1108_v33 }
 0x24b   : > { %v1299_v39 = vpop.permute.xlu0 %1298 }
 0x24c   : > { %1369 = vst.msk [vmem:[#allocation3 + $0xd0] sm:$0xff] %vm1342_vm7, %v1299_v39  ;;  %v1877_v40 = vpop.permute.xlu1 %1876  ;;  %v1979_v41 = vld [vmem:[#allocation3 + $0xc0] sm:$0xff] }
 0x24d   : > { %1948 = vst.msk [vmem:[#allocation3 + $0xc8] sm:$0xff] %vm1922_vm10, %v1877_v40  ;;  %5314 = vmatprep.mubr.msk.f32.mxu0 %vm1999_vm11, %v1979_v41 }
 0x24f   : > { %v533_v42 = vpop.permute.xlu0 %532 }
 0x250   : > { %600 = vst.msk [vmem:[#allocation3 + $0xe8] sm:$0xff] %vm570_vm3, %v533_v42  ;;  %v724_v43 = vpop.permute.xlu1 %723 }
 0x251   : > { %792 = vst.msk [vmem:[#allocation3 + $0xe0] sm:$0xff] %vm763_vm4, %v724_v43 }
 0x253   : > { %v1301_v45 = vpop.permute.xlu0 %1300 }
 0x254   : > { %1370 = vst.msk [vmem:[#allocation3 + $0xd8] sm:$0xff] %vm1342_vm7, %v1301_v45  ;;  %v1493_v4 = vpop.permute.xlu1 %1492  ;;  %v1980_v49 = vld [vmem:[#allocation3 + $0xc8] sm:$0xff] }
 0x255   : > { %1563 = vst.msk [vmem:[#allocation3 + $0xd0] sm:$0xff] %vm1536_vm8, %v1493_v4  ;;  %5315 = vmatmul.mubr.msk.f32.gmra.mrb[24].mxu0 %vm1999_vm11, %v1980_v49 }
 0x257   : > { %v726_v51 = vpop.permute.xlu0 %725 }
 0x258   : > { %793 = vst.msk [vmem:[#allocation3 + $0xe8] sm:$0xff] %vm763_vm4, %v726_v51  ;;  %v917_v57 = vpop.permute.xlu1 %916  ;;  %v6623_v51 = vld [vmem:[%s8666_s2] ss:$0 sm:$0xff] }
 0x259   : > { %985 = vst.msk [vmem:[#allocation3 + $0xe0] sm:$0xff] %vm956_vm5, %v917_v57  ;;  %v6627_v57 = vadd.f32 %v6364_v32, %v6623_v51  ;;  %v6645_v32 = vadd.f32 %v6406_v60, %v6623_v51  ;;  %v6661_v60 = vadd.f32 %v6623_v51, %v6491_v46 }
 0x25b   : > { %v1495_v52 = vpop.permute.xlu0 %1494 }
 0x25c   : > { %1564 = vst.msk [vmem:[#allocation3 + $0xd8] sm:$0xff] %vm1536_vm8, %v1495_v52  ;;  %v1686_v53 = vpop.permute.xlu1 %1685  ;;  %v6631_v52 = vadd.f32 %v6623_v51, %v6367_v35  ;;  %v6649_v35 = vadd.f32 %v6623_v51, %v6451_v22 }
 0x25d   : > { %1756 = vst.msk [vmem:[#allocation3 + $0xd0] sm:$0xff] %vm1729_vm9, %v1686_v53  ;;  %v6635_v53 = vadd.f32 %v6623_v51, %v6409_v62 }
 0x25f   : > { %v919_v54 = vpop.permute.xlu0 %918 }
 0x260   : > { %986 = vst.msk [vmem:[#allocation3 + $0xe8] sm:$0xff] %vm956_vm5, %v919_v54  ;;  %v1110_v56 = vpop.permute.xlu1 %1109  ;;  %v2327_v54 = vsel %vm2325_vm12, %v6627_v57, 0.0 }
 0x261   : > { %1178 = vst.msk [vmem:[#allocation3 + $0xe0] sm:$0xff] %vm1149_vm6, %v1110_v56  ;;  %v2326_v56 = vsel %vm2325_vm12, %v6631_v52, 0.0 }
 0x263   : > { %v1688_v59 = vpop.permute.xlu0 %1687 }
 0x264   : > { %1757 = vst.msk [vmem:[#allocation3 + $0xd8] sm:$0xff] %vm1729_vm9, %v1688_v59  ;;  %v1879_v61 = vpop.permute.xlu1 %1878  ;;  %v2329_v59 = vsel %vm2325_vm12, %v6635_v53, 0.0 }
 0x265   : > { %1949 = vst.msk [vmem:[#allocation3 + $0xd0] sm:$0xff] %vm1922_vm10, %v1879_v61  ;;  %v2328_v61 = vadd.f32 %v2327_v54, %v2326_v56 }
 0x267   : > { %v535_v2 = vpop.permute.xlu0 %534  ;;  %v2330_v62 = vadd.f32 %v2329_v59, %v2328_v61 }
 0x268   : > { %v6570_v63 = vpop.f32.mrb[12].mxu0  ;;  %601 = vst.msk [vmem:[#allocation3 + $0xf0] sm:$0xff] %vm570_vm3, %v535_v2  ;;  %v1112_v50 = vpop.permute.xlu1 %1111  ;;  %v2331_v2 = vsel %vm2325_vm12, %v6645_v32, 0.0 }
 0x269   : > { %v6573_v1 = vpop.f32.mrb[13].mxu0  ;;  %1179 = vst.msk [vmem:[#allocation3 + $0xe8] sm:$0xff] %vm1149_vm6, %v1112_v50  ;;  %v2333_v50 = vsel %vm2325_vm12, %v6649_v35, 0.0 }
 0x26b   : > { %v1303_v3 = vpop.permute.xlu0 %1302 }
 0x26c   : > { %1371 = vst.msk [vmem:[#allocation3 + $0xe0] sm:$0xff] %vm1342_vm7, %v1303_v3  ;;  %v1881_v0 = vpop.permute.xlu1 %1880  ;;  %v1981_v5 = vld [vmem:[#allocation3 + $0xd0] sm:$0xff]  ;;  %v2332_v3 = vadd.f32 %v2331_v2, %v2330_v62 }
 0x26d   : > { %1950 = vst.msk [vmem:[#allocation3 + $0xd8] sm:$0xff] %vm1922_vm10, %v1881_v0  ;;  %5317 = vmatprep.mubr.msk.f32.mxu0 %vm1999_vm11, %v1981_v5  ;;  %v6657_v0 = vadd.f32 %v6448_v17, %v6623_v51  ;;  %v6673_v17 = vadd.f32 %v6623_v51, %v6529_v15 }
 0x26e   : > { %v2334_v5 = vadd.f32 %v2333_v50, %v2332_v3 }
 0x26f   : > { %v537_v47 = vpop.permute.xlu0 %536  ;;  %v2335_v22 = vsel %vm2325_vm12, %v6657_v0, 0.0 }
 0x270   : > { %602 = vst.msk [vmem:[#allocation3 + $0xf8] sm:$0xff] %vm570_vm3, %v537_v47  ;;  %v728_v11 = vpop.permute.xlu1 %727  ;;  %v2337_v47 = vsel %vm2325_vm12, %v6661_v60, 0.0 }
 0x271   : > { %794 = vst.msk [vmem:[#allocation3 + $0xf0] sm:$0xff] %vm763_vm4, %v728_v11  ;;  %v2336_v11 = vadd.f32 %v2335_v22, %v2334_v5 }
 0x273   : > { %v1305_v20 = vpop.permute.xlu0 %1304  ;;  %v2338_v46 = vadd.f32 %v2337_v47, %v2336_v11 }
 0x274   : > { %1372 = vst.msk [vmem:[#allocation3 + $0xe8] sm:$0xff] %vm1342_vm7, %v1305_v20  ;;  %v1497_v6 = vpop.permute.xlu1 %1496  ;;  %v1982_v7 = vld [vmem:[#allocation3 + $0xd8] sm:$0xff] }
 0x275   : > { %1565 = vst.msk [vmem:[#allocation3 + $0xe0] sm:$0xff] %vm1536_vm8, %v1497_v6  ;;  %5318 = vmatmul.mubr.msk.f32.gmra.mrb[26].mxu0 %vm1999_vm11, %v1982_v7  ;;  %v6669_v6 = vadd.f32 %v6488_v44, %v6623_v51  ;;  %v6685_v44 = vadd.f32 %v6623_v51, %v6551_v48 }
 0x277   : > { %v730_v8 = vpop.permute.xlu0 %729 }
 0x278   : > { %795 = vst.msk [vmem:[#allocation3 + $0xf8] sm:$0xff] %vm763_vm4, %v730_v8  ;;  %v921_v9 = vpop.permute.xlu1 %920  ;;  %v2339_v8 = vsel %vm2325_vm12, %v6669_v6, 0.0 }
 0x279   : > { %987 = vst.msk [vmem:[#allocation3 + $0xf0] sm:$0xff] %vm956_vm5, %v921_v9  ;;  %v2341_v9 = vsel %vm2325_vm12, %v6673_v17, 0.0 }
 0x27b   : > { %v1499_v10 = vpop.permute.xlu0 %1498 }
 0x27c   : > { %1566 = vst.msk [vmem:[#allocation3 + $0xe8] sm:$0xff] %vm1536_vm8, %v1499_v10  ;;  %v1690_v12 = vpop.permute.xlu1 %1689  ;;  %v2340_v10 = vadd.f32 %v2339_v8, %v2338_v46 }
 0x27d   : > { %1758 = vst.msk [vmem:[#allocation3 + $0xe0] sm:$0xff] %vm1729_vm9, %v1690_v12  ;;  %v6681_v12 = vadd.f32 %v6526_v14, %v6623_v51  ;;  %v6697_v14 = vadd.f32 %v6623_v51, %v6573_v1 }
 0x27f   : > { %v923_v13 = vpop.permute.xlu0 %922  ;;  %v2343_v15 = vsel %vm2325_vm12, %v6681_v12, 0.0 }
 0x280   : > { %988 = vst.msk [vmem:[#allocation3 + $0xf8] sm:$0xff] %vm956_vm5, %v923_v13  ;;  %v1114_v21 = vpop.permute.xlu1 %1113  ;;  %v2342_v13 = vadd.f32 %v2341_v9, %v2340_v10 }
 0x281   : > { %1180 = vst.msk [vmem:[#allocation3 + $0xf0] sm:$0xff] %vm1149_vm6, %v1114_v21  ;;  %v2345_v21 = vsel %vm2325_vm12, %v6685_v44, 0.0 }
 0x283   : > { %v1692_v16 = vpop.permute.xlu0 %1691 }
 0x284   : > { %1759 = vst.msk [vmem:[#allocation3 + $0xe8] sm:$0xff] %vm1729_vm9, %v1692_v16  ;;  %v1883_v18 = vpop.permute.xlu1 %1882  ;;  %v2344_v16 = vadd.f32 %v2343_v15, %v2342_v13 }
 0x285   : > { %1951 = vst.msk [vmem:[#allocation3 + $0xe0] sm:$0xff] %vm1922_vm10, %v1883_v18  ;;  %v6693_v18 = vadd.f32 %v6548_v38, %v6623_v51 }
 0x287   : > { %v1116_v19 = vpop.permute.xlu0 %1115  ;;  %v2347_v48 = vsel %vm2325_vm12, %v6693_v18, 0.0 }
 0x288   : > { %1181 = vst.msk [vmem:[#allocation3 + $0xf8] sm:$0xff] %vm1149_vm6, %v1116_v19  ;;  %v6593_v29 = vpop.f32.mrb[14].mxu0  ;;  %v1307_v58 = vpop.permute.xlu1 %1306  ;;  %v2346_v19 = vadd.f32 %v2345_v21, %v2344_v16 }
 0x289   : > { %1373 = vst.msk [vmem:[#allocation3 + $0xf0] sm:$0xff] %vm1342_vm7, %v1307_v58  ;;  %v6596_v23 = vpop.f32.mrb[15].mxu0  ;;  %v2349_v58 = vsel %vm2325_vm12, %v6697_v14, 0.0 }
 0x28a   : > { %v6709_v38 = vadd.f32 %v6623_v51, %v6596_v23 }
 0x28b   : > { %v1885_v28 = vpop.permute.xlu0 %1884 }
 0x28c   : > { %1952 = vst.msk [vmem:[#allocation3 + $0xe8] sm:$0xff] %vm1922_vm10, %v1885_v28  ;;  %v1309_v24 = vpop.permute.xlu1 %1308  ;;  %v1983_v25 = vld [vmem:[#allocation3 + $0xe0] sm:$0xff]  ;;  %v2348_v28 = vadd.f32 %v2347_v48, %v2346_v19 }
 0x28d   : > { %1374 = vst.msk [vmem:[#allocation3 + $0xf8] sm:$0xff] %vm1342_vm7, %v1309_v24  ;;  %5320 = vmatprep.mubr.msk.f32.mxu0 %vm1999_vm11, %v1983_v25  ;;  %v6705_v24 = vadd.f32 %v6570_v63, %v6623_v51 }
 0x28e   : > { %v2350_v25 = vadd.f32 %v2349_v58, %v2348_v28 }
 0x28f   : > { %v1501_v26 = vpop.permute.xlu0 %1500  ;;  %v2351_v1 = vsel %vm2325_vm12, %v6705_v24, 0.0 }
 0x290   : > { %1567 = vst.msk [vmem:[#allocation3 + $0xf0] sm:$0xff] %vm1536_vm8, %v1501_v26  ;;  %v1503_v27 = vpop.permute.xlu1 %1502  ;;  %v2353_v26 = vsel %vm2325_vm12, %v6709_v38, 0.0 }
 0x291   : > { %1568 = vst.msk [vmem:[#allocation3 + $0xf8] sm:$0xff] %vm1536_vm8, %v1503_v27  ;;  %v2352_v27 = vadd.f32 %v2351_v1, %v2350_v25 }
 0x293   : > { %v1694_v37 = vpop.permute.xlu0 %1693  ;;  %v1984_v30 = vld [vmem:[#allocation3 + $0xe8] sm:$0xff]  ;;  %v2354_v63 = vadd.f32 %v2353_v26, %v2352_v27 }
 0x294   : > { %1760 = vst.msk [vmem:[#allocation3 + $0xf0] sm:$0xff] %vm1729_vm9, %v1694_v37  ;;  %v1696_v31 = vpop.permute.xlu1 %1695  ;;  %5321 = vmatmul.mubr.msk.f32.gmra.mrb[28].mxu0 %vm1999_vm11, %v1984_v30  ;;  %v6717_v37 = vadd.f32 %v6593_v29, %v6623_v51 }
 0x295   : > { %1761 = vst.msk [vmem:[#allocation3 + $0xf8] sm:$0xff] %vm1729_vm9, %v1696_v31 }
 0x296   : > { %v2355_v23 = vsel %vm2325_vm12, %v6717_v37, 0.0 }
 0x297   : > { %v1887_v55 = vpop.permute.xlu0 %1886 }
 0x298   : > { %1953 = vst.msk [vmem:[#allocation3 + $0xf0] sm:$0xff] %vm1922_vm10, %v1887_v55  ;;  %v1889_v36 = vpop.permute.xlu1 %1888  ;;  %v2356_v55 = vadd.f32 %v2355_v23, %v2354_v63 }
 0x299   : > { %1954 = vst.msk [vmem:[#allocation3 + $0xf8] sm:$0xff] %vm1922_vm10, %v1889_v36 }
 0x29f   : > { %v1985_v34 = vld [vmem:[#allocation3 + $0xf0] sm:$0xff] }
 0x2a0   : > { %5323 = vmatprep.mubr.msk.f32.mxu0 %vm1999_vm11, %v1985_v34  ;;  %v1986_v33 = vld [vmem:[#allocation3 + $0xf8] sm:$0xff] }
 0x2a1   : > { %5324 = vmatmul.mubr.msk.f32.gmra.mrb[30].mxu0 %vm1999_vm11, %v1986_v33 }
 0x2a8   : > { %v5304_v39 = vpop.f32.mrb[16].mxu0 }
 0x2a9   : > { %v2246_v40 = vpop.f32.mrb[17].mxu0  ;;  %v6727_v36 = vadd.f32 %v5304_v39, %v6623_v51 }
 0x2aa   : > { %v6720_v30 = vadd.f32 %v6623_v51, %v2246_v40 }
 0x2ab   : > { %v2359_v40 = vsel %vm2325_vm12, %v6727_v36, 0.0 }
 0x2ac   : > { %v2357_v31 = vsel %vm2325_vm12, %v6720_v30, 0.0 }
 0x2ad   : > { %v2358_v33 = vadd.f32 %v2357_v31, %v2356_v55 }
 0x2af   : > { %v2360_v59 = vadd.f32 %v2359_v40, %v2358_v33 }
 0x2c8   : > { %v6610_v41 = vpop.f32.mrb[18].mxu0 }
 0x2c9   : > { %v2256_v42 = vpop.f32.mrb[19].mxu0  ;;  %v6738_v61 = vadd.f32 %v6610_v41, %v6623_v51 }
 0x2ca   : > { %v6730_v34 = vadd.f32 %v6623_v51, %v2256_v42 }
 0x2cb   : > { %v2363_v62 = vsel %vm2325_vm12, %v6738_v61, 0.0 }
 0x2cc   : > { %v2361_v56 = vsel %vm2325_vm12, %v6730_v34, 0.0 }
 0x2cd   : > { %v2362_v42 = vadd.f32 %v2361_v56, %v2360_v59 }
 0x2cf   : > { %v2364_v50 = vadd.f32 %v2363_v62, %v2362_v42 }
 0x2e8   : > { %v6612_v43 = vpop.f32.mrb[20].mxu0 }
 0x2e9   : > { %v6614_v45 = vpop.f32.mrb[21].mxu0  ;;  %v6750_v3 = vadd.f32 %v6612_v43, %v6623_v51 }
 0x2ea   : > { %v6742_v39 = vadd.f32 %v6623_v51, %v6614_v45 }
 0x2eb   : > { %v2367_v45 = vsel %vm2325_vm12, %v6750_v3, 0.0 }
 0x2ec   : > { %v2365_v2 = vsel %vm2325_vm12, %v6742_v39, 0.0 }
 0x2ed   : > { %v2366_v5 = vadd.f32 %v2365_v2, %v2364_v50 }
 0x2ef   : > { %v2368_v47 = vadd.f32 %v2367_v45, %v2366_v5 }
 0x308   : > { %v6616_v4 = vpop.f32.mrb[22].mxu0 }
 0x309   : > { %v6618_v49 = vpop.f32.mrb[23].mxu0  ;;  %v6762_v11 = vadd.f32 %v6616_v4, %v6623_v51 }
 0x30a   : > { %v6754_v41 = vadd.f32 %v6623_v51, %v6618_v49 }
 0x30b   : > { %v2371_v49 = vsel %vm2325_vm12, %v6762_v11, 0.0 }
 0x30c   : > { %v2369_v22 = vsel %vm2325_vm12, %v6754_v41, 0.0 }
 0x30d   : > { %v2370_v43 = vadd.f32 %v2369_v22, %v2368_v47 }
 0x30f   : > { %v2372_v9 = vadd.f32 %v2371_v49, %v2370_v43 }
 0x328   : > { %v5316_v20 = vpop.f32.mrb[24].mxu0 }
 0x329   : > { %v2286_v7 = vpop.f32.mrb[25].mxu0  ;;  %v6772_v10 = vadd.f32 %v5316_v20, %v6623_v51 }
 0x32a   : > { %v6765_v46 = vadd.f32 %v6623_v51, %v2286_v7 }
 0x32b   : > { %v2375_v4 = vsel %vm2325_vm12, %v6772_v10, 0.0 }
 0x32c   : > { %v2373_v8 = vsel %vm2325_vm12, %v6765_v46, 0.0 }
 0x32d   : > { %v2374_v15 = vadd.f32 %v2373_v8, %v2372_v9 }
 0x32f   : > { %v2376_v21 = vadd.f32 %v2375_v4, %v2374_v15 }
 0x348   : > { %v5319_v29 = vpop.f32.mrb[26].mxu0 }
 0x349   : > { %v2296_v54 = vpop.f32.mrb[27].mxu0  ;;  %v6782_v16 = vadd.f32 %v5319_v29, %v6623_v51 }
 0x34a   : > { %v6775_v13 = vadd.f32 %v6623_v51, %v2296_v54 }
 0x34b   : > { %v2379_v20 = vsel %vm2325_vm12, %v6782_v16, 0.0 }
 0x34c   : > { %v2377_v7 = vsel %vm2325_vm12, %v6775_v13, 0.0 }
 0x34d   : > { %v2378_v19 = vadd.f32 %v2377_v7, %v2376_v21 }
 0x34f   : > { %v2380_v1 = vadd.f32 %v2379_v20, %v2378_v19 }
 0x367   : > { %v5322_v48 = vpop.f32.mrb[28].mxu0 }
 0x368   : > { %v2306_v58 = vpop.f32.mrb[29].mxu0  ;;  %v2312_v28 = vadd.f32 %v5322_v48, %v6623_v51 }
 0x369   : > { %v2307_v25 = vadd.f32 %v6623_v51, %v2306_v58 }
 0x36a   : > { %v2383_v63 = vsel %vm2325_vm12, %v2312_v28, 0.0 }
 0x36b   : > { %v2381_v26 = vsel %vm2325_vm12, %v2307_v25, 0.0 }
 0x36c   : > { %v2382_v27 = vadd.f32 %v2381_v26, %v2380_v1 }
 0x36e   : > { %v2384_v23 = vadd.f32 %v2383_v63, %v2382_v27 }
 0x374   : > { %v5325_v31 = vpop.f32.mrb[30].mxu0 }
 0x375   : > { %v2316_v55 = vpop.f32.mrb[31].mxu0  ;;  %v2322_v33 = vadd.f32 %v5325_v31, %v6623_v51 }
 0x376   : > { %v2317_v29 = vadd.f32 %v6623_v51, %v2316_v55 }
 0x377   : > { %v2387_v56 = vsel %vm2325_vm12, %v2322_v33, 0.0 }
 0x378   : > { %v2385_v54 = vsel %vm2325_vm12, %v2317_v29, 0.0 }
 0x379   : > { %v2386_v40 = vadd.f32 %v2385_v54, %v2384_v23 }
 0x37b   : > { %v2388_v59 = vadd.f32 %v2387_v56, %v2386_v40 }
 0x37d   : > { %v2389_v42 = vrot.slane %v2388_v59, 4 }
 0x37f   : > { %v2390_v62 = vadd.f32 %v2389_v42, %v2388_v59 }
 0x381   : > { %v2391_v2 = vrot.slane %v2390_v62, 2 }
 0x383   : > { %v2392_v50 = vadd.f32 %v2391_v2, %v2390_v62 }
 0x385   : > { %v2393_v5 = vrot.slane %v2392_v50, 1 }
 0x387   : > { %v2394_v45 = vadd.f32 %v2393_v5, %v2392_v50 }
 0x389   : > { %v6794_v22 = vmul.f32 0.00390625, %v2394_v45 }
 0x38b   : > { %v6797_v47 = vsub.f32 %v2307_v25, %v6794_v22  ;;  %v6800_v43 = vsub.f32 %v2312_v28, %v6794_v22  ;;  %v6803_v51 = vsub.f32 %v2317_v29, %v6794_v22  ;;  %v6806_v49 = vsub.f32 %v2322_v33, %v6794_v22 }
 0x38c   : > { %v6810_v8 = vsub.f32 %v6631_v52, %v6794_v22  ;;  %v6814_v9 = vsub.f32 %v6627_v57, %v6794_v22  ;;  %v6818_v15 = vsub.f32 %v6635_v53, %v6794_v22  ;;  %v6822_v4 = vsub.f32 %v6645_v32, %v6794_v22 }
 0x38d   : > { %v6830_v52 = vsub.f32 %v6649_v35, %v6794_v22  ;;  %v6836_v53 = vsub.f32 %v6657_v0, %v6794_v22  ;;  %v6844_v20 = vsub.f32 %v6661_v60, %v6794_v22  ;;  %v6851_v0 = vsub.f32 %v6669_v6, %v6794_v22 }
 0x38e   : > { %v2429_v7 = vmul.f32 %v6810_v8, %v6810_v8  ;;  %v2430_v21 = vmul.f32 %v6814_v9, %v6814_v9  ;;  %v2431_v57 = vmul.f32 %v6818_v15, %v6818_v15  ;;  %v2432_v32 = vmul.f32 %v6822_v4, %v6822_v4 }
 0x38f   : > { %v2433_v35 = vmul.f32 %v6830_v52, %v6830_v52  ;;  %v2434_v1 = vmul.f32 %v6836_v53, %v6836_v53  ;;  %v6858_v60 = vsub.f32 %v6673_v17, %v6794_v22  ;;  %v2435_v63 = vmul.f32 %v6844_v20, %v6844_v20 }
 0x390   : > { %v2461_v19 = vsel %vm2325_vm12, %v2429_v7, 0.0  ;;  %v2462_v48 = vsel %vm2325_vm12, %v2430_v21, 0.0  ;;  %v2464_v28 = vsel %vm2325_vm12, %v2431_v57, 0.0  ;;  %v2466_v26 = vsel %vm2325_vm12, %v2432_v32, 0.0 }
 0x391   : > { %v2463_v58 = vadd.f32 %v2462_v48, %v2461_v19  ;;  %v2468_v23 = vsel %vm2325_vm12, %v2433_v35, 0.0  ;;  %v6865_v6 = vsub.f32 %v6681_v12, %v6794_v22  ;;  %v2436_v55 = vmul.f32 %v6851_v0, %v6851_v0 }
 0x392   : > { %v2470_v33 = vsel %vm2325_vm12, %v2434_v1, 0.0  ;;  %v6872_v17 = vsub.f32 %v6685_v44, %v6794_v22  ;;  %v2437_v54 = vmul.f32 %v6858_v60, %v6858_v60  ;;  %v2472_v40 = vsel %vm2325_vm12, %v2435_v63, 0.0 }
 0x393   : > { %v2465_v25 = vadd.f32 %v2464_v28, %v2463_v58  ;;  %v6879_v12 = vsub.f32 %v6693_v18, %v6794_v22  ;;  %v2438_v59 = vmul.f32 %v6865_v6, %v6865_v6  ;;  %v2474_v42 = vsel %vm2325_vm12, %v2436_v55, 0.0 }
 0x394   : > { %v6886_v44 = vsub.f32 %v6697_v14, %v6794_v22  ;;  %v2439_v2 = vmul.f32 %v6872_v17, %v6872_v17  ;;  %v2476_v50 = vsel %vm2325_vm12, %v2437_v54, 0.0  ;;  %v6893_v18 = vsub.f32 %v6705_v24, %v6794_v22 }
 0x395   : > { %v2467_v27 = vadd.f32 %v2466_v26, %v2465_v25  ;;  %v2440_v45 = vmul.f32 %v6879_v12, %v6879_v12  ;;  %v2478_v7 = vsel %vm2325_vm12, %v2438_v59, 0.0  ;;  %v6900_v14 = vsub.f32 %v6709_v38, %v6794_v22 }
 0x396   : > { %v2441_v57 = vmul.f32 %v6886_v44, %v6886_v44  ;;  %v2480_v32 = vsel %vm2325_vm12, %v2439_v2, 0.0  ;;  %v6907_v24 = vsub.f32 %v6717_v37, %v6794_v22  ;;  %v2442_v48 = vmul.f32 %v6893_v18, %v6893_v18 }
 0x397   : > { %v2469_v31 = vadd.f32 %v2468_v23, %v2467_v27  ;;  %v2482_v58 = vsel %vm2325_vm12, %v2440_v45, 0.0  ;;  %v6914_v38 = vsub.f32 %v6720_v30, %v6794_v22  ;;  %v2443_v28 = vmul.f32 %v6900_v14, %v6900_v14 }
 0x398   : > { %v2484_v25 = vsel %vm2325_vm12, %v2441_v57, 0.0  ;;  %v6921_v37 = vsub.f32 %v6727_v36, %v6794_v22  ;;  %v2444_v26 = vmul.f32 %v6907_v24, %v6907_v24  ;;  %v2486_v27 = vsel %vm2325_vm12, %v2442_v48, 0.0 }
 0x399   : > { %v2471_v29 = vadd.f32 %v2470_v33, %v2469_v31  ;;  %v6928_v30 = vsub.f32 %v6730_v34, %v6794_v22  ;;  %v2445_v23 = vmul.f32 %v6914_v38, %v6914_v38  ;;  %v2488_v31 = vsel %vm2325_vm12, %v2443_v28, 0.0 }
 0x39a   : > { %v6935_v36 = vsub.f32 %v6738_v61, %v6794_v22  ;;  %v2446_v33 = vmul.f32 %v6921_v37, %v6921_v37  ;;  %v6942_v34 = vsub.f32 %v6742_v39, %v6794_v22  ;;  %v6949_v61 = vsub.f32 %v6750_v3, %v6794_v22 }
 0x39b   : > { %v2473_v56 = vadd.f32 %v2472_v40, %v2471_v29  ;;  %v2490_v29 = vsel %vm2325_vm12, %v2444_v26, 0.0  ;;  %v2447_v40 = vmul.f32 %v6928_v30, %v6928_v30  ;;  %v6956_v39 = vsub.f32 %v6754_v41, %v6794_v22 }
 0x39c   : > { %v6963_v3 = vsub.f32 %v6762_v11, %v6794_v22  ;;  %v6970_v41 = vsub.f32 %v6765_v46, %v6794_v22  ;;  %v6977_v11 = vsub.f32 %v6772_v10, %v6794_v22  ;;  %v6984_v46 = vsub.f32 %v6775_v13, %v6794_v22 }
 0x39d   : > { %v2475_v62 = vadd.f32 %v2474_v42, %v2473_v56  ;;  %v2492_v56 = vsel %vm2325_vm12, %v2445_v23, 0.0  ;;  %v2448_v42 = vmul.f32 %v6935_v36, %v6935_v36  ;;  %v6991_v10 = vsub.f32 %v6782_v16, %v6794_v22 }
 0x39e   : > { %v2455_v13 = vmul.f32 %v6984_v46, %v6984_v46 }
 0x39f   : > { %v2477_v5 = vadd.f32 %v2476_v50, %v2475_v62  ;;  %v2494_v62 = vsel %vm2325_vm12, %v2446_v33, 0.0  ;;  %v2449_v50 = vmul.f32 %v6942_v34, %v6942_v34  ;;  %v2456_v16 = vmul.f32 %v6991_v10, %v6991_v10 }
 0x3a1   : > { %v2479_v21 = vadd.f32 %v2478_v7, %v2477_v5  ;;  %v2496_v5 = vsel %vm2325_vm12, %v2447_v40, 0.0  ;;  %v2450_v7 = vmul.f32 %v6949_v61, %v6949_v61  ;;  %v4130_v40 = vld [vmem:[%s8667_s3 + $0x8] sm:$0xff] }
 0x3a3   : > { %v2481_v19 = vadd.f32 %v2480_v32, %v2479_v21  ;;  %v2498_v21 = vsel %vm2325_vm12, %v2448_v42, 0.0  ;;  %v2451_v32 = vmul.f32 %v6956_v39, %v6956_v39 }
 0x3a5   : > { %v2483_v35 = vadd.f32 %v2482_v58, %v2481_v19  ;;  %v2500_v19 = vsel %vm2325_vm12, %v2449_v50, 0.0  ;;  %v2452_v58 = vmul.f32 %v6963_v3, %v6963_v3  ;;  %v2514_v50 = vsel %vm2325_vm12, %v2456_v16, 0.0 }
 0x3a7   : > { %v2485_v1 = vadd.f32 %v2484_v25, %v2483_v35  ;;  %v2502_v35 = vsel %vm2325_vm12, %v2450_v7, 0.0  ;;  %v2453_v25 = vmul.f32 %v6970_v41, %v6970_v41  ;;  %v4132_v7 = vld [vmem:[%s8667_s3 + $0x18] sm:$0xff] }
 0x3a9   : > { %v2487_v63 = vadd.f32 %v2486_v27, %v2485_v1  ;;  %v2504_v1 = vsel %vm2325_vm12, %v2451_v32, 0.0  ;;  %v2454_v27 = vmul.f32 %v6977_v11, %v6977_v11 }
 0x3ab   : > { %v2489_v55 = vadd.f32 %v2488_v31, %v2487_v63  ;;  %v2506_v63 = vsel %vm2325_vm12, %v2452_v58, 0.0  ;;  %v2508_v31 = vsel %vm2325_vm12, %v2453_v25, 0.0  ;;  %v2510_v22 = vsel %vm2325_vm12, %v2454_v27, 0.0  ;;  %v4134_v25 = vld [vmem:[%s8667_s3 + $0x28] sm:$0xff] }
 0x3ad   : > { %v2491_v54 = vadd.f32 %v2490_v29, %v2489_v55  ;;  %v5519_v55 = vmov 0.0|0.0  }
 0x3ae   : > { %5446 = vmatprep.subr.bf16.mxu1 %v5519_v55  ;;  %5390 = vmatprep.subr.bf16.mxu0 %v5519_v55 }
 0x3af   : > { %v2493_v59 = vadd.f32 %v2492_v56, %v2491_v54  ;;  %v4129_v54 = vld [vmem:[%s8667_s3] sm:$0xff]  ;;  %v2457_v56 = vmul.f32 %v6797_v47, %v6797_v47 }
 0x3b0   : > { %v5391_v42 = vpack.c.bf16 %v4130_v40, %v4129_v54  ;;  %v4138_v54 = vld [vmem:[%s8667_s3 + $0x48] sm:$0xff] }
 0x3b1   : > { %v2495_v2 = vadd.f32 %v2494_v62, %v2493_v59  ;;  %v2512_v59 = vsel %vm2325_vm12, %v2455_v13, 0.0  ;;  %v4135_v13 = vld [vmem:[%s8667_s3 + $0x30] sm:$0xff] }
 0x3b2   : > { %5462 = vmatpush1.bf16.msra.mxu1 %v5391_v42  ;;  %5392 = vmatpush1.bf16.msra.mxu0 %v5391_v42  ;;  %v4139_v42 = vld [vmem:[%s8667_s3 + $0x50] sm:$0xff] }
 0x3b3   : > { %v2497_v45 = vadd.f32 %v2496_v5, %v2495_v2  ;;  %v2458_v2 = vmul.f32 %v6800_v43, %v6800_v43  ;;  %5447 = vmatprep.subr.bf16.mxu1 %v5519_v55  ;;  %5393 = vmatprep.subr.bf16.mxu0 %v5519_v55 }
 0x3b5   : > { %v2499_v57 = vadd.f32 %v2498_v21, %v2497_v45  ;;  %v4131_v45 = vld [vmem:[%s8667_s3 + $0x10] sm:$0xff]  ;;  %v2459_v21 = vmul.f32 %v6803_v51, %v6803_v51  ;;  %v2518_v58 = vsel %vm2325_vm12, %v2458_v2, 0.0 }
 0x3b6   : > { %v5394_v32 = vpack.c.bf16 %v4132_v7, %v4131_v45  ;;  %v4141_v45 = vld [vmem:[%s8667_s3 + $0x60] sm:$0xff]  ;;  %v4142_v7 = vld [vmem:[%s8667_s3 + $0x68] sm:$0xff] }
 0x3b7   : > { %v2501_v48 = vadd.f32 %v2500_v19, %v2499_v57  ;;  %v2516_v57 = vsel %vm2325_vm12, %v2457_v56, 0.0 }
 0x3b8   : > { %5463 = vmatpush1.bf16.msra.mxu1 %v5394_v32  ;;  %5395 = vmatpush1.bf16.msra.mxu0 %v5394_v32 }
 0x3b9   : > { %v2503_v28 = vadd.f32 %v2502_v35, %v2501_v48  ;;  %v2460_v48 = vmul.f32 %v6806_v49, %v6806_v49  ;;  %5448 = vmatprep.subr.bf16.mxu1 %v5519_v55  ;;  %5396 = vmatprep.subr.bf16.mxu0 %v5519_v55 }
 0x3bb   : > { %v2505_v26 = vadd.f32 %v2504_v1, %v2503_v28  ;;  %v4133_v28 = vld [vmem:[%s8667_s3 + $0x20] sm:$0xff]  ;;  %v2520_v1 = vsel %vm2325_vm12, %v2459_v21, 0.0  ;;  %v5409_v21 = vpack.c.bf16 %v4142_v7, %v4141_v45 }
 0x3bd   : > { %v2507_v23 = vadd.f32 %v2506_v63, %v2505_v26  ;;  %v5397_v26 = vpack.c.bf16 %v4134_v25, %v4133_v28  ;;  %v2522_v63 = vsel %vm2325_vm12, %v2460_v48, 0.0  ;;  %v4144_v48 = vld [vmem:[%s8667_s3 + $0x78] sm:$0xff]  ;;  %v4146_v28 = vld [vmem:[%s8667_s3 + $0x88] sm:$0xff] }
 0x3bf   : > { %v2509_v33 = vadd.f32 %v2508_v31, %v2507_v23  ;;  %5464 = vmatpush1.bf16.msra.mxu1 %v5397_v26  ;;  %5398 = vmatpush1.bf16.msra.mxu0 %v5397_v26  ;;  %v4136_v31 = vld [vmem:[%s8667_s3 + $0x38] sm:$0xff] }
 0x3c0   : > { %5449 = vmatprep.subr.bf16.mxu1 %v5519_v55  ;;  %5399 = vmatprep.subr.bf16.mxu0 %v5519_v55  ;;  %v4148_v26 = vld [vmem:[%s8667_s3 + $0x98] sm:$0xff] }
 0x3c1   : > { %v2511_v29 = vadd.f32 %v2510_v22, %v2509_v33  ;;  %v5400_v33 = vpack.c.bf16 %v4136_v31, %v4135_v13 }
 0x3c3   : > { %v2513_v62 = vadd.f32 %v2512_v59, %v2511_v29  ;;  %5465 = vmatpush1.bf16.msra.mxu1 %v5400_v33  ;;  %5401 = vmatpush1.bf16.msra.mxu0 %v5400_v33  ;;  %v4137_v29 = vld [vmem:[%s8667_s3 + $0x40] sm:$0xff] }
 0x3c4   : > { %5450 = vmatprep.subr.bf16.mxu1 %v5519_v55  ;;  %5402 = vmatprep.subr.bf16.mxu0 %v5519_v55  ;;  %v5403_v40 = vpack.c.bf16 %v4138_v54, %v4137_v29 }
 0x3c5   : > { %v2515_v5 = vadd.f32 %v2514_v50, %v2513_v62  ;;  %v4140_v62 = vld [vmem:[%s8667_s3 + $0x58] sm:$0xff] }
 0x3c6   : > { %v5406_v2 = vpack.c.bf16 %v4140_v62, %v4139_v42 }
 0x3c7   : > { %v2517_v19 = vadd.f32 %v2516_v57, %v2515_v5  ;;  %5466 = vmatpush1.bf16.msra.mxu1 %v5403_v40  ;;  %5404 = vmatpush1.bf16.msra.mxu0 %v5403_v40 }
 0x3c8   : > { %5451 = vmatprep.subr.bf16.mxu1 %v5519_v55  ;;  %5405 = vmatprep.subr.bf16.mxu0 %v5519_v55 }
 0x3c9   : > { %v2519_v35 = vadd.f32 %v2518_v58, %v2517_v19  ;;  %v4143_v19 = vld [vmem:[%s8667_s3 + $0x70] sm:$0xff] }
 0x3ca   : > { %v5412_v58 = vpack.c.bf16 %v4144_v48, %v4143_v19 }
 0x3cb   : > { %v2521_v27 = vadd.f32 %v2520_v1, %v2519_v35  ;;  %5467 = vmatpush1.bf16.msra.mxu1 %v5406_v2  ;;  %5407 = vmatpush1.bf16.msra.mxu0 %v5406_v2  ;;  %v4145_v35 = vld [vmem:[%s8667_s3 + $0x80] sm:$0xff]  ;;  %v4147_v1 = vld [vmem:[%s8667_s3 + $0x90] sm:$0xff] }
 0x3cc   : > { %5452 = vmatprep.subr.bf16.mxu1 %v5519_v55  ;;  %5408 = vmatprep.subr.bf16.mxu0 %v5519_v55  ;;  %v5415_v25 = vpack.c.bf16 %v4146_v28, %v4145_v35  ;;  %v4149_v28 = vld [vmem:[%s8667_s3 + $0xa0] sm:$0xff] }
 0x3cd   : > { %v2523_v23 = vadd.f32 %v2522_v63, %v2521_v27  ;;  %v5418_v27 = vpack.c.bf16 %v4148_v26, %v4147_v1 }
 0x3cf   : > { %v2524_v16 = vrot.slane %v2523_v23, 4  ;;  %5468 = vmatpush1.bf16.msra.mxu1 %v5409_v21  ;;  %5410 = vmatpush1.bf16.msra.mxu0 %v5409_v21 }
 0x3d0   : > { %5453 = vmatprep.subr.bf16.mxu1 %v5519_v55  ;;  %5411 = vmatprep.subr.bf16.mxu0 %v5519_v55 }
 0x3d1   : > { %v2525_v22 = vadd.f32 %v2524_v16, %v2523_v23 }
 0x3d3   : > { %v2526_v56 = vrot.slane %v2525_v22, 2  ;;  %5469 = vmatpush1.bf16.msra.mxu1 %v5412_v58  ;;  %5413 = vmatpush1.bf16.msra.mxu0 %v5412_v58 }
 0x3d4   : > { %5454 = vmatprep.subr.bf16.mxu1 %v5519_v55  ;;  %5414 = vmatprep.subr.bf16.mxu0 %v5519_v55 }
 0x3d5   : > { %v2527_v59 = vadd.f32 %v2526_v56, %v2525_v22 }
 0x3d7   : > { %v2528_v50 = vrot.slane %v2527_v59, 1  ;;  %5470 = vmatpush1.bf16.msra.mxu1 %v5415_v25  ;;  %5416 = vmatpush1.bf16.msra.mxu0 %v5415_v25  ;;  %v4150_v25 = vld [vmem:[%s8667_s3 + $0xa8] sm:$0xff] }
 0x3d8   : > { %5455 = vmatprep.subr.bf16.mxu1 %v5519_v55  ;;  %5417 = vmatprep.subr.bf16.mxu0 %v5519_v55 }
 0x3d9   : > { %v2529_v5 = vadd.f32 %v2528_v50, %v2527_v59 }
 0x3db   : > { %v2530_v57 = vmul.f32 0.00390625, %v2529_v5  ;;  %5471 = vmatpush1.bf16.msra.mxu1 %v5418_v27  ;;  %5419 = vmatpush1.bf16.msra.mxu0 %v5418_v27 }
 0x3dc   : > { %5456 = vmatprep.subr.bf16.mxu1 %v5519_v55  ;;  %5420 = vmatprep.subr.bf16.mxu0 %v5519_v55 }
 0x3dd   : > { %v2531_v32 = vadd.f32 1e-05, %v2530_v57 }
 0x3df   : > { %5498 = vrsqrt.f32 %v2531_v32 }
 0x3e9   : > { %v5499_v63 = vpop.eup %5498 }
 0x3ea   : > { %v2563_v23 = vmul.f32 %v5499_v63, %v6803_v51  ;;  %v2533_v13 = vmul.f32 %v5499_v63, %v6810_v8  ;;  %v2534_v31 = vmul.f32 %v5499_v63, %v6814_v9  ;;  %v2535_v33 = vmul.f32 %v5499_v63, %v6818_v15 }
 0x3eb   : > { %v2536_v16 = vmul.f32 %v5499_v63, %v6822_v4  ;;  %v2537_v22 = vmul.f32 %v5499_v63, %v6830_v52  ;;  %v2538_v29 = vmul.f32 %v5499_v63, %v6836_v53  ;;  %v2539_v54 = vmul.f32 %v5499_v63, %v6844_v20 }
 0x3ec   : > { %v2595_v40 = vmax.f32 %v2563_v23, 0.0  ;;  %v2540_v56 = vmul.f32 %v5499_v63, %v6851_v0  ;;  %v2541_v59 = vmul.f32 %v5499_v63, %v6858_v60  ;;  %v2542_v51 = vmul.f32 %v5499_v63, %v6865_v6 }
 0x3ed   : > { %v2543_v8 = vmul.f32 %v5499_v63, %v6872_v17  ;;  %v2544_v9 = vmul.f32 %v5499_v63, %v6879_v12  ;;  %v2545_v15 = vmul.f32 %v5499_v63, %v6886_v44  ;;  %v2546_v4 = vmul.f32 %v5499_v63, %v6893_v18 }
 0x3ee   : > { %2683 = vst.msk [vmem:[#allocation4 + $0x181] sm:$0xff] %vm2325_vm12, %v2595_v40  ;;  %v2547_v52 = vmul.f32 %v5499_v63, %v6900_v14  ;;  %v7116_v53 = vmul.f32 %v5499_v63, %v6907_v24  ;;  %v7119_v20 = vmul.f32 %v5499_v63, %v6914_v38  ;;  %v7122_v0 = vmul.f32 %v5499_v63, %v6921_v37 }
 0x3ef   : > { %v7125_v60 = vmul.f32 %v5499_v63, %v6928_v30  ;;  %v7128_v6 = vmul.f32 %v5499_v63, %v6935_v36  ;;  %v7131_v17 = vmul.f32 %v5499_v63, %v6942_v34  ;;  %v7134_v12 = vmul.f32 %v5499_v63, %v6949_v61 }
 0x3f0   : > { %v7137_v44 = vmul.f32 %v5499_v63, %v6956_v39  ;;  %v7140_v18 = vmul.f32 %v5499_v63, %v6963_v3  ;;  %v7143_v14 = vmul.f32 %v5499_v63, %v6970_v41  ;;  %v7146_v24 = vmul.f32 %v5499_v63, %v6977_v11 }
 0x3f1   : > { %v7149_v38 = vmul.f32 %v5499_v63, %v6984_v46  ;;  %v7152_v37 = vmul.f32 %v5499_v63, %v6991_v10  ;;  %v7155_v30 = vmul.f32 %v5499_v63, %v6797_v47  ;;  %v7158_v36 = vmul.f32 %v5499_v63, %v6800_v43 }
 0x3f2   : > { %v7161_v34 = vmul.f32 %v5499_v63, %v6806_v49  ;;  %v2571_v61 = vmax.f32 %v2539_v54, 0.0  ;;  %v2572_v39 = vmax.f32 %v2540_v56, 0.0  ;;  %v2565_v3 = vmax.f32 %v2533_v13, 0.0  ;;  %v4153_v56 = vld [vmem:[%s8667_s3 + $0xc0] sm:$0xff] }
 0x3f3   : > { %v2566_v41 = vmax.f32 %v2534_v31, 0.0  ;;  %v2567_v11 = vmax.f32 %v2535_v33, 0.0  ;;  %v2568_v42 = vmax.f32 %v2536_v16, 0.0  ;;  %v2569_v46 = vmax.f32 %v2537_v22, 0.0  ;;  %v4151_v16 = vld [vmem:[%s8667_s3 + $0xb0] sm:$0xff]  ;;  %v4152_v22 = vld [vmem:[%s8667_s3 + $0xb8] sm:$0xff] }
 0x3f4   : > { %2659 = vst.msk [vmem:[#allocation4 + $0x61] sm:$0xff] %vm2325_vm12, %v2571_v61  ;;  %2660 = vst.msk [vmem:[#allocation4 + $0x69] sm:$0xff] %vm2325_vm12, %v2572_v39  ;;  %v2570_v10 = vmax.f32 %v2538_v29, 0.0  ;;  %v2573_v47 = vmax.f32 %v2541_v59, 0.0  ;;  %v2574_v62 = vmax.f32 %v2542_v51, 0.0  ;;  %v2575_v2 = vmax.f32 %v2543_v8, 0.0 }
 0x3f5   : > { %2653 = vst.msk [vmem:[#allocation4 + $0x19] sm:$0xff] %vm2325_vm12, %v2565_v3  ;;  %v2576_v43 = vmax.f32 %v2544_v9, 0.0  ;;  %v2577_v49 = vmax.f32 %v2545_v15, 0.0  ;;  %v2578_v50 = vmax.f32 %v2546_v4, 0.0  ;;  %v2579_v5 = vmax.f32 %v2547_v52, 0.0  ;;  %2657 = vst.msk [vmem:[#allocation4 + $0x49] sm:$0xff] %vm2325_vm12, %v2569_v46 }
 0x3f6   : > { %2654 = vst.msk [vmem:[#allocation4 + $0x21] sm:$0xff] %vm2325_vm12, %v2566_v41  ;;  %2655 = vst.msk [vmem:[#allocation4 + $0x31] sm:$0xff] %vm2325_vm12, %v2567_v11  ;;  %v2580_v45 = vmax.f32 %v7116_v53, 0.0  ;;  %v2581_v7 = vmax.f32 %v7119_v20, 0.0  ;;  %v2582_v21 = vmax.f32 %v7122_v0, 0.0  ;;  %v2583_v57 = vmax.f32 %v7125_v60, 0.0 }
 0x3f7   : > { %2656 = vst.msk [vmem:[#allocation4 + $0x39] sm:$0xff] %vm2325_vm12, %v2568_v42  ;;  %2658 = vst.msk [vmem:[#allocation4 + $0x51] sm:$0xff] %vm2325_vm12, %v2570_v10  ;;  %v7178_v32 = vld [vmem:[#allocation4 + $0x181] sm:$0xff]  ;;  %v2584_v19 = vmax.f32 %v7128_v6, 0.0  ;;  %v2585_v48 = vmax.f32 %v7131_v17, 0.0  ;;  %v2586_v58 = vmax.f32 %v7134_v12, 0.0  ;;  %v5421_v29 = vpack.c.bf16 %v4150_v25, %v4149_v28 }
 0x3f8   : > { %2661 = vst.msk [vmem:[#allocation4 + $0x79] sm:$0xff] %vm2325_vm12, %v2573_v47  ;;  %2662 = vst.msk [vmem:[#allocation4 + $0x81] sm:$0xff] %vm2325_vm12, %v2574_v62  ;;  %v2587_v35 = vmax.f32 %v7137_v44, 0.0  ;;  %v2588_v1 = vmax.f32 %v7140_v18, 0.0  ;;  %v2589_v26 = vmax.f32 %v7143_v14, 0.0  ;;  %v2590_v27 = vmax.f32 %v7146_v24, 0.0 }
 0x3f9   : > { %2663 = vst.msk [vmem:[#allocation4 + $0x91] sm:$0xff] %vm2325_vm12, %v2575_v2  ;;  %8689 = vst [vmem:[#allocation6_spill] sm:$0xff] %v7178_v32  ;;  %v2591_v63 = vmax.f32 %v7149_v38, 0.0  ;;  %v2592_v23 = vmax.f32 %v7152_v37, 0.0  ;;  %v2593_v13 = vmax.f32 %v7155_v30, 0.0  ;;  %v2594_v31 = vmax.f32 %v7158_v36, 0.0  ;;  %5472 = vmatpush1.bf16.msra.mxu1 %v5421_v29  ;;  %5422 = vmatpush1.bf16.msra.mxu0 %v5421_v29 }
 0x3fa   : > { %2664 = vst.msk [vmem:[#allocation4 + $0x99] sm:$0xff] %vm2325_vm12, %v2576_v43  ;;  %2665 = vst.msk [vmem:[#allocation4 + $0xa9] sm:$0xff] %vm2325_vm12, %v2577_v49  ;;  %v2596_v33 = vmax.f32 %v7161_v34, 0.0  ;;  %v5424_v9 = vpack.c.bf16 %v4152_v22, %v4151_v16  ;;  %5457 = vmatprep.subr.bf16.mxu1 %v5519_v55  ;;  %v4154_v52 = vld [vmem:[%s8667_s3 + $0xc8] sm:$0xff]  ;;  %5423 = vmatprep.subr.bf16.mxu0 %v5519_v55  ;;  %v4155_v18 = vld [vmem:[%s8667_s3 + $0xd0] sm:$0xff] }
 0x3fb   : > { %2666 = vst.msk [vmem:[#allocation4 + $0xb1] sm:$0xff] %vm2325_vm12, %v2578_v50  ;;  %2667 = vst.msk [vmem:[#allocation4 + $0xc1] sm:$0xff] %vm2325_vm12, %v2579_v5  ;;  %v7222_v54 = vld [vmem:[#allocation4 + $0x62] sm:$0xff]  ;;  %v5427_v12 = vpack.c.bf16 %v4154_v52, %v4153_v56  ;;  %v4157_v36 = vld [vmem:[%s8667_s3 + $0xe0] sm:$0xff] }
 0x3fc   : > { %3390 = vst.msk [vmem:[#allocation5 + $0x2d8] sm:$0xff] %vm2325_vm12, %v7178_v32  ;;  %2668 = vst.msk [vmem:[#allocation4 + $0xc9] sm:$0xff] %vm2325_vm12, %v2580_v45  ;;  %v7228_v40 = vld [vmem:[#allocation4 + $0x60] sm:$0xff]  ;;  %3468 = vrot.lane.b32.xlu0 %v7222_v54, %s5518_s14  ;;  %v7235_v59 = vld [vmem:[#allocation4 + $0x49] sm:$0xff] }
 0x3fd   : > { %2669 = vst.msk [vmem:[#allocation4 + $0xd9] sm:$0xff] %vm2325_vm12, %v2581_v7  ;;  %2670 = vst.msk [vmem:[#allocation4 + $0xe1] sm:$0xff] %vm2325_vm12, %v2582_v21  ;;  %v7237_v51 = vld [vmem:[#allocation4 + $0x68] sm:$0xff]  ;;  %2825 = vrot.lane.b32.xlu1 %v7235_v59, %s5518_s14  ;;  %5473 = vmatpush1.bf16.msra.mxu1 %v5424_v9  ;;  %v7297_v24 = vld [vmem:[#allocation4 + $0x31] sm:$0xff] }
 0x3fe   : > { %2671 = vst.msk [vmem:[#allocation4 + $0xf1] sm:$0xff] %vm2325_vm12, %v2583_v57  ;;  %2672 = vst.msk [vmem:[#allocation4 + $0xf9] sm:$0xff] %vm2325_vm12, %v2584_v19  ;;  %v7239_v8 = vld [vmem:[#allocation4 + $0x61] sm:$0xff]  ;;  %v7272_v60 = vld [vmem:[#allocation4 + $0x4a] sm:$0xff]  ;;  %5458 = vmatprep.subr.bf16.mxu1 %v5519_v55  ;;  %5425 = vmatpush1.bf16.msra.mxu0 %v5424_v9 }
 0x3ff   : > { %2673 = vst.msk [vmem:[#allocation4 + $0x109] sm:$0xff] %vm2325_vm12, %v2585_v48  ;;  %2674 = vst.msk [vmem:[#allocation4 + $0x111] sm:$0xff] %vm2325_vm12, %v2586_v58  ;;  %v7245_v15 = vld [vmem:[#allocation4 + $0x78] sm:$0xff]  ;;  %v7257_v53 = vld [vmem:[#allocation4 + $0x80] sm:$0xff]  ;;  %5426 = vmatprep.subr.bf16.mxu0 %v5519_v55 }
 0x400   : > { %2675 = vst.msk [vmem:[#allocation4 + $0x121] sm:$0xff] %vm2325_vm12, %v2587_v35  ;;  %2676 = vst.msk [vmem:[#allocation4 + $0x129] sm:$0xff] %vm2325_vm12, %v2588_v1  ;;  %v7247_v4 = vld [vmem:[#allocation4 + $0x79] sm:$0xff]  ;;  %v7263_v20 = vld [vmem:[#allocation4 + $0x81] sm:$0xff]  ;;  %3661 = vrot.lane.b32.xlu0 %v7245_v15, %s5520_s29 }
 0x401   : > { %2677 = vst.msk [vmem:[#allocation4 + $0x139] sm:$0xff] %vm2325_vm12, %v2589_v26  ;;  %2678 = vst.msk [vmem:[#allocation4 + $0x141] sm:$0xff] %vm2325_vm12, %v2590_v27  ;;  %v7265_v0 = vld [vmem:[#allocation4 + $0x90] sm:$0xff]  ;;  %3018 = vrot.lane.b32.xlu1 %v7272_v60, %s5520_s29  ;;  %v7284_v44 = vld [vmem:[#allocation4 + $0x99] sm:$0xff]  ;;  %5474 = vmatpush1.bf16.msra.mxu1 %v5427_v12 }
 0x402   : > { %2679 = vst.msk [vmem:[#allocation4 + $0x151] sm:$0xff] %vm2325_vm12, %v2591_v63  ;;  %2680 = vst.msk [vmem:[#allocation4 + $0x159] sm:$0xff] %vm2325_vm12, %v2592_v23  ;;  %v7274_v6 = vld [vmem:[#allocation4 + $0x91] sm:$0xff]  ;;  %v7276_v17 = vld [vmem:[#allocation4 + $0x69] sm:$0xff]  ;;  %5459 = vmatprep.subr.bf16.mxu1 %v5519_v55  ;;  %5428 = vmatpush1.bf16.msra.mxu0 %v5427_v12 }
 0x403   : > { %2681 = vst.msk [vmem:[#allocation4 + $0x169] sm:$0xff] %vm2325_vm12, %v2593_v13  ;;  %2682 = vst.msk [vmem:[#allocation4 + $0x171] sm:$0xff] %vm2325_vm12, %v2594_v31  ;;  %v4156_v14 = vld [vmem:[%s8667_s3 + $0xd8] sm:$0xff]  ;;  %v7301_v38 = vld [vmem:[#allocation4 + $0x18] sm:$0xff]  ;;  %5429 = vmatprep.subr.bf16.mxu0 %v5519_v55 }
 0x404   : > { %2684 = vst.msk [vmem:[#allocation4 + $0x189] sm:$0xff] %vm2325_vm12, %v2596_v33  ;;  %2725 = vst.msk [vmem:[#allocation5 + $0xc0] sm:$0xff] %vm2325_vm12, %v7228_v40  ;;  %v7303_v37 = vld [vmem:[#allocation4 + $0xa9] sm:$0xff]  ;;  %3853 = vrot.lane.b32.xlu0 %v7247_v4, %s5521_s9  ;;  %v5430_v30 = vpack.c.bf16 %v4156_v14, %v4155_v18  ;;  %v7319_v34 = vld [vmem:[#allocation4 + $0x39] sm:$0xff] }
 0x405   : > { %3366 = vst.msk [vmem:[#allocation5 + $0x98] sm:$0xff] %vm2325_vm12, %v7239_v8  ;;  %2726 = vst.msk [vmem:[#allocation5 + $0xd8] sm:$0xff] %vm2325_vm12, %v7237_v51  ;;  %3211 = vrot.lane.b32.xlu1 %v7228_v40, %s5521_s9  ;;  %v7321_v61 = vld [vmem:[#allocation4 + $0x20] sm:$0xff]  ;;  %v4158_v39 = vld [vmem:[%s8667_s3 + $0xe8] sm:$0xff] }
 0x406   : > { %3368 = vst.msk [vmem:[#allocation5 + $0xc8] sm:$0xff] %vm2325_vm12, %v7247_v4  ;;  %2727 = vst.msk [vmem:[#allocation5 + $0xf0] sm:$0xff] %vm2325_vm12, %v7245_v15  ;;  %v7327_v3 = vld [vmem:[#allocation4 + $0xb1] sm:$0xff]  ;;  %v7329_v41 = vld [vmem:[#allocation4 + $0x19] sm:$0xff]  ;;  %5475 = vmatpush1.bf16.msra.mxu1 %v5430_v30  ;;  %v5433_v62 = vpack.c.bf16 %v4158_v39, %v4157_v36  ;;  %5431 = vmatpush1.bf16.msra.mxu0 %v5430_v30 }
 0x407   : > { %2728 = vst.msk [vmem:[#allocation5 + $0x108] sm:$0xff] %vm2325_vm12, %v7257_v53  ;;  %3369 = vst.msk [vmem:[#allocation5 + $0xe0] sm:$0xff] %vm2325_vm12, %v7263_v20  ;;  %v7335_v11 = vld [vmem:[#allocation4 + $0x6a] sm:$0xff]  ;;  %v7350_v10 = vld [vmem:[#allocation4 + $0xc1] sm:$0xff]  ;;  %5460 = vmatprep.subr.bf16.mxu1 %v5519_v55  ;;  %5432 = vmatprep.subr.bf16.mxu0 %v5519_v55 }
 0x408   : > { %2729 = vst.msk [vmem:[#allocation5 + $0x120] sm:$0xff] %vm2325_vm12, %v7265_v0  ;;  %3367 = vst.msk [vmem:[#allocation5 + $0xb0] sm:$0xff] %vm2325_vm12, %v7276_v17  ;;  %v7337_v42 = vld [vmem:[#allocation4 + $0x48] sm:$0xff]  ;;  %3470 = vrot.lane.b32.xlu0 %v7335_v11, %s5518_s14  ;;  %v7346_v46 = vld [vmem:[#allocation4 + $0x51] sm:$0xff] }
 0x409   : > { %3370 = vst.msk [vmem:[#allocation5 + $0xf8] sm:$0xff] %vm2325_vm12, %v7274_v6  ;;  %3371 = vst.msk [vmem:[#allocation5 + $0x110] sm:$0xff] %vm2325_vm12, %v7284_v44  ;;  %v7352_v47 = vld [vmem:[#allocation4 + $0x21] sm:$0xff]  ;;  %2827 = vrot.lane.b32.xlu1 %v7346_v46, %s5518_s14  ;;  %v7357_v2 = vld [vmem:[#allocation4 + $0x50] sm:$0xff] }
 0x40a   : > { %3362 = vst.msk [vmem:[#allocation5 + $0x38] sm:$0xff] %vm2325_vm12, %v7297_v24  ;;  %2719 = vst.msk [vmem:[#allocation5 + $0x30] sm:$0xff] %vm2325_vm12, %v7301_v38  ;;  %v4159_v43 = vld [vmem:[%s8667_s3 + $0xf0] sm:$0xff]  ;;  %v4160_v49 = vld [vmem:[%s8667_s3 + $0xf8] sm:$0xff]  ;;  %5476 = vmatpush1.bf16.msra.mxu1 %v5433_v62  ;;  %5434 = vmatpush1.bf16.msra.mxu0 %v5433_v62 }
 0x40b   : > { %3372 = vst.msk [vmem:[#allocation5 + $0x128] sm:$0xff] %vm2325_vm12, %v7303_v37  ;;  %3363 = vst.msk [vmem:[#allocation5 + $0x50] sm:$0xff] %vm2325_vm12, %v7319_v34  ;;  %v7371_v50 = vld [vmem:[#allocation4 + $0xc9] sm:$0xff]  ;;  %v7373_v5 = vld [vmem:[#allocation4 + $0xd9] sm:$0xff]  ;;  %v5436_v7 = vpack.c.bf16 %v4160_v49, %v4159_v43  ;;  %5461 = vmatprep.subr.bf16.mxu1 %v5519_v55  ;;  %5435 = vmatprep.subr.bf16.mxu0 %v5519_v55 }
 0x40c   : > { %2720 = vst.msk [vmem:[#allocation5 + $0x48] sm:$0xff] %vm2325_vm12, %v7321_v61  ;;  %3360 = vst.msk [vmem:[#allocation5 + $0x8] sm:$0xff] %vm2325_vm12, %v7329_v41  ;;  %3663 = vrot.lane.b32.xlu0 %v7257_v53, %s5520_s29  ;;  %v7380_v45 = vld [vmem:[#allocation4 + $0x52] sm:$0xff]  ;;  %v7382_v21 = vld [vmem:[#allocation4 + $0xca] sm:$0xff] }
 0x40d   : > { %3373 = vst.msk [vmem:[#allocation5 + $0x140] sm:$0xff] %vm2325_vm12, %v7327_v3  ;;  %2723 = vst.msk [vmem:[#allocation5 + $0x90] sm:$0xff] %vm2325_vm12, %v7337_v42  ;;  %v7384_v57 = vld [vmem:[#allocation4 + $0xe1] sm:$0xff]  ;;  %3020 = vrot.lane.b32.xlu1 %v7380_v45, %s5520_s29  ;;  %v7393_v48 = vld [vmem:[#allocation4 + $0xf1] sm:$0xff] }
 0x40e   : > { %3361 = vst.msk [vmem:[#allocation5 + $0x20] sm:$0xff] %vm2325_vm12, %v7352_v47  ;;  %3374 = vst.msk [vmem:[#allocation5 + $0x158] sm:$0xff] %vm2325_vm12, %v7350_v10  ;;  %v7391_v19 = vld [vmem:[#allocation4 + $0xda] sm:$0xff]  ;;  %v7399_v58 = vld [vmem:[#allocation4 + $0xe2] sm:$0xff]  ;;  %5477 = vmatpush1.bf16.msra.mxu1 %v5436_v7  ;;  %5437 = vmatpush1.bf16.msra.mxu0 %v5436_v7 }
 0x40f   : > { %2724 = vst.msk [vmem:[#allocation5 + $0xa8] sm:$0xff] %vm2325_vm12, %v7357_v2  ;;  %3375 = vst.msk [vmem:[#allocation5 + $0x170] sm:$0xff] %vm2325_vm12, %v7371_v50  ;;  %v7401_v35 = vld [vmem:[#allocation4 + $0xf9] sm:$0xff]  ;;  %v7410_v25 = vld [vmem:[#allocation4 + $0x109] sm:$0xff] }
 0x410   : > { %3376 = vst.msk [vmem:[#allocation5 + $0x188] sm:$0xff] %vm2325_vm12, %v7373_v5  ;;  %3377 = vst.msk [vmem:[#allocation5 + $0x1a0] sm:$0xff] %vm2325_vm12, %v7384_v57  ;;  %v7408_v28 = vld [vmem:[#allocation4 + $0xf2] sm:$0xff]  ;;  %3855 = vrot.lane.b32.xlu0 %v7263_v20, %s5521_s9  ;;  %v7418_v1 = vld [vmem:[#allocation4 + $0xfa] sm:$0xff] }
 0x411   : > { %4014 = vst.msk [vmem:[#allocation5 + $0x148] sm:$0xff] %vm2325_vm12, %v7382_v21  ;;  %3378 = vst.msk [vmem:[#allocation5 + $0x1b8] sm:$0xff] %vm2325_vm12, %v7393_v48  ;;  %v7420_v26 = vld [vmem:[#allocation4 + $0x111] sm:$0xff]  ;;  %3213 = vrot.lane.b32.xlu1 %v7237_v51, %s5521_s9  ;;  %v7434_v63 = vld [vmem:[#allocation4 + $0x7a] sm:$0xff] }
 0x412   : > { %4015 = vst.msk [vmem:[#allocation5 + $0x160] sm:$0xff] %vm2325_vm12, %v7391_v19  ;;  %4016 = vst.msk [vmem:[#allocation5 + $0x178] sm:$0xff] %vm2325_vm12, %v7399_v58  ;;  %v7428_v55 = vld [vmem:[#allocation4 + $0x10a] sm:$0xff]  ;;  %v2698_v27 = vld [vmem:[#allocation4 + $0x98] sm:$0xff] }
 0x413   : > { %3379 = vst.msk [vmem:[#allocation5 + $0x1d0] sm:$0xff] %vm2325_vm12, %v7401_v35  ;;  %4017 = vst.msk [vmem:[#allocation5 + $0x190] sm:$0xff] %vm2325_vm12, %v7408_v28  ;;  %v7437_v23 = vld [vmem:[#allocation4 + $0x121] sm:$0xff]  ;;  %v7439_v13 = vld [vmem:[#allocation4 + $0x112] sm:$0xff] }
 0x414   : > { %3380 = vst.msk [vmem:[#allocation5 + $0x1e8] sm:$0xff] %vm2325_vm12, %v7410_v25  ;;  %4018 = vst.msk [vmem:[#allocation5 + $0x1a8] sm:$0xff] %vm2325_vm12, %v7418_v1  ;;  %v3332_v31 = vld [vmem:[#allocation4 + $0x49] sm:$0xff]  ;;  %3472 = vrot.lane.b32.xlu0 %v7434_v63, %s5518_s14  ;;  %v7460_v56 = vld [vmem:[#allocation4 + $0x139] sm:$0xff] }
 0x415   : > { %3381 = vst.msk [vmem:[#allocation5 + $0x200] sm:$0xff] %vm2325_vm12, %v7420_v26  ;;  %2730 = vst.msk [vmem:[#allocation5 + $0x138] sm:$0xff] %vm2325_vm12, %v2698_v27  ;;  %v2689_v33 = vld [vmem:[#allocation4 + $0x30] sm:$0xff]  ;;  %v7453_v22 = vld [vmem:[#allocation4 + $0x122] sm:$0xff]  ;;  %2829 = vrot.lane.b32.xlu1 %v7239_v8, %s5518_s14 }
 0x416   : > { %4019 = vst.msk [vmem:[#allocation5 + $0x1c0] sm:$0xff] %vm2325_vm12, %v7428_v55  ;;  %v7443_v16 = vld [vmem:[#allocation4 + $0x129] sm:$0xff]  ;;  %4020 = vst.msk [vmem:[#allocation5 + $0x1d8] sm:$0xff] %vm2325_vm12, %v7439_v13  ;;  %v3333_v52 = vld [vmem:[#allocation4 + $0x51] sm:$0xff] }
 0x417   : > { %3382 = vst.msk [vmem:[#allocation5 + $0x218] sm:$0xff] %vm2325_vm12, %v7437_v23  ;;  %3364 = vst.msk [vmem:[#allocation5 + $0x68] sm:$0xff] %vm2325_vm12, %v3332_v31  ;;  %v2699_v29 = vld [vmem:[#allocation4 + $0xa8] sm:$0xff]  ;;  %v2690_v12 = vld [vmem:[#allocation4 + $0x38] sm:$0xff] }
 0x418   : > { %2721 = vst.msk [vmem:[#allocation5 + $0x60] sm:$0xff] %vm2325_vm12, %v2689_v33  ;;  %3383 = vst.msk [vmem:[#allocation5 + $0x230] sm:$0xff] %vm2325_vm12, %v7443_v16  ;;  %v7462_v9 = vld [vmem:[#allocation4 + $0x12a] sm:$0xff]  ;;  %v7466_v18 = vld [vmem:[#allocation4 + $0x141] sm:$0xff]  ;;  %3665 = vrot.lane.b32.xlu0 %v7265_v0, %s5520_s29 }
 0x419   : > { %2731 = vst.msk [vmem:[#allocation5 + $0x150] sm:$0xff] %vm2325_vm12, %v2699_v29  ;;  %4021 = vst.msk [vmem:[#allocation5 + $0x1f0] sm:$0xff] %vm2325_vm12, %v7453_v22  ;;  %v7474_v14 = vld [vmem:[#allocation4 + $0x13a] sm:$0xff]  ;;  %v2700_v30 = vld [vmem:[#allocation4 + $0xb0] sm:$0xff]  ;;  %3022 = vrot.lane.b32.xlu1 %v7222_v54, %s5520_s29 }
 0x41a   : > { %4022 = vst.msk [vmem:[#allocation5 + $0x208] sm:$0xff] %vm2325_vm12, %v7462_v9  ;;  %3384 = vst.msk [vmem:[#allocation5 + $0x248] sm:$0xff] %vm2325_vm12, %v7460_v56  ;;  %v7476_v36 = vld [vmem:[#allocation4 + $0x150] sm:$0xff]  ;;  %v7485_v62 = vld [vmem:[#allocation4 + $0x142] sm:$0xff] }
 0x41b   : > { %3365 = vst.msk [vmem:[#allocation5 + $0x80] sm:$0xff] %vm2325_vm12, %v3333_v52  ;;  %2722 = vst.msk [vmem:[#allocation5 + $0x78] sm:$0xff] %vm2325_vm12, %v2690_v12  ;;  %v7483_v39 = vld [vmem:[#allocation4 + $0x151] sm:$0xff]  ;;  %v2701_v49 = vld [vmem:[#allocation4 + $0xc0] sm:$0xff] }
 0x41c   : > { %3385 = vst.msk [vmem:[#allocation5 + $0x260] sm:$0xff] %vm2325_vm12, %v7466_v18  ;;  %2732 = vst.msk [vmem:[#allocation5 + $0x168] sm:$0xff] %vm2325_vm12, %v2700_v30  ;;  %v7487_v43 = vld [vmem:[#allocation4 + $0x158] sm:$0xff]  ;;  %v3971_v54 = vld [vmem:[#allocation4 + $0x4a] sm:$0xff]  ;;  %3857 = vrot.lane.b32.xlu0 %v7274_v6, %s5521_s9 }
 0x41d   : > { %4023 = vst.msk [vmem:[#allocation5 + $0x220] sm:$0xff] %vm2325_vm12, %v7474_v14  ;;  %2745 = vst.msk [vmem:[#allocation5 + $0x2a0] sm:$0xff] %vm2325_vm12, %v7476_v36  ;;  %v7495_v7 = vld [vmem:[#allocation4 + $0x159] sm:$0xff]  ;;  %v7511_v52 = vld [vmem:[#allocation4 + $0x168] sm:$0xff]  ;;  %3215 = vrot.lane.b32.xlu1 %v7245_v15, %s5521_s9 }
 0x41e   : > { %v3969_v27 = vld [vmem:[#allocation4 + $0x32] sm:$0xff]  ;;  %4024 = vst.msk [vmem:[#allocation5 + $0x238] sm:$0xff] %vm2325_vm12, %v7485_v62  ;;  %3386 = vst.msk [vmem:[#allocation5 + $0x278] sm:$0xff] %vm2325_vm12, %v7483_v39  ;;  %v3970_v31 = vld [vmem:[#allocation4 + $0x3a] sm:$0xff] }
 0x41f   : > { %2746 = vst.msk [vmem:[#allocation5 + $0x2b8] sm:$0xff] %vm2325_vm12, %v7487_v43  ;;  %2733 = vst.msk [vmem:[#allocation5 + $0x180] sm:$0xff] %vm2325_vm12, %v2701_v49  ;;  %v7505_v33 = vld [vmem:[#allocation4 + $0x152] sm:$0xff]  ;;  %v3973_v12 = vld [vmem:[#allocation4 + $0x62] sm:$0xff] }
 0x420   : > { %4001 = vst.msk [vmem:[#allocation5 + $0x10] sm:$0xff] %vm2325_vm12, %v3969_v27  ;;  %8690 = vst [vmem:[#allocation7_spill] sm:$0xff] %v7505_v33  ;;  %v3972_v29 = vld [vmem:[#allocation4 + $0x52] sm:$0xff]  ;;  %v2702_v30 = vld [vmem:[#allocation4 + $0xc8] sm:$0xff] }
 0x421   : > { %3387 = vst.msk [vmem:[#allocation5 + $0x290] sm:$0xff] %vm2325_vm12, %v7495_v7  ;;  %4002 = vst.msk [vmem:[#allocation5 + $0x28] sm:$0xff] %vm2325_vm12, %v3970_v31  ;;  %v3974_v49 = vld [vmem:[#allocation4 + $0x6a] sm:$0xff]  ;;  %v7525_v31 = vld [vmem:[#allocation4 + $0x82] sm:$0xff]  ;;  %2831 = vrot.lane.b32.xlu1 %v7276_v17, %s5518_s14 }
 0x422   : > { %4003 = vst.msk [vmem:[#allocation5 + $0x40] sm:$0xff] %vm2325_vm12, %v3971_v54  ;;  %8691 = vst [vmem:[#allocation8_spill] sm:$0xff] %v7511_v52  ;;  %v7519_v27 = vld [vmem:[#allocation4 + $0x169] sm:$0xff]  ;;  %v2685_v54 = vld [vmem:[#allocation4] sm:$0xff]  ;;  %3474 = vrot.lane.b32.xlu0 %v7525_v31, %s5518_s14 }
 0x423   : > { %4025 = vst.msk [vmem:[#allocation5 + $0x250] sm:$0xff] %vm2325_vm12, %v7505_v33  ;;  %4004 = vst.msk [vmem:[#allocation5 + $0x58] sm:$0xff] %vm2325_vm12, %v3972_v29  ;;  %v3975_v29 = vld [vmem:[#allocation4 + $0x7a] sm:$0xff]  ;;  %v3976_v32 = vld [vmem:[#allocation4 + $0x82] sm:$0xff] }
 0x424   : > { %4005 = vst.msk [vmem:[#allocation5 + $0x70] sm:$0xff] %vm2325_vm12, %v3973_v12  ;;  %8692 = vst [vmem:[#allocation9_spill] sm:$0xff] %v7519_v27  ;;  %v7534_v12 = vld [vmem:[#allocation4 + $0x15a] sm:$0xff]  ;;  %v3977_v15 = vld [vmem:[#allocation4 + $0x92] sm:$0xff] }
 0x425   : > { %2747 = vst.msk [vmem:[#allocation5 + $0x2d0] sm:$0xff] %vm2325_vm12, %v7511_v52  ;;  %2734 = vst.msk [vmem:[#allocation5 + $0x198] sm:$0xff] %vm2325_vm12, %v2702_v30  ;;  %v3978_v52 = vld [vmem:[#allocation4 + $0x9a] sm:$0xff]  ;;  %v7538_v30 = vld [vmem:[#allocation4 + $0x170] sm:$0xff]  ;;  %3024 = vrot.lane.b32.xlu1 %v7335_v11, %s5520_s29 }
 0x426   : > { %4006 = vst.msk [vmem:[#allocation5 + $0x88] sm:$0xff] %vm2325_vm12, %v3974_v49  ;;  %3388 = vst.msk [vmem:[#allocation5 + $0x2a8] sm:$0xff] %vm2325_vm12, %v7519_v27  ;;  %v3979_v49 = vld [vmem:[#allocation4 + $0xaa] sm:$0xff]  ;;  %v2703_v33 = vld [vmem:[#allocation4 + $0xd8] sm:$0xff] }
 0x427   : > { %2717 = vst.msk [vmem:[#allocation5] sm:$0xff] %vm2325_vm12, %v2685_v54  ;;  %4007 = vst.msk [vmem:[#allocation5 + $0xa0] sm:$0xff] %vm2325_vm12, %v3975_v29  ;;  %v7546_v54 = vld [vmem:[#allocation4 + $0x171] sm:$0xff]  ;;  %v3981_v29 = vld [vmem:[#allocation4 + $0xc2] sm:$0xff] }
 0x428   : > { %4008 = vst.msk [vmem:[#allocation5 + $0xb8] sm:$0xff] %vm2325_vm12, %v3976_v32  ;;  %8693 = vst [vmem:[#allocation10_spill] sm:$0xff] %v7534_v12  ;;  %v3980_v32 = vld [vmem:[#allocation4 + $0xb2] sm:$0xff]  ;;  %v7580_v11 = vld [vmem:[#allocation4 + $0x182] sm:$0xff] }
 0x429   : > { %4009 = vst.msk [vmem:[#allocation5 + $0xd0] sm:$0xff] %vm2325_vm12, %v3977_v15  ;;  %4010 = vst.msk [vmem:[#allocation5 + $0xe8] sm:$0xff] %vm2325_vm12, %v3978_v52  ;;  %v7554_v52 = vld [vmem:[#allocation4 + $0x16a] sm:$0xff]  ;;  %v2704_v15 = vld [vmem:[#allocation4 + $0xe0] sm:$0xff]  ;;  %3217 = vrot.lane.b32.xlu1 %v7257_v53, %s5521_s9 }
 0x42a   : > { %8694 = vst [vmem:[#allocation11_spill] sm:$0xff] %v7538_v30  ;;  %4026 = vst.msk [vmem:[#allocation5 + $0x268] sm:$0xff] %vm2325_vm12, %v7534_v12  ;;  %v2706_v53 = vld [vmem:[#allocation4 + $0xf8] sm:$0xff]  ;;  %v2712_v12 = vld [vmem:[#allocation4 + $0x140] sm:$0xff] }
 0x42b   : > { %4011 = vst.msk [vmem:[#allocation5 + $0x100] sm:$0xff] %vm2325_vm12, %v3979_v49  ;;  %2735 = vst.msk [vmem:[#allocation5 + $0x1b0] sm:$0xff] %vm2325_vm12, %v2703_v33  ;;  %v7560_v33 = vld [vmem:[#allocation4 + $0x98] sm:$0xff] }
 0x42c   : > { %8695 = vst [vmem:[#allocation12_spill] sm:$0xff] %v7546_v54  ;;  %2748 = vst.msk [vmem:[#allocation5 + $0x2e8] sm:$0xff] %vm2325_vm12, %v7538_v30  ;;  %3667 = vrot.lane.b32.xlu0 %v7560_v33, %s5520_s29  ;;  %v7567_v49 = vld [vmem:[#allocation4 + $0x172] sm:$0xff]  ;;  %v2709_v30 = vld [vmem:[#allocation4 + $0x120] sm:$0xff] }
 0x42d   : > { %4012 = vst.msk [vmem:[#allocation5 + $0x118] sm:$0xff] %vm2325_vm12, %v3980_v32  ;;  %4013 = vst.msk [vmem:[#allocation5 + $0x130] sm:$0xff] %vm2325_vm12, %v3981_v29  ;;  %v2749_v32 = vld [vmem:[#allocation4 + $0x1] sm:$0xff]  ;;  %v2705_v29 = vld [vmem:[#allocation4 + $0xf0] sm:$0xff] }
 0x42e   : > { %8696 = vst [vmem:[#allocation13_spill] sm:$0xff] %v7554_v52  ;;  %3389 = vst.msk [vmem:[#allocation5 + $0x2c0] sm:$0xff] %vm2325_vm12, %v7546_v54  ;;  %v7577_v54 = vld [vmem:[#allocation4 + $0x1a] sm:$0xff]  ;;  %2813 = vrot.lane.b32.xlu1 %v2749_v32, %s5518_s14  ;;  %v3402_v27 = vld [vmem:[#allocation4 + $0x92] sm:$0xff] }
 0x42f   : > { %4027 = vst.msk [vmem:[#allocation5 + $0x280] sm:$0xff] %vm2325_vm12, %v7554_v52  ;;  %2736 = vst.msk [vmem:[#allocation5 + $0x1c8] sm:$0xff] %vm2325_vm12, %v2704_v15  ;;  %v7575_v52 = vld [vmem:[#allocation4 + $0x189] sm:$0xff] }
 0x430   : > { %8697 = vst [vmem:[#allocation14_spill] sm:$0xff] %v7567_v49  ;;  %3859 = vrot.lane.b32.xlu0 %v7284_v44, %s5521_s9  ;;  %4028 = vst.msk [vmem:[#allocation5 + $0x298] sm:$0xff] %vm2325_vm12, %v7567_v49  ;;  %v7588_v15 = vld [vmem:[#allocation4 + $0x18a] sm:$0xff] }
 0x431   : > { %8698 = vst [vmem:[#allocation15_spill] sm:$0xff] %v7575_v52  ;;  %2737 = vst.msk [vmem:[#allocation5 + $0x1e0] sm:$0xff] %vm2325_vm12, %v2705_v29  ;;  %v2707_v29 = vld [vmem:[#allocation4 + $0x108] sm:$0xff]  ;;  %v2708_v49 = vld [vmem:[#allocation4 + $0x110] sm:$0xff] }
 0x432   : > { %8699 = vst [vmem:[#allocation16_spill] sm:$0xff] %v7580_v11  ;;  %3391 = vst.msk [vmem:[#allocation5 + $0x2f0] sm:$0xff] %vm2325_vm12, %v7575_v52  ;;  %v2711_v52 = vld [vmem:[#allocation4 + $0x138] sm:$0xff]  ;;  %v3585_v32 = vld [vmem:[#allocation4 + $0x30] sm:$0xff] }
 0x433   : > { %4029 = vst.msk [vmem:[#allocation5 + $0x2b0] sm:$0xff] %vm2325_vm12, %v7580_v11  ;;  %2738 = vst.msk [vmem:[#allocation5 + $0x1f8] sm:$0xff] %vm2325_vm12, %v2706_v53  ;;  %v2710_v11 = vld [vmem:[#allocation4 + $0x128] sm:$0xff]  ;;  %3649 = vrot.lane.b32.xlu1 %v3585_v32, %s5520_s29 }
 0x434   : > { %3456 = vrot.lane.b32.xlu0 %v7577_v54, %s5518_s14  ;;  %4030 = vst.msk [vmem:[#allocation5 + $0x2c8] sm:$0xff] %vm2325_vm12, %v7588_v15  ;;  %2739 = vst.msk [vmem:[#allocation5 + $0x210] sm:$0xff] %vm2325_vm12, %v2707_v29  ;;  %v2942_v53 = vld [vmem:[#allocation4 + $0x2] sm:$0xff]  ;;  %v7682_v29 = vld [vmem:[#allocation4 + $0xb2] sm:$0xff] }
 0x435   : > { %2740 = vst.msk [vmem:[#allocation5 + $0x228] sm:$0xff] %vm2325_vm12, %v2708_v49  ;;  %2741 = vst.msk [vmem:[#allocation5 + $0x240] sm:$0xff] %vm2325_vm12, %v2709_v30  ;;  %v3595_v30 = vld [vmem:[#allocation4 + $0xa8] sm:$0xff] }
 0x436   : > { %2742 = vst.msk [vmem:[#allocation5 + $0x258] sm:$0xff] %vm2325_vm12, %v2710_v11  ;;  %2743 = vst.msk [vmem:[#allocation5 + $0x270] sm:$0xff] %vm2325_vm12, %v2711_v52  ;;  %v2686_v49 = vld [vmem:[#allocation4 + $0x8] sm:$0xff]  ;;  %v7619_v52 = vld [vmem:[#allocation4 + $0x9a] sm:$0xff] }
 0x437   : > { %2744 = vst.msk [vmem:[#allocation5 + $0x288] sm:$0xff] %vm2325_vm12, %v2712_v12  ;;  %3006 = vrot.lane.b32.xlu1 %v2942_v53, %s5520_s29  ;;  %2718 = vst.msk [vmem:[#allocation5 + $0x18] sm:$0xff] %vm2325_vm12, %v2686_v49  ;;  %v3393_v12 = vld [vmem:[#allocation4 + $0x22] sm:$0xff]  ;;  %v7650_v11 = vld [vmem:[#allocation4 + $0xaa] sm:$0xff] }
 0x438   : > { %3476 = vrot.lane.b32.xlu0 %v3402_v27, %s5518_s14 }
 0x43b   : > { %3841 = vrot.lane.b32.xlu1 %v7297_v24, %s5521_s9 }
 0x43c   : > { %2833 = vrot.lane.b32.xlu0 %v7247_v4, %s5518_s14  ;;  %v2750_v4 = vld [vmem:[#allocation4 + $0x9] sm:$0xff] }
 0x43f   : > { %3199 = vrot.lane.b32.xlu1 %v7301_v38, %s5521_s9  ;;  %v2943_v38 = vld [vmem:[#allocation4 + $0xa] sm:$0xff] }
 0x440   : > { %3669 = vrot.lane.b32.xlu0 %v3595_v30, %s5520_s29 }
 0x443   : > { %3219 = vrot.lane.b32.xlu1 %v7265_v0, %s5521_s9  ;;  %v7630_v0 = vld [vmem:[#allocation4 + $0xb0] sm:$0xff] }
 0x444   : > { %3026 = vrot.lane.b32.xlu0 %v7434_v63, %s5520_s29  ;;  %v7623_v63 = vld [vmem:[#allocation4 + $0x38] sm:$0xff] }
 0x447   : > { %2815 = vrot.lane.b32.xlu1 %v2750_v4, %s5518_s14 }
 0x448   : > { %3861 = vrot.lane.b32.xlu0 %v7303_v37, %s5521_s9 }
 0x44b   : > { %3651 = vrot.lane.b32.xlu1 %v7623_v63, %s5520_s29 }
 0x44c   : > { %3458 = vrot.lane.b32.xlu0 %v3393_v12, %s5518_s14 }
 0x44f   : > { %3008 = vrot.lane.b32.xlu1 %v2943_v38, %s5520_s29  ;;  %v7695_v38 = vld [vmem:[#allocation4 + $0xc8] sm:$0xff] }
 0x450   : > { %3478 = vrot.lane.b32.xlu0 %v7619_v52, %s5518_s14 }
 0x453   : > { %3843 = vrot.lane.b32.xlu1 %v7319_v34, %s5521_s9 }
 0x454   : > { %2835 = vrot.lane.b32.xlu0 %v7263_v20, %s5518_s14  ;;  %v7644_v20 = vld [vmem:[#allocation4 + $0x32] sm:$0xff] }
 0x457   : > { %3201 = vrot.lane.b32.xlu1 %v7321_v61, %s5521_s9  ;;  %v7660_v61 = vld [vmem:[#allocation4 + $0xc0] sm:$0xff] }
 0x458   : > { %3671 = vrot.lane.b32.xlu0 %v7630_v0, %s5520_s29 }
 0x45b   : > { %3221 = vrot.lane.b32.xlu1 %v7560_v33, %s5521_s9 }
 0x45c   : > { %3028 = vrot.lane.b32.xlu0 %v7525_v31, %s5520_s29 }
 0x45f   : > { %2817 = vrot.lane.b32.xlu1 %v7329_v41, %s5518_s14 }
 0x460   : > { %3863 = vrot.lane.b32.xlu0 %v7327_v3, %s5521_s9 }
 0x463   : > { %3653 = vrot.lane.b32.xlu1 %v7337_v42, %s5520_s29 }
 0x464   : > { %3460 = vrot.lane.b32.xlu0 %v7644_v20, %s5518_s14 }
 0x467   : > { %3010 = vrot.lane.b32.xlu1 %v7577_v54, %s5520_s29 }
 0x468   : > { %3480 = vrot.lane.b32.xlu0 %v7650_v11, %s5518_s14 }
 0x46b   : > { %3845 = vrot.lane.b32.xlu1 %v7235_v59, %s5521_s9 }
 0x46c   : > { %2837 = vrot.lane.b32.xlu0 %v7274_v6, %s5518_s14 }
 0x46e   : > { %v3469_v41 = vpop.permute.xlu0 %3468 }
 0x46f   : > { %3203 = vrot.lane.b32.xlu1 %v3585_v32, %s5521_s9  ;;  %3558 = vst.msk [vmem:[#allocation5 + $0x98] sm:$0xff] %vm2909_vm14, %v3469_v41  ;;  %v2826_v6 = vpop.permute.xlu1 %2825 }
 0x470   : > { %3673 = vrot.lane.b32.xlu0 %v7660_v61, %s5520_s29  ;;  %2916 = vst.msk [vmem:[#allocation5 + $0x90] sm:$0xff] %vm2909_vm14, %v2826_v6 }
 0x472   : > { %v3662_v31 = vpop.permute.xlu0 %3661 }
 0x473   : > { %3223 = vrot.lane.b32.xlu1 %v3595_v30, %s5521_s9  ;;  %3751 = vst.msk [vmem:[#allocation5 + $0x98] sm:$0xff] %vm3102_vm15, %v3662_v31  ;;  %v3019_v59 = vpop.permute.xlu1 %3018 }
 0x474   : > { %3030 = vrot.lane.b32.xlu0 %v3402_v27, %s5520_s29  ;;  %v7674_v27 = vld [vmem:[#allocation4 + $0x3a] sm:$0xff]  ;;  %3109 = vst.msk [vmem:[#allocation5 + $0x90] sm:$0xff] %vm3102_vm15, %v3019_v59 }
 0x476   : > { %v3854_v54 = vpop.permute.xlu0 %3853 }
 0x477   : > { %2819 = vrot.lane.b32.xlu1 %v7352_v47, %s5518_s14  ;;  %3943 = vst.msk [vmem:[#allocation5 + $0x98] sm:$0xff] %vm3295_vm0, %v3854_v54  ;;  %v3212_v33 = vpop.permute.xlu1 %3211  ;;  %v7721_v54 = vld [vmem:[#allocation4 + $0xc2] sm:$0xff] }
 0x478   : > { %3865 = vrot.lane.b32.xlu0 %v7350_v10, %s5521_s9  ;;  %3302 = vst.msk [vmem:[#allocation5 + $0x90] sm:$0xff] %vm3295_vm0, %v3212_v33 }
 0x47a   : > { %v3471_v32 = vpop.permute.xlu0 %3470 }
 0x47b   : > { %3655 = vrot.lane.b32.xlu1 %v7357_v2, %s5520_s29  ;;  %3559 = vst.msk [vmem:[#allocation5 + $0xb0] sm:$0xff] %vm2909_vm14, %v3471_v32  ;;  %v2828_v53 = vpop.permute.xlu1 %2827 }
 0x47c   : > { %3462 = vrot.lane.b32.xlu0 %v7674_v27, %s5518_s14  ;;  %2917 = vst.msk [vmem:[#allocation5 + $0xa8] sm:$0xff] %vm2909_vm14, %v2828_v53 }
 0x47e   : > { %v3664_v47 = vpop.permute.xlu0 %3663  ;;  %v4052_v30 = vld [vmem:[#allocation5 + $0x98] sm:$0xff] }
 0x47f   : > { %3012 = vrot.lane.b32.xlu1 %v3393_v12, %s5520_s29  ;;  %3752 = vst.msk [vmem:[#allocation5 + $0xb0] sm:$0xff] %vm3102_vm15, %v3664_v47  ;;  %v3021_v49 = vpop.permute.xlu1 %3020  ;;  %4362 = vmatprep.mubr.f32.mxu1 %v4052_v30  ;;  %v4051_v4 = vld [vmem:[#allocation5 + $0x90] sm:$0xff] }
 0x480   : > { %3482 = vrot.lane.b32.xlu0 %v7682_v29, %s5518_s14  ;;  %3110 = vst.msk [vmem:[#allocation5 + $0xa8] sm:$0xff] %vm3102_vm15, %v3021_v49  ;;  %4363 = vmatmul.mubr.f32.vlgmr.msra.gmra.mrb[0].mxu1 %v4051_v4 }
 0x483   : > { %3847 = vrot.lane.b32.xlu1 %v7346_v46, %s5521_s9  ;;  %v3214_v12 = vpop.permute.xlu1 %3213 }
 0x484   : > { %2839 = vrot.lane.b32.xlu0 %v7284_v44, %s5518_s14  ;;  %v3856_v44 = vpop.permute.xlu0 %3855  ;;  %3303 = vst.msk [vmem:[#allocation5 + $0xa8] sm:$0xff] %vm3295_vm0, %v3214_v12 }
 0x485   : > { %3944 = vst.msk [vmem:[#allocation5 + $0xb0] sm:$0xff] %vm3295_vm0, %v3856_v44 }
 0x487   : > { %3205 = vrot.lane.b32.xlu1 %v7623_v63, %s5521_s9  ;;  %v2830_v6 = vpop.permute.xlu1 %2829 }
 0x488   : > { %3675 = vrot.lane.b32.xlu0 %v7695_v38, %s5520_s29  ;;  %v3473_v41 = vpop.permute.xlu0 %3472  ;;  %2918 = vst.msk [vmem:[#allocation5 + $0xc0] sm:$0xff] %vm2909_vm14, %v2830_v6 }
 0x489   : > { %3560 = vst.msk [vmem:[#allocation5 + $0xc8] sm:$0xff] %vm2909_vm14, %v3473_v41 }
 0x48b   : > { %3225 = vrot.lane.b32.xlu1 %v7630_v0, %s5521_s9  ;;  %v4054_v59 = vld [vmem:[#allocation5 + $0xa8] sm:$0xff] }
 0x48c   : > { %3032 = vrot.lane.b32.xlu0 %v7619_v52, %s5520_s29  ;;  %v3666_v46 = vpop.permute.xlu0 %3665  ;;  %v4055_v31 = vld [vmem:[#allocation5 + $0xb0] sm:$0xff]  ;;  %v3023_v52 = vpop.permute.xlu1 %3022 }
 0x48d   : > { %3753 = vst.msk [vmem:[#allocation5 + $0xc8] sm:$0xff] %vm3102_vm15, %v3666_v46  ;;  %4367 = vmatprep.mubr.f32.mxu1 %v4055_v31  ;;  %3111 = vst.msk [vmem:[#allocation5 + $0xc0] sm:$0xff] %vm3102_vm15, %v3023_v52  ;;  %v7779_v31 = vld [vmem:[#allocation4 + $0xe0] sm:$0xff] }
 0x48e   : > { %4368 = vmatmul.mubr.f32.gmra.mrb[2].mxu1 %v4054_v59  ;;  %v4163_v59 = vld [vmem:[%s8667_s3 + $0x110] sm:$0xff] }
 0x48f   : > { %2821 = vrot.lane.b32.xlu1 %v7297_v24, %s5518_s14 }
 0x490   : > { %3867 = vrot.lane.b32.xlu0 %v7371_v50, %s5521_s9  ;;  %v3858_v63 = vpop.permute.xlu0 %3857  ;;  %v3216_v0 = vpop.permute.xlu1 %3215 }
 0x491   : > { %3945 = vst.msk [vmem:[#allocation5 + $0xc8] sm:$0xff] %vm3295_vm0, %v3858_v63  ;;  %3304 = vst.msk [vmem:[#allocation5 + $0xc0] sm:$0xff] %vm3295_vm0, %v3216_v0  ;;  %v4164_v63 = vld [vmem:[%s8667_s3 + $0x118] sm:$0xff] }
 0x492   : > { %v5442_v0 = vpack.c.bf16 %v4164_v63, %v4163_v59 }
 0x493   : > { %3657 = vrot.lane.b32.xlu1 %v7228_v40, %s5520_s29  ;;  %v7735_v40 = vld [vmem:[#allocation4 + $0xd8] sm:$0xff] }
 0x494   : > { %3464 = vrot.lane.b32.xlu0 %v7272_v60, %s5518_s14  ;;  %v3475_v33 = vpop.permute.xlu0 %3474  ;;  %v2832_v60 = vpop.permute.xlu1 %2831 }
 0x495   : > { %3561 = vst.msk [vmem:[#allocation5 + $0xe0] sm:$0xff] %vm2909_vm14, %v3475_v33  ;;  %2919 = vst.msk [vmem:[#allocation5 + $0xd8] sm:$0xff] %vm2909_vm14, %v2832_v60 }
 0x497   : > { %3014 = vrot.lane.b32.xlu1 %v7644_v20, %s5520_s29 }
 0x498   : > { %3484 = vrot.lane.b32.xlu0 %v7721_v54, %s5518_s14  ;;  %v4058_v32 = vld [vmem:[#allocation5 + $0xc8] sm:$0xff]  ;;  %v3025_v53 = vpop.permute.xlu1 %3024  ;;  %v4057_v47 = vld [vmem:[#allocation5 + $0xc0] sm:$0xff] }
 0x499   : > { %4372 = vmatprep.mubr.f32.mxu1 %v4058_v32  ;;  %3112 = vst.msk [vmem:[#allocation5 + $0xd8] sm:$0xff] %vm3102_vm15, %v3025_v53 }
 0x49a   : > { %4373 = vmatmul.mubr.f32.gmra.mrb[4].mxu1 %v4057_v47  ;;  %v3601_v47 = vld [vmem:[#allocation4 + $0xf0] sm:$0xff] }
 0x49b   : > { %3849 = vrot.lane.b32.xlu1 %v7239_v8, %s5521_s9 }
 0x49c   : > { %2841 = vrot.lane.b32.xlu0 %v7303_v37, %s5518_s14  ;;  %v3218_v20 = vpop.permute.xlu1 %3217 }
 0x49d   : > { %3305 = vst.msk [vmem:[#allocation5 + $0xd8] sm:$0xff] %vm3295_vm0, %v3218_v20 }
 0x49e   : > { %v3668_v24 = vpop.permute.xlu0 %3667 }
 0x49f   : > { %3754 = vst.msk [vmem:[#allocation5 + $0xe0] sm:$0xff] %vm3102_vm15, %v3668_v24  ;;  %3207 = vrot.lane.b32.xlu1 %v7337_v42, %s5521_s9 }
 0x4a0   : > { %3677 = vrot.lane.b32.xlu0 %v7735_v40, %s5520_s29  ;;  %v2814_v49 = vpop.permute.xlu1 %2813 }
 0x4a1   : > { %2910 = vst.msk [vmem:[#allocation5] sm:$0xff] %vm2909_vm14, %v2814_v49 }
 0x4a2   : > { %v3860_v37 = vpop.permute.xlu0 %3859 }
 0x4a3   : > { %3946 = vst.msk [vmem:[#allocation5 + $0xe0] sm:$0xff] %vm3295_vm0, %v3860_v37  ;;  %3227 = vrot.lane.b32.xlu1 %v7660_v61, %s5521_s9 }
 0x4a4   : > { %3034 = vrot.lane.b32.xlu0 %v7650_v11, %s5520_s29  ;;  %v4060_v11 = vld [vmem:[#allocation5 + $0xd8] sm:$0xff] }
 0x4a5   : > { %v3650_v44 = vpop.permute.xlu1 %3649 }
 0x4a6   : > { %v3457_v30 = vpop.permute.xlu0 %3456 }
 0x4a7   : > { %3552 = vst.msk [vmem:[#allocation5 + $0x8] sm:$0xff] %vm2909_vm14, %v3457_v30  ;;  %2823 = vrot.lane.b32.xlu1 %v7319_v34, %s5518_s14  ;;  %v4161_v34 = vld [vmem:[%s8667_s3 + $0x100] sm:$0xff] }
 0x4a8   : > { %3869 = vrot.lane.b32.xlu0 %v7373_v5, %s5521_s9  ;;  %3745 = vst.msk [vmem:[#allocation5 + $0x8] sm:$0xff] %vm3102_vm15, %v3650_v44 }
 0x4a9   : > { %v3007_v12 = vpop.permute.xlu1 %3006 }
 0x4aa   : > { %v3477_v8 = vpop.permute.xlu0 %3476  ;;  %v4061_v4 = vld [vmem:[#allocation5 + $0xe0] sm:$0xff]  ;;  %3103 = vst.msk [vmem:[#allocation5] sm:$0xff] %vm3102_vm15, %v3007_v12 }
 0x4ab   : > { %3562 = vst.msk [vmem:[#allocation5 + $0xf8] sm:$0xff] %vm2909_vm14, %v3477_v8  ;;  %4377 = vmatprep.mubr.f32.mxu1 %v4061_v4  ;;  %3659 = vrot.lane.b32.xlu1 %v7237_v51, %s5520_s29  ;;  %v3602_v4 = vld [vmem:[#allocation4 + $0xf8] sm:$0xff] }
 0x4ac   : > { %4378 = vmatmul.mubr.f32.gmra.mrb[6].mxu1 %v4060_v11  ;;  %3466 = vrot.lane.b32.xlu0 %v7380_v45, %s5518_s14  ;;  %v4162_v45 = vld [vmem:[%s8667_s3 + $0x108] sm:$0xff] }
 0x4ad   : > { %v3842_v41 = vpop.permute.xlu1 %3841  ;;  %v5438_v51 = vpack.c.bf16 %v4162_v45, %v4161_v34  ;;  %v3603_v34 = vld [vmem:[#allocation4 + $0x108] sm:$0xff] }
 0x4ae   : > { %v2834_v42 = vpop.permute.xlu0 %2833  ;;  %3937 = vst.msk [vmem:[#allocation5 + $0x8] sm:$0xff] %vm3295_vm0, %v3842_v41 }
 0x4af   : > { %2920 = vst.msk [vmem:[#allocation5 + $0xf0] sm:$0xff] %vm2909_vm14, %v2834_v42  ;;  %3016 = vrot.lane.b32.xlu1 %v7674_v27, %s5520_s29  ;;  %5439 = vmatprep.subr.bf16.mxu0 %v5438_v51 }
 0x4b0   : > { %3486 = vrot.lane.b32.xlu0 %v7382_v21, %s5518_s14 }
 0x4b1   : > { %v3200_v46 = vpop.permute.xlu1 %3199 }
 0x4b2   : > { %v3670_v61 = vpop.permute.xlu0 %3669  ;;  %3296 = vst.msk [vmem:[#allocation5] sm:$0xff] %vm3295_vm0, %v3200_v46 }
 0x4b3   : > { %3755 = vst.msk [vmem:[#allocation5 + $0xf8] sm:$0xff] %vm3102_vm15, %v3670_v61  ;;  %3851 = vrot.lane.b32.xlu1 %v7276_v17, %s5521_s9 }
 0x4b4   : > { %2843 = vrot.lane.b32.xlu0 %v7327_v3, %s5518_s14 }
 0x4b5   : > { %v3220_v27 = vpop.permute.xlu1 %3219  ;;  %v4034_v52 = vld [vmem:[#allocation5 + $0x8] sm:$0xff] }
 0x4b6   : > { %v3027_v6 = vpop.permute.xlu0 %3026  ;;  %4332 = vmatprep.mubr.f32.mxu0 %v4034_v52 }
 0x4b7   : > { %3113 = vst.msk [vmem:[#allocation5 + $0xf0] sm:$0xff] %vm3102_vm15, %v3027_v6  ;;  %3209 = vrot.lane.b32.xlu1 %v7357_v2, %s5521_s9 }
 0x4b8   : > { %3679 = vrot.lane.b32.xlu0 %v7779_v31, %s5520_s29  ;;  %3306 = vst.msk [vmem:[#allocation5 + $0xf0] sm:$0xff] %vm3295_vm0, %v3220_v27 }
 0x4b9   : > { %v2816_v33 = vpop.permute.xlu1 %2815  ;;  %v4033_v60 = vld [vmem:[#allocation5] sm:$0xff] }
 0x4ba   : > { %v3862_v3 = vpop.permute.xlu0 %3861  ;;  %2911 = vst.msk [vmem:[#allocation5 + $0x18] sm:$0xff] %vm2909_vm14, %v2816_v33  ;;  %4333 = vmatmul.mubr.f32.vlgmr.msra.gmra.mrb[32].mxu0 %v4033_v60  ;;  %v3605_v60 = vld [vmem:[#allocation4 + $0x120] sm:$0xff] }
 0x4bb   : > { %3947 = vst.msk [vmem:[#allocation5 + $0xf8] sm:$0xff] %vm3295_vm0, %v3862_v3  ;;  %3229 = vrot.lane.b32.xlu1 %v7695_v38, %s5521_s9  ;;  %5441 = vmatpush3.bf16.msra.mxu0 %v5438_v51  ;;  %v3604_v3 = vld [vmem:[#allocation4 + $0x110] sm:$0xff] }
 0x4bc   : > { %3036 = vrot.lane.b32.xlu0 %v7682_v29, %s5520_s29  ;;  %5443 = vmatprep.subr.bf16.mxu0 %v5442_v0 }
 0x4bd   : > { %v3652_v2 = vpop.permute.xlu1 %3651 }
 0x4be   : > { %v3459_v17 = vpop.permute.xlu0 %3458 }
 0x4bf   : > { %3553 = vst.msk [vmem:[#allocation5 + $0x20] sm:$0xff] %vm2909_vm14, %v3459_v17  ;;  %v4063_v32 = vld [vmem:[#allocation5 + $0xf0] sm:$0xff]  ;;  %2845 = vrot.lane.b32.xlu1 %v7350_v10, %s5518_s14  ;;  %5445 = vmatpush3.bf16.msra.mxu0 %v5442_v0 }
 0x4c0   : > { %3871 = vrot.lane.b32.xlu0 %v7384_v57, %s5521_s9  ;;  %3746 = vst.msk [vmem:[#allocation5 + $0x20] sm:$0xff] %vm3102_vm15, %v3652_v2 }
 0x4c1   : > { %v3009_v53 = vpop.permute.xlu1 %3008 }
 0x4c2   : > { %v3479_v29 = vpop.permute.xlu0 %3478  ;;  %v4064_v24 = vld [vmem:[#allocation5 + $0xf8] sm:$0xff]  ;;  %3104 = vst.msk [vmem:[#allocation5 + $0x18] sm:$0xff] %vm3102_vm15, %v3009_v53 }
 0x4c3   : > { %3563 = vst.msk [vmem:[#allocation5 + $0x110] sm:$0xff] %vm2909_vm14, %v3479_v29  ;;  %4382 = vmatprep.mubr.f32.mxu1 %v4064_v24  ;;  %3038 = vrot.lane.b32.xlu1 %v7721_v54, %s5520_s29  ;;  %v3606_v53 = vld [vmem:[#allocation4 + $0x128] sm:$0xff] }
 0x4c4   : > { %3488 = vrot.lane.b32.xlu0 %v7391_v19, %s5518_s14  ;;  %4383 = vmatmul.mubr.f32.gmra.mrb[8].mxu1 %v4063_v32 }
 0x4c5   : > { %v3844_v20 = vpop.permute.xlu1 %3843 }
 0x4c6   : > { %v2836_v38 = vpop.permute.xlu0 %2835  ;;  %3938 = vst.msk [vmem:[#allocation5 + $0x20] sm:$0xff] %vm3295_vm0, %v3844_v20 }
 0x4c7   : > { %2921 = vst.msk [vmem:[#allocation5 + $0x108] sm:$0xff] %vm2909_vm14, %v2836_v38  ;;  %3231 = vrot.lane.b32.xlu1 %v7735_v40, %s5521_s9 }
 0x4c8   : > { %3681 = vrot.lane.b32.xlu0 %v3601_v47, %s5520_s29 }
 0x4c9   : > { %v3202_v30 = vpop.permute.xlu1 %3201 }
 0x4ca   : > { %v3672_v37 = vpop.permute.xlu0 %3671  ;;  %3297 = vst.msk [vmem:[#allocation5 + $0x18] sm:$0xff] %vm3295_vm0, %v3202_v30 }
 0x4cb   : > { %3756 = vst.msk [vmem:[#allocation5 + $0x110] sm:$0xff] %vm3102_vm15, %v3672_v37  ;;  %2847 = vrot.lane.b32.xlu1 %v7371_v50, %s5518_s14 }
 0x4cc   : > { %3873 = vrot.lane.b32.xlu0 %v7393_v48, %s5521_s9 }
 0x4cd   : > { %v3222_v49 = vpop.permute.xlu1 %3221  ;;  %v4037_v8 = vld [vmem:[#allocation5 + $0x20] sm:$0xff] }
 0x4ce   : > { %v3029_v10 = vpop.permute.xlu0 %3028  ;;  %4337 = vmatprep.mubr.f32.mxu0 %v4037_v8  ;;  %v3607_v8 = vld [vmem:[#allocation4 + $0x138] sm:$0xff] }
 0x4cf   : > { %3114 = vst.msk [vmem:[#allocation5 + $0x108] sm:$0xff] %vm3102_vm15, %v3029_v10  ;;  %3040 = vrot.lane.b32.xlu1 %v7382_v21, %s5520_s29 }
 0x4d0   : > { %3490 = vrot.lane.b32.xlu0 %v7399_v58, %s5518_s14  ;;  %3307 = vst.msk [vmem:[#allocation5 + $0x108] sm:$0xff] %vm3295_vm0, %v3222_v49 }
 0x4d1   : > { %v2818_v44 = vpop.permute.xlu1 %2817  ;;  %v4036_v11 = vld [vmem:[#allocation5 + $0x18] sm:$0xff] }
 0x4d2   : > { %v3864_v54 = vpop.permute.xlu0 %3863  ;;  %2912 = vst.msk [vmem:[#allocation5 + $0x30] sm:$0xff] %vm2909_vm14, %v2818_v44  ;;  %4338 = vmatmul.mubr.f32.gmra.mrb[34].mxu0 %v4036_v11 }
 0x4d3   : > { %3948 = vst.msk [vmem:[#allocation5 + $0x110] sm:$0xff] %vm3295_vm0, %v3864_v54  ;;  %3233 = vrot.lane.b32.xlu1 %v7779_v31, %s5521_s9 }
 0x4d4   : > { %3683 = vrot.lane.b32.xlu0 %v3602_v4, %s5520_s29 }
 0x4d5   : > { %v3654_v12 = vpop.permute.xlu1 %3653 }
 0x4d6   : > { %v3461_v40 = vpop.permute.xlu0 %3460 }
 0x4d7   : > { %3554 = vst.msk [vmem:[#allocation5 + $0x38] sm:$0xff] %vm2909_vm14, %v3461_v40  ;;  %v4066_v21 = vld [vmem:[#allocation5 + $0x108] sm:$0xff]  ;;  %2849 = vrot.lane.b32.xlu1 %v7373_v5, %s5518_s14 }
 0x4d8   : > { %3875 = vrot.lane.b32.xlu0 %v7401_v35, %s5521_s9  ;;  %3747 = vst.msk [vmem:[#allocation5 + $0x38] sm:$0xff] %vm3102_vm15, %v3654_v12 }
 0x4d9   : > { %v3011_v41 = vpop.permute.xlu1 %3010 }
 0x4da   : > { %v3481_v50 = vpop.permute.xlu0 %3480  ;;  %v4067_v42 = vld [vmem:[#allocation5 + $0x110] sm:$0xff]  ;;  %3105 = vst.msk [vmem:[#allocation5 + $0x30] sm:$0xff] %vm3102_vm15, %v3011_v41 }
 0x4db   : > { %3564 = vst.msk [vmem:[#allocation5 + $0x128] sm:$0xff] %vm2909_vm14, %v3481_v50  ;;  %4387 = vmatprep.mubr.f32.mxu1 %v4067_v42  ;;  %3042 = vrot.lane.b32.xlu1 %v7391_v19, %s5520_s29  ;;  %v3608_v42 = vld [vmem:[#allocation4 + $0x140] sm:$0xff] }
 0x4dc   : > { %3492 = vrot.lane.b32.xlu0 %v7408_v28, %s5518_s14  ;;  %4388 = vmatmul.mubr.f32.gmra.mrb[10].mxu1 %v4066_v21 }
 0x4dd   : > { %v3846_v51 = vpop.permute.xlu1 %3845 }
 0x4de   : > { %v2838_v61 = vpop.permute.xlu0 %2837  ;;  %3939 = vst.msk [vmem:[#allocation5 + $0x38] sm:$0xff] %vm3295_vm0, %v3846_v51 }
 0x4df   : > { %2922 = vst.msk [vmem:[#allocation5 + $0x120] sm:$0xff] %vm2909_vm14, %v2838_v61  ;;  %3235 = vrot.lane.b32.xlu1 %v3601_v47, %s5521_s9 }
 0x4e0   : > { %3685 = vrot.lane.b32.xlu0 %v3603_v34, %s5520_s29 }
 0x4e1   : > { %v3204_v6 = vpop.permute.xlu1 %3203 }
 0x4e2   : > { %v3674_v45 = vpop.permute.xlu0 %3673  ;;  %3298 = vst.msk [vmem:[#allocation5 + $0x30] sm:$0xff] %vm3295_vm0, %v3204_v6 }
 0x4e3   : > { %3757 = vst.msk [vmem:[#allocation5 + $0x128] sm:$0xff] %vm3102_vm15, %v3674_v45  ;;  %2851 = vrot.lane.b32.xlu1 %v7384_v57, %s5518_s14 }
 0x4e4   : > { %3877 = vrot.lane.b32.xlu0 %v7410_v25, %s5521_s9 }
 0x4e5   : > { %v3224_v46 = vpop.permute.xlu1 %3223  ;;  %v4040_v31 = vld [vmem:[#allocation5 + $0x38] sm:$0xff] }
 0x4e6   : > { %v3031_v5 = vpop.permute.xlu0 %3030  ;;  %4342 = vmatprep.mubr.f32.mxu0 %v4040_v31 }
 0x4e7   : > { %3115 = vst.msk [vmem:[#allocation5 + $0x120] sm:$0xff] %vm3102_vm15, %v3031_v5  ;;  %3044 = vrot.lane.b32.xlu1 %v7399_v58, %s5520_s29 }
 0x4e8   : > { %3494 = vrot.lane.b32.xlu0 %v7418_v1, %s5518_s14  ;;  %3308 = vst.msk [vmem:[#allocation5 + $0x120] sm:$0xff] %vm3295_vm0, %v3224_v46 }
 0x4e9   : > { %v2820_v52 = vpop.permute.xlu1 %2819  ;;  %v4039_v59 = vld [vmem:[#allocation5 + $0x30] sm:$0xff] }
 0x4ea   : > { %v3866_v19 = vpop.permute.xlu0 %3865  ;;  %2913 = vst.msk [vmem:[#allocation5 + $0x48] sm:$0xff] %vm2909_vm14, %v2820_v52  ;;  %4343 = vmatmul.mubr.f32.gmra.mrb[36].mxu0 %v4039_v59 }
 0x4eb   : > { %3949 = vst.msk [vmem:[#allocation5 + $0x128] sm:$0xff] %vm3295_vm0, %v3866_v19  ;;  %3237 = vrot.lane.b32.xlu1 %v3602_v4, %s5521_s9 }
 0x4ec   : > { %3687 = vrot.lane.b32.xlu0 %v3604_v3, %s5520_s29 }
 0x4ed   : > { %v3656_v17 = vpop.permute.xlu1 %3655 }
 0x4ee   : > { %v3463_v27 = vpop.permute.xlu0 %3462 }
 0x4ef   : > { %3555 = vst.msk [vmem:[#allocation5 + $0x50] sm:$0xff] %vm2909_vm14, %v3463_v27  ;;  %v4069_v58 = vld [vmem:[#allocation5 + $0x120] sm:$0xff]  ;;  %2853 = vrot.lane.b32.xlu1 %v7393_v48, %s5518_s14 }
 0x4f0   : > { %3879 = vrot.lane.b32.xlu0 %v7420_v26, %s5521_s9  ;;  %3748 = vst.msk [vmem:[#allocation5 + $0x50] sm:$0xff] %vm3102_vm15, %v3656_v17 }
 0x4f1   : > { %v3013_v33 = vpop.permute.xlu1 %3012 }
 0x4f2   : > { %v3483_v57 = vpop.permute.xlu0 %3482  ;;  %v4070_v63 = vld [vmem:[#allocation5 + $0x128] sm:$0xff]  ;;  %3106 = vst.msk [vmem:[#allocation5 + $0x48] sm:$0xff] %vm3102_vm15, %v3013_v33 }
 0x4f3   : > { %3565 = vst.msk [vmem:[#allocation5 + $0x140] sm:$0xff] %vm2909_vm14, %v3483_v57  ;;  %4392 = vmatprep.mubr.f32.mxu1 %v4070_v63  ;;  %3046 = vrot.lane.b32.xlu1 %v7408_v28, %s5520_s29  ;;  %v4038_v63 = vld [vmem:[#allocation5 + $0x28] sm:$0xff] }
 0x4f4   : > { %3496 = vrot.lane.b32.xlu0 %v7428_v55, %s5518_s14  ;;  %4393 = vmatmul.mubr.f32.gmra.mrb[12].mxu1 %v4069_v58  ;;  %v8700_v58 = vld [vmem:[#allocation7_spill] sm:$0xff] }
 0x4f5   : > { %v3848_v24 = vpop.permute.xlu1 %3847 }
 0x4f6   : > { %v2840_v0 = vpop.permute.xlu0 %2839  ;;  %3940 = vst.msk [vmem:[#allocation5 + $0x50] sm:$0xff] %vm3295_vm0, %v3848_v24  ;;  %v8701_v24 = vld [vmem:[#allocation8_spill] sm:$0xff] }
 0x4f7   : > { %2923 = vst.msk [vmem:[#allocation5 + $0x138] sm:$0xff] %vm2909_vm14, %v2840_v0  ;;  %3239 = vrot.lane.b32.xlu1 %v3603_v34, %s5521_s9  ;;  %v4041_v0 = vld [vmem:[#allocation5 + $0x40] sm:$0xff] }
 0x4f8   : > { %3689 = vrot.lane.b32.xlu0 %v3605_v60, %s5520_s29 }
 0x4f9   : > { %v3206_v2 = vpop.permute.xlu1 %3205 }
 0x4fa   : > { %v3676_v29 = vpop.permute.xlu0 %3675  ;;  %3299 = vst.msk [vmem:[#allocation5 + $0x48] sm:$0xff] %vm3295_vm0, %v3206_v2 }
 0x4fb   : > { %3758 = vst.msk [vmem:[#allocation5 + $0x140] sm:$0xff] %vm3102_vm15, %v3676_v29  ;;  %2855 = vrot.lane.b32.xlu1 %v7401_v35, %s5518_s14  ;;  %v4044_v29 = vld [vmem:[#allocation5 + $0x58] sm:$0xff] }
 0x4fc   : > { %3881 = vrot.lane.b32.xlu0 %v7437_v23, %s5521_s9 }
 0x4fd   : > { %v3226_v32 = vpop.permute.xlu1 %3225  ;;  %v4043_v38 = vld [vmem:[#allocation5 + $0x50] sm:$0xff] }
 0x4fe   : > { %v3033_v48 = vpop.permute.xlu0 %3032  ;;  %4347 = vmatprep.mubr.f32.mxu0 %v4043_v38  ;;  %v4053_v38 = vld [vmem:[#allocation5 + $0xa0] sm:$0xff] }
 0x4ff   : > { %3116 = vst.msk [vmem:[#allocation5 + $0x138] sm:$0xff] %vm3102_vm15, %v3033_v48  ;;  %3048 = vrot.lane.b32.xlu1 %v7418_v1, %s5520_s29  ;;  %v4047_v48 = vld [vmem:[#allocation5 + $0x70] sm:$0xff] }
 0x500   : > { %3498 = vrot.lane.b32.xlu0 %v7439_v13, %s5518_s14  ;;  %3309 = vst.msk [vmem:[#allocation5 + $0x138] sm:$0xff] %vm3295_vm0, %v3226_v32  ;;  %v8702_v32 = vld [vmem:[#allocation9_spill] sm:$0xff] }
 0x501   : > { %v2822_v37 = vpop.permute.xlu1 %2821  ;;  %v4042_v20 = vld [vmem:[#allocation5 + $0x48] sm:$0xff] }
 0x502   : > { %v3868_v28 = vpop.permute.xlu0 %3867  ;;  %2914 = vst.msk [vmem:[#allocation5 + $0x60] sm:$0xff] %vm2909_vm14, %v2822_v37  ;;  %4348 = vmatmul.mubr.f32.gmra.mrb[38].mxu0 %v4042_v20  ;;  %v4056_v37 = vld [vmem:[#allocation5 + $0xb8] sm:$0xff] }
 0x503   : > { %3950 = vst.msk [vmem:[#allocation5 + $0x140] sm:$0xff] %vm3295_vm0, %v3868_v28  ;;  %3241 = vrot.lane.b32.xlu1 %v3604_v3, %s5521_s9  ;;  %v4050_v28 = vld [vmem:[#allocation5 + $0x88] sm:$0xff] }
 0x504   : > { %3691 = vrot.lane.b32.xlu0 %v3606_v53, %s5520_s29 }
 0x505   : > { %v3658_v30 = vpop.permute.xlu1 %3657 }
 0x506   : > { %v3465_v47 = vpop.permute.xlu0 %3464 }
 0x507   : > { %3556 = vst.msk [vmem:[#allocation5 + $0x68] sm:$0xff] %vm2909_vm14, %v3465_v47  ;;  %v4072_v1 = vld [vmem:[#allocation5 + $0x138] sm:$0xff]  ;;  %2857 = vrot.lane.b32.xlu1 %v7410_v25, %s5518_s14 }
 0x508   : > { %3883 = vrot.lane.b32.xlu0 %v7443_v16, %s5521_s9  ;;  %3749 = vst.msk [vmem:[#allocation5 + $0x68] sm:$0xff] %vm3102_vm15, %v3658_v30 }
 0x509   : > { %v3015_v49 = vpop.permute.xlu1 %3014 }
 0x50a   : > { %v3485_v35 = vpop.permute.xlu0 %3484  ;;  %v4073_v10 = vld [vmem:[#allocation5 + $0x140] sm:$0xff]  ;;  %3107 = vst.msk [vmem:[#allocation5 + $0x60] sm:$0xff] %vm3102_vm15, %v3015_v49 }
 0x50b   : > { %3566 = vst.msk [vmem:[#allocation5 + $0x158] sm:$0xff] %vm2909_vm14, %v3485_v35  ;;  %4397 = vmatprep.mubr.f32.mxu1 %v4073_v10  ;;  %3050 = vrot.lane.b32.xlu1 %v7428_v55, %s5520_s29  ;;  %v8703_v35 = vld [vmem:[#allocation10_spill] sm:$0xff] }
 0x50c   : > { %3500 = vrot.lane.b32.xlu0 %v7453_v22, %s5518_s14  ;;  %4398 = vmatmul.mubr.f32.gmra.mrb[14].mxu1 %v4072_v1  ;;  %v4062_v1 = vld [vmem:[#allocation5 + $0xe8] sm:$0xff]  ;;  %v4065_v49 = vld [vmem:[#allocation5 + $0x100] sm:$0xff] }
 0x50d   : > { %v3850_v40 = vpop.permute.xlu1 %3849 }
 0x50e   : > { %v2842_v54 = vpop.permute.xlu0 %2841  ;;  %3941 = vst.msk [vmem:[#allocation5 + $0x68] sm:$0xff] %vm3295_vm0, %v3850_v40  ;;  %v8705_v40 = vld [vmem:[#allocation12_spill] sm:$0xff] }
 0x50f   : > { %2924 = vst.msk [vmem:[#allocation5 + $0x150] sm:$0xff] %vm2909_vm14, %v2842_v54  ;;  %3243 = vrot.lane.b32.xlu1 %v3605_v60, %s5521_s9  ;;  %v8704_v54 = vld [vmem:[#allocation11_spill] sm:$0xff] }
 0x510   : > { %3693 = vrot.lane.b32.xlu0 %v3607_v8, %s5520_s29 }
 0x511   : > { %v3208_v44 = vpop.permute.xlu1 %3207 }
 0x512   : > { %v3678_v4 = vpop.permute.xlu0 %3677  ;;  %3300 = vst.msk [vmem:[#allocation5 + $0x60] sm:$0xff] %vm3295_vm0, %v3208_v44 }
 0x513   : > { %3759 = vst.msk [vmem:[#allocation5 + $0x158] sm:$0xff] %vm3102_vm15, %v3678_v4  ;;  %2859 = vrot.lane.b32.xlu1 %v7420_v26, %s5518_s14  ;;  %v4068_v4 = vld [vmem:[#allocation5 + $0x118] sm:$0xff] }
 0x514   : > { %3885 = vrot.lane.b32.xlu0 %v7460_v56, %s5521_s9 }
 0x515   : > { %v3228_v11 = vpop.permute.xlu1 %3227  ;;  %v4046_v50 = vld [vmem:[#allocation5 + $0x68] sm:$0xff] }
 0x516   : > { %v3035_v25 = vpop.permute.xlu0 %3034  ;;  %4352 = vmatprep.mubr.f32.mxu0 %v4046_v50 }
 0x517   : > { %3117 = vst.msk [vmem:[#allocation5 + $0x150] sm:$0xff] %vm3102_vm15, %v3035_v25  ;;  %3052 = vrot.lane.b32.xlu1 %v7439_v13, %s5520_s29  ;;  %v4071_v25 = vld [vmem:[#allocation5 + $0x130] sm:$0xff] }
 0x518   : > { %3502 = vrot.lane.b32.xlu0 %v7462_v9, %s5518_s14  ;;  %3310 = vst.msk [vmem:[#allocation5 + $0x150] sm:$0xff] %vm3295_vm0, %v3228_v11  ;;  %v4074_v11 = vld [vmem:[#allocation5 + $0x148] sm:$0xff] }
 0x519   : > { %v2824_v21 = vpop.permute.xlu1 %2823  ;;  %v4045_v61 = vld [vmem:[#allocation5 + $0x60] sm:$0xff] }
 0x51a   : > { %v3870_v55 = vpop.permute.xlu0 %3869  ;;  %2915 = vst.msk [vmem:[#allocation5 + $0x78] sm:$0xff] %vm2909_vm14, %v2824_v21  ;;  %4353 = vmatmul.mubr.f32.gmra.mrb[40].mxu0 %v4045_v61  ;;  %v4080_v61 = vld [vmem:[#allocation5 + $0x178] sm:$0xff] }
 0x51b   : > { %3951 = vst.msk [vmem:[#allocation5 + $0x158] sm:$0xff] %vm3295_vm0, %v3870_v55  ;;  %3245 = vrot.lane.b32.xlu1 %v3606_v53, %s5521_s9 }
 0x51c   : > { %3695 = vrot.lane.b32.xlu0 %v3608_v42, %s5520_s29 }
 0x51d   : > { %v3660_v34 = vpop.permute.xlu1 %3659 }
 0x51e   : > { %v3467_v12 = vpop.permute.xlu0 %3466 }
 0x51f   : > { %3557 = vst.msk [vmem:[#allocation5 + $0x80] sm:$0xff] %vm2909_vm14, %v3467_v12  ;;  %v4075_v13 = vld [vmem:[#allocation5 + $0x150] sm:$0xff]  ;;  %2861 = vrot.lane.b32.xlu1 %v7437_v23, %s5518_s14 }
 0x520   : > { %3887 = vrot.lane.b32.xlu0 %v7466_v18, %s5521_s9  ;;  %3750 = vst.msk [vmem:[#allocation5 + $0x80] sm:$0xff] %vm3102_vm15, %v3660_v34 }
 0x521   : > { %v3017_v51 = vpop.permute.xlu1 %3016 }
 0x522   : > { %v3487_v26 = vpop.permute.xlu0 %3486  ;;  %v4076_v41 = vld [vmem:[#allocation5 + $0x158] sm:$0xff]  ;;  %3108 = vst.msk [vmem:[#allocation5 + $0x78] sm:$0xff] %vm3102_vm15, %v3017_v51 }
 0x523   : > { %3567 = vst.msk [vmem:[#allocation5 + $0x170] sm:$0xff] %vm2909_vm14, %v3487_v26  ;;  %4402 = vmatprep.mubr.f32.mxu1 %v4076_v41  ;;  %3054 = vrot.lane.b32.xlu1 %v7453_v22, %s5520_s29  ;;  %v8026_v26 = vld [vmem:[#allocation4 + $0x180] sm:$0xff] }
 0x524   : > { %3504 = vrot.lane.b32.xlu0 %v7474_v14, %s5518_s14  ;;  %4403 = vmatmul.mubr.f32.gmra.mrb[16].mxu1 %v4075_v13  ;;  %v4083_v41 = vld [vmem:[#allocation5 + $0x190] sm:$0xff] }
 0x525   : > { %v3852_v6 = vpop.permute.xlu1 %3851 }
 0x526   : > { %v2844_v45 = vpop.permute.xlu0 %2843  ;;  %3942 = vst.msk [vmem:[#allocation5 + $0x80] sm:$0xff] %vm3295_vm0, %v3852_v6  ;;  %v4089_v6 = vld [vmem:[#allocation5 + $0x1c0] sm:$0xff] }
 0x527   : > { %2925 = vst.msk [vmem:[#allocation5 + $0x168] sm:$0xff] %vm2909_vm14, %v2844_v45  ;;  %3247 = vrot.lane.b32.xlu1 %v3607_v8, %s5521_s9  ;;  %v4086_v45 = vld [vmem:[#allocation5 + $0x1a8] sm:$0xff] }
 0x528   : > { %3697 = vrot.lane.b32.xlu0 %v7476_v36, %s5520_s29 }
 0x529   : > { %v3210_v19 = vpop.permute.xlu1 %3209 }
 0x52a   : > { %v3680_v5 = vpop.permute.xlu0 %3679  ;;  %3301 = vst.msk [vmem:[#allocation5 + $0x78] sm:$0xff] %vm3295_vm0, %v3210_v19 }
 0x52b   : > { %3760 = vst.msk [vmem:[#allocation5 + $0x170] sm:$0xff] %vm3102_vm15, %v3680_v5  ;;  %2863 = vrot.lane.b32.xlu1 %v7443_v16, %s5518_s14  ;;  %v4035_v16 = vld [vmem:[#allocation5 + $0x10] sm:$0xff]  ;;  %v8707_v5 = vld [vmem:[#allocation6_spill] sm:$0xff] }
 0x52c   : > { %3889 = vrot.lane.b32.xlu0 %v7483_v39, %s5521_s9 }
 0x52d   : > { %v3230_v46 = vpop.permute.xlu1 %3229  ;;  %v4049_v31 = vld [vmem:[#allocation5 + $0x80] sm:$0xff] }
 0x52e   : > { %v3037_v23 = vpop.permute.xlu0 %3036  ;;  %4357 = vmatprep.mubr.f32.mxu0 %v4049_v31 }
 0x52f   : > { %3118 = vst.msk [vmem:[#allocation5 + $0x168] sm:$0xff] %vm3102_vm15, %v3037_v23  ;;  %3056 = vrot.lane.b32.xlu1 %v7462_v9, %s5520_s29 }
 0x530   : > { %3506 = vrot.lane.b32.xlu0 %v7485_v62, %s5518_s14  ;;  %3311 = vst.msk [vmem:[#allocation5 + $0x168] sm:$0xff] %vm3295_vm0, %v3230_v46  ;;  %v4092_v46 = vld [vmem:[#allocation5 + $0x1d8] sm:$0xff] }
 0x531   : > { %v2846_v27 = vpop.permute.xlu1 %2845  ;;  %v4048_v52 = vld [vmem:[#allocation5 + $0x78] sm:$0xff] }
 0x532   : > { %v3872_v22 = vpop.permute.xlu0 %3871  ;;  %2926 = vst.msk [vmem:[#allocation5 + $0x180] sm:$0xff] %vm2909_vm14, %v2846_v27  ;;  %4358 = vmatmul.mubr.f32.gmra.mrb[42].mxu0 %v4048_v52  ;;  %v4095_v27 = vld [vmem:[#allocation5 + $0x1f0] sm:$0xff] }
 0x533   : > { %3952 = vst.msk [vmem:[#allocation5 + $0x170] sm:$0xff] %vm3295_vm0, %v3872_v22  ;;  %3249 = vrot.lane.b32.xlu1 %v3608_v42, %s5521_s9  ;;  %5334 = vmatprep.mubr.msk.f32.mxu0 %vm2325_vm12, %v4035_v16  ;;  %v8706_v42 = vld [vmem:[#allocation13_spill] sm:$0xff] }
 0x534   : > { %3699 = vrot.lane.b32.xlu0 %v7487_v43, %s5520_s29 }
 0x535   : > { %v3039_v9 = vpop.permute.xlu1 %3038 }
 0x536   : > { %v3489_v3 = vpop.permute.xlu0 %3488  ;;  %3119 = vst.msk [vmem:[#allocation5 + $0x180] sm:$0xff] %vm3102_vm15, %v3039_v9  ;;  %5335 = vmatmul.mubr.msk.f32.vlgmr.msra.gmra.mrb[44].mxu0 %vm2325_vm12, %v4038_v63  ;;  %v4101_v9 = vld [vmem:[#allocation5 + $0x220] sm:$0xff] }
 0x537   : > { %3568 = vst.msk [vmem:[#allocation5 + $0x188] sm:$0xff] %vm2909_vm14, %v3489_v3  ;;  %v4078_v17 = vld [vmem:[#allocation5 + $0x168] sm:$0xff]  ;;  %2865 = vrot.lane.b32.xlu1 %v7460_v56, %s5518_s14  ;;  %5337 = vmatprep.mubr.msk.f32.mxu0 %vm2325_vm12, %v4041_v0  ;;  %v8708_v3 = vld [vmem:[#allocation14_spill] sm:$0xff] }
 0x538   : > { %3891 = vrot.lane.b32.xlu0 %v7495_v7, %s5521_s9 }
 0x539   : > { %v3232_v60 = vpop.permute.xlu1 %3231 }
 0x53a   : > { %v3682_v59 = vpop.permute.xlu0 %3681  ;;  %v4079_v57 = vld [vmem:[#allocation5 + $0x170] sm:$0xff]  ;;  %3312 = vst.msk [vmem:[#allocation5 + $0x180] sm:$0xff] %vm3295_vm0, %v3232_v60  ;;  %5338 = vmatmul.mubr.msk.f32.gmra.mrb[46].mxu0 %vm2325_vm12, %v4044_v29 }
 0x53b   : > { %3761 = vst.msk [vmem:[#allocation5 + $0x188] sm:$0xff] %vm3102_vm15, %v3682_v59  ;;  %4407 = vmatprep.mubr.f32.mxu1 %v4079_v57  ;;  %3058 = vrot.lane.b32.xlu1 %v7474_v14, %s5520_s29  ;;  %v4098_v59 = vld [vmem:[#allocation5 + $0x208] sm:$0xff]  ;;  %v8054_v57 = vld [vmem:[#allocation4 + $0x188] sm:$0xff]  ;;  %v4107_v60 = vld [vmem:[#allocation5 + $0x250] sm:$0xff] }
 0x53c   : > { %3508 = vrot.lane.b32.xlu0 %v8700_v58, %s5518_s14  ;;  %4408 = vmatmul.mubr.f32.gmra.mrb[18].mxu1 %v4078_v17 }
 0x53d   : > { %5340 = vmatprep.mubr.msk.f32.mxu0 %vm2325_vm12, %v4047_v48  ;;  %v2848_v2 = vpop.permute.xlu1 %2847 }
 0x53e   : > { %v3874_v33 = vpop.permute.xlu0 %3873  ;;  %2927 = vst.msk [vmem:[#allocation5 + $0x198] sm:$0xff] %vm2909_vm14, %v2848_v2  ;;  %5341 = vmatmul.mubr.msk.f32.gmra.mrb[48].mxu0 %vm2325_vm12, %v4050_v28  ;;  %v8710_v28 = vld [vmem:[#allocation16_spill] sm:$0xff] }
 0x53f   : > { %3953 = vst.msk [vmem:[#allocation5 + $0x188] sm:$0xff] %vm3295_vm0, %v3874_v33  ;;  %3251 = vrot.lane.b32.xlu1 %v7476_v36, %s5521_s9  ;;  %5343 = vmatprep.mubr.msk.f32.mxu0 %vm2325_vm12, %v4053_v38  ;;  %v4059_v36 = vld [vmem:[#allocation5 + $0xd0] sm:$0xff]  ;;  %v8709_v33 = vld [vmem:[#allocation15_spill] sm:$0xff]  ;;  %v4113_v38 = vld [vmem:[#allocation5 + $0x280] sm:$0xff] }
 0x540   : > { %3701 = vrot.lane.b32.xlu0 %v8701_v24, %s5520_s29 }
 0x541   : > { %v3041_v47 = vpop.permute.xlu1 %3040  ;;  %v4081_v20 = vld [vmem:[#allocation5 + $0x180] sm:$0xff] }
 0x542   : > { %v3491_v56 = vpop.permute.xlu0 %3490  ;;  %3120 = vst.msk [vmem:[#allocation5 + $0x198] sm:$0xff] %vm3102_vm15, %v3041_v47  ;;  %5344 = vmatmul.mubr.msk.f32.gmra.mrb[50].mxu0 %vm2325_vm12, %v4056_v37  ;;  %v4116_v37 = vld [vmem:[#allocation5 + $0x298] sm:$0xff] }
 0x543   : > { %3569 = vst.msk [vmem:[#allocation5 + $0x1a0] sm:$0xff] %vm2909_vm14, %v3491_v56  ;;  %2867 = vrot.lane.b32.xlu1 %v7466_v18, %s5518_s14  ;;  %5346 = vmatprep.mubr.msk.f32.mxu0 %vm2325_vm12, %v4059_v36  ;;  %v4110_v56 = vld [vmem:[#allocation5 + $0x268] sm:$0xff]  ;;  %v4000_v36 = vld [vmem:[#allocation4 + $0x1a2] sm:$0xff] }
 0x544   : > { %3893 = vrot.lane.b32.xlu0 %v8702_v32, %s5521_s9  ;;  %4032 = vst.msk [vmem:[#allocation5 + $0x2f8] sm:$0xff] %vm2325_vm12, %v4000_v36 }
 0x545   : > { %v3234_v30 = vpop.permute.xlu1 %3233 }
 0x546   : > { %v3684_v14 = vpop.permute.xlu0 %3683  ;;  %v4082_v53 = vld [vmem:[#allocation5 + $0x188] sm:$0xff]  ;;  %3313 = vst.msk [vmem:[#allocation5 + $0x198] sm:$0xff] %vm3295_vm0, %v3234_v30  ;;  %5347 = vmatmul.mubr.msk.f32.gmra.mrb[52].mxu0 %vm2325_vm12, %v4062_v1 }
 0x547   : > { %3762 = vst.msk [vmem:[#allocation5 + $0x1a0] sm:$0xff] %vm3102_vm15, %v3684_v14  ;;  %4412 = vmatprep.mubr.f32.mxu1 %v4082_v53  ;;  %3060 = vrot.lane.b32.xlu1 %v7485_v62, %s5520_s29  ;;  %v3615_v14 = vld [vmem:[#allocation4 + $0x198] sm:$0xff] }
 0x548   : > { %3510 = vrot.lane.b32.xlu0 %v8703_v35, %s5518_s14  ;;  %4413 = vmatmul.mubr.f32.gmra.mrb[20].mxu1 %v4081_v20  ;;  %v4119_v20 = vld [vmem:[#allocation5 + $0x2b0] sm:$0xff] }
 0x549   : > { %5349 = vmatprep.mubr.msk.f32.mxu0 %vm2325_vm12, %v4065_v49  ;;  %v2850_v8 = vpop.permute.xlu1 %2849 }
 0x54a   : > { %v3876_v10 = vpop.permute.xlu0 %3875  ;;  %2928 = vst.msk [vmem:[#allocation5 + $0x1b0] sm:$0xff] %vm2909_vm14, %v2850_v8  ;;  %5350 = vmatmul.mubr.msk.f32.gmra.mrb[54].mxu0 %vm2325_vm12, %v4068_v4 }
 0x54b   : > { %3954 = vst.msk [vmem:[#allocation5 + $0x1a0] sm:$0xff] %vm3295_vm0, %v3876_v10  ;;  %3253 = vrot.lane.b32.xlu1 %v7487_v43, %s5521_s9  ;;  %5352 = vmatprep.mubr.msk.f32.mxu0 %vm2325_vm12, %v4071_v25  ;;  %v4077_v43 = vld [vmem:[#allocation5 + $0x160] sm:$0xff] }
 0x54c   : > { %3703 = vrot.lane.b32.xlu0 %v8704_v54, %s5520_s29 }
 0x54d   : > { %v3043_v55 = vpop.permute.xlu1 %3042  ;;  %v4084_v50 = vld [vmem:[#allocation5 + $0x198] sm:$0xff] }
 0x54e   : > { %v3493_v18 = vpop.permute.xlu0 %3492  ;;  %3121 = vst.msk [vmem:[#allocation5 + $0x1b0] sm:$0xff] %vm3102_vm15, %v3043_v55  ;;  %5353 = vmatmul.mubr.msk.f32.gmra.mrb[56].mxu0 %vm2325_vm12, %v4074_v11  ;;  %v3616_v55 = vld [vmem:[#allocation4 + $0x1a0] sm:$0xff] }
 0x54f   : > { %3570 = vst.msk [vmem:[#allocation5 + $0x1b8] sm:$0xff] %vm2909_vm14, %v3493_v18  ;;  %2869 = vrot.lane.b32.xlu1 %v7483_v39, %s5518_s14  ;;  %5355 = vmatprep.mubr.msk.f32.mxu0 %vm2325_vm12, %v4077_v43 }
 0x550   : > { %3895 = vrot.lane.b32.xlu0 %v8705_v40, %s5521_s9 }
 0x551   : > { %v3236_v21 = vpop.permute.xlu1 %3235 }
 0x552   : > { %v3686_v62 = vpop.permute.xlu0 %3685  ;;  %v4085_v44 = vld [vmem:[#allocation5 + $0x1a0] sm:$0xff]  ;;  %3314 = vst.msk [vmem:[#allocation5 + $0x1b0] sm:$0xff] %vm3295_vm0, %v3236_v21  ;;  %5356 = vmatmul.mubr.msk.f32.gmra.mrb[58].mxu0 %vm2325_vm12, %v4080_v61 }
 0x553   : > { %3763 = vst.msk [vmem:[#allocation5 + $0x1b8] sm:$0xff] %vm3102_vm15, %v3686_v62  ;;  %4417 = vmatprep.mubr.f32.mxu1 %v4085_v44  ;;  %3062 = vrot.lane.b32.xlu1 %v8700_v58, %s5520_s29  ;;  %v8036_v13 = vpop.f32.mrb[0].mxu1  ;;  %v4104_v58 = vld [vmem:[#allocation5 + $0x238] sm:$0xff] }
 0x554   : > { %3512 = vrot.lane.b32.xlu0 %v8706_v42, %s5518_s14  ;;  %4418 = vmatmul.mubr.f32.gmra.mrb[22].mxu1 %v4084_v50  ;;  %v4366_v51 = vpop.f32.mrb[1].mxu1  ;;  %v4128_v44 = vld [vmem:[#allocation5 + $0x2f8] sm:$0xff] }
 0x555   : > { %5358 = vmatprep.mubr.msk.f32.mxu0 %vm2325_vm12, %v4083_v41  ;;  %v2852_v34 = vpop.permute.xlu1 %2851 }
 0x556   : > { %v3878_v12 = vpop.permute.xlu0 %3877  ;;  %2929 = vst.msk [vmem:[#allocation5 + $0x1c8] sm:$0xff] %vm2909_vm14, %v2852_v34  ;;  %5359 = vmatmul.mubr.msk.f32.gmra.mrb[60].mxu0 %vm2325_vm12, %v4086_v45 }
 0x557   : > { %3955 = vst.msk [vmem:[#allocation5 + $0x1b8] sm:$0xff] %vm3295_vm0, %v3878_v12  ;;  %3255 = vrot.lane.b32.xlu1 %v8701_v24, %s5521_s9  ;;  %5361 = vmatprep.mubr.msk.f32.mxu0 %vm2325_vm12, %v4089_v6 }
 0x558   : > { %3705 = vrot.lane.b32.xlu0 %v8026_v26, %s5520_s29 }
 0x559   : > { %v3045_v22 = vpop.permute.xlu1 %3044  ;;  %v4087_v31 = vld [vmem:[#allocation5 + $0x1b0] sm:$0xff] }
 0x55a   : > { %v3495_v39 = vpop.permute.xlu0 %3494  ;;  %3122 = vst.msk [vmem:[#allocation5 + $0x1c8] sm:$0xff] %vm3102_vm15, %v3045_v22  ;;  %5362 = vmatmul.mubr.msk.f32.gmra.mrb[62].mxu0 %vm2325_vm12, %v4092_v46 }
 0x55b   : > { %3571 = vst.msk [vmem:[#allocation5 + $0x1d0] sm:$0xff] %vm2909_vm14, %v3495_v39  ;;  %2871 = vrot.lane.b32.xlu1 %v7495_v7, %s5518_s14  ;;  %5364 = vmatprep.mubr.msk.f32.mxu0 %vm2325_vm12, %v4095_v27 }
 0x55c   : > { %3897 = vrot.lane.b32.xlu0 %v8707_v5, %s5521_s9 }
 0x55d   : > { %v3238_v16 = vpop.permute.xlu1 %3237 }
 0x55e   : > { %v3688_v23 = vpop.permute.xlu0 %3687  ;;  %v4088_v19 = vld [vmem:[#allocation5 + $0x1b8] sm:$0xff]  ;;  %3315 = vst.msk [vmem:[#allocation5 + $0x1c8] sm:$0xff] %vm3295_vm0, %v3238_v16  ;;  %5365 = vmatmul.mubr.msk.f32.gmra.mrb[64].mxu0 %vm2325_vm12, %v4098_v59 }
 0x55f   : > { %3764 = vst.msk [vmem:[#allocation5 + $0x1d0] sm:$0xff] %vm3102_vm15, %v3688_v23  ;;  %4422 = vmatprep.mubr.f32.mxu1 %v4088_v19  ;;  %3064 = vrot.lane.b32.xlu1 %v8703_v35, %s5520_s29  ;;  %v3999_v35 = vld [vmem:[#allocation4 + $0x19a] sm:$0xff] }
 0x560   : > { %3514 = vrot.lane.b32.xlu0 %v8708_v3, %s5518_s14  ;;  %4423 = vmatmul.mubr.f32.gmra.mrb[24].mxu1 %v4087_v31  ;;  %4031 = vst.msk [vmem:[#allocation5 + $0x2e0] sm:$0xff] %vm2325_vm12, %v3999_v35 }
 0x561   : > { %5367 = vmatprep.mubr.msk.f32.mxu0 %vm2325_vm12, %v4101_v9  ;;  %v2854_v63 = vpop.permute.xlu1 %2853  ;;  %v8064_v17 = vpop.f32.mrb[2].mxu1 }
 0x562   : > { %v3880_v52 = vpop.permute.xlu0 %3879  ;;  %2930 = vst.msk [vmem:[#allocation5 + $0x1e0] sm:$0xff] %vm2909_vm14, %v2854_v63  ;;  %5368 = vmatmul.mubr.msk.f32.gmra.mrb[66].mxu0 %vm2325_vm12, %v4104_v58  ;;  %v4371_v0 = vpop.f32.mrb[3].mxu1 }
 0x563   : > { %3956 = vst.msk [vmem:[#allocation5 + $0x1d0] sm:$0xff] %vm3295_vm0, %v3880_v52  ;;  %3257 = vrot.lane.b32.xlu1 %v8704_v54, %s5521_s9  ;;  %5370 = vmatprep.mubr.msk.f32.mxu0 %vm2325_vm12, %v4107_v60  ;;  %v4122_v54 = vld [vmem:[#allocation5 + $0x2c8] sm:$0xff] }
 0x564   : > { %3707 = vrot.lane.b32.xlu0 %v8054_v57, %s5520_s29 }
 0x565   : > { %v3047_v48 = vpop.permute.xlu1 %3046  ;;  %v4090_v2 = vld [vmem:[#allocation5 + $0x1c8] sm:$0xff] }
 0x566   : > { %v3497_v7 = vpop.permute.xlu0 %3496  ;;  %3123 = vst.msk [vmem:[#allocation5 + $0x1e0] sm:$0xff] %vm3102_vm15, %v3047_v48  ;;  %5371 = vmatmul.mubr.msk.f32.gmra.mrb[68].mxu0 %vm2325_vm12, %v4110_v56 }
 0x567   : > { %3572 = vst.msk [vmem:[#allocation5 + $0x1e8] sm:$0xff] %vm2909_vm14, %v3497_v7  ;;  %2873 = vrot.lane.b32.xlu1 %v8702_v32, %s5518_s14  ;;  %5373 = vmatprep.mubr.msk.f32.mxu0 %vm2325_vm12, %v4113_v38  ;;  %v3807_v32 = vld [vmem:[#allocation4 + $0x199] sm:$0xff]  ;;  %v4125_v62 = vld [vmem:[#allocation5 + $0x2e0] sm:$0xff] }
 0x568   : > { %3899 = vrot.lane.b32.xlu0 %v8709_v33, %s5521_s9 }
 0x569   : > { %v3240_v47 = vpop.permute.xlu1 %3239 }
 0x56a   : > { %v3690_v29 = vpop.permute.xlu0 %3689  ;;  %v4091_v24 = vld [vmem:[#allocation5 + $0x1d0] sm:$0xff]  ;;  %3316 = vst.msk [vmem:[#allocation5 + $0x1e0] sm:$0xff] %vm3295_vm0, %v3240_v47  ;;  %5374 = vmatmul.mubr.msk.f32.gmra.mrb[70].mxu0 %vm2325_vm12, %v4116_v37 }
 0x56b   : > { %3765 = vst.msk [vmem:[#allocation5 + $0x1e8] sm:$0xff] %vm3102_vm15, %v3690_v29  ;;  %4427 = vmatprep.mubr.f32.mxu1 %v4091_v24  ;;  %3066 = vrot.lane.b32.xlu1 %v8706_v42, %s5520_s29 }
 0x56c   : > { %3516 = vrot.lane.b32.xlu0 %v8710_v28, %s5518_s14  ;;  %4428 = vmatmul.mubr.f32.gmra.mrb[26].mxu1 %v4090_v2 }
 0x56d   : > { %5376 = vmatprep.mubr.msk.f32.mxu0 %vm2325_vm12, %v4119_v20  ;;  %v2856_v30 = vpop.permute.xlu1 %2855  ;;  %v8091_v1 = vpop.f32.mrb[4].mxu1 }
 0x56e   : > { %v3882_v53 = vpop.permute.xlu0 %3881  ;;  %2931 = vst.msk [vmem:[#allocation5 + $0x1f8] sm:$0xff] %vm2909_vm14, %v2856_v30  ;;  %5377 = vmatmul.mubr.msk.f32.gmra.mrb[72].mxu0 %vm2325_vm12, %v4122_v54  ;;  %v4376_v49 = vpop.f32.mrb[5].mxu1 }
 0x56f   : > { %3957 = vst.msk [vmem:[#allocation5 + $0x1e8] sm:$0xff] %vm3295_vm0, %v3882_v53  ;;  %3259 = vrot.lane.b32.xlu1 %v8026_v26, %s5521_s9  ;;  %5379 = vmatprep.mubr.msk.f32.mxu0 %vm2325_vm12, %v4125_v62 }
 0x570   : > { %3709 = vrot.lane.b32.xlu0 %v3615_v14, %s5520_s29 }
 0x571   : > { %v3049_v4 = vpop.permute.xlu1 %3048  ;;  %v4093_v25 = vld [vmem:[#allocation5 + $0x1e0] sm:$0xff] }
 0x572   : > { %v3499_v10 = vpop.permute.xlu0 %3498  ;;  %3124 = vst.msk [vmem:[#allocation5 + $0x1f8] sm:$0xff] %vm3102_vm15, %v3049_v4  ;;  %5380 = vmatmul.mubr.msk.f32.gmra.mrb[74].mxu0 %vm2325_vm12, %v4128_v44 }
 0x573   : > { %3573 = vst.msk [vmem:[#allocation5 + $0x200] sm:$0xff] %vm2909_vm14, %v3499_v10  ;;  %2875 = vrot.lane.b32.xlu1 %v8705_v40, %s5518_s14 }
 0x574   : > { %3901 = vrot.lane.b32.xlu0 %v3807_v32, %s5521_s9 }
 0x575   : > { %v3242_v50 = vpop.permute.xlu1 %3241 }
 0x576   : > { %v3692_v18 = vpop.permute.xlu0 %3691  ;;  %v4094_v8 = vld [vmem:[#allocation5 + $0x1e8] sm:$0xff]  ;;  %3317 = vst.msk [vmem:[#allocation5 + $0x1f8] sm:$0xff] %vm3295_vm0, %v3242_v50 }
 0x577   : > { %3766 = vst.msk [vmem:[#allocation5 + $0x200] sm:$0xff] %vm3102_vm15, %v3692_v18  ;;  %4432 = vmatprep.mubr.f32.mxu1 %v4094_v8  ;;  %3068 = vrot.lane.b32.xlu1 %v8708_v3, %s5520_s29 }
 0x578   : > { %3518 = vrot.lane.b32.xlu0 %v7588_v15, %s5518_s14  ;;  %4433 = vmatmul.mubr.f32.gmra.mrb[28].mxu1 %v4093_v25  ;;  %v3808_v15 = vld [vmem:[#allocation4 + $0x1a1] sm:$0xff] }
 0x579   : > { %v2858_v40 = vpop.permute.xlu1 %2857 }
 0x57a   : > { %v3884_v11 = vpop.permute.xlu0 %3883  ;;  %2932 = vst.msk [vmem:[#allocation5 + $0x210] sm:$0xff] %vm2909_vm14, %v2858_v40 }
 0x57b   : > { %3958 = vst.msk [vmem:[#allocation5 + $0x200] sm:$0xff] %vm3295_vm0, %v3884_v11  ;;  %3261 = vrot.lane.b32.xlu1 %v8054_v57, %s5521_s9 }
 0x57c   : > { %3711 = vrot.lane.b32.xlu0 %v3616_v55, %s5520_s29 }
 0x57d   : > { %v3051_v26 = vpop.permute.xlu1 %3050  ;;  %v4096_v41 = vld [vmem:[#allocation5 + $0x1f8] sm:$0xff] }
 0x57e   : > { %v3501_v42 = vpop.permute.xlu0 %3500  ;;  %3125 = vst.msk [vmem:[#allocation5 + $0x210] sm:$0xff] %vm3102_vm15, %v3051_v26 }
 0x57f   : > { %3574 = vst.msk [vmem:[#allocation5 + $0x218] sm:$0xff] %vm2909_vm14, %v3501_v42  ;;  %v8112_v43 = vpop.f32.mrb[6].mxu1 }
 0x580   : > { %v4381_v12 = vpop.f32.mrb[7].mxu1  ;;  %3903 = vrot.lane.b32.xlu0 %v3808_v15, %s5521_s9 }
 0x581   : > { %v3244_v34 = vpop.permute.xlu1 %3243 }
 0x582   : > { %v3694_v21 = vpop.permute.xlu0 %3693  ;;  %v4097_v61 = vld [vmem:[#allocation5 + $0x200] sm:$0xff]  ;;  %3318 = vst.msk [vmem:[#allocation5 + $0x210] sm:$0xff] %vm3295_vm0, %v3244_v34 }
 0x583   : > { %3767 = vst.msk [vmem:[#allocation5 + $0x218] sm:$0xff] %vm3102_vm15, %v3694_v21  ;;  %4437 = vmatprep.mubr.f32.mxu1 %v4097_v61 }
 0x584   : > { %4438 = vmatmul.mubr.f32.gmra.mrb[30].mxu1 %v4096_v41 }
 0x585   : > { %v2860_v51 = vpop.permute.xlu1 %2859 }
 0x586   : > { %v3886_v39 = vpop.permute.xlu0 %3885  ;;  %2933 = vst.msk [vmem:[#allocation5 + $0x228] sm:$0xff] %vm2909_vm14, %v2860_v51 }
 0x587   : > { %3959 = vst.msk [vmem:[#allocation5 + $0x218] sm:$0xff] %vm3295_vm0, %v3886_v39 }
 0x589   : > { %v3053_v23 = vpop.permute.xlu1 %3052  ;;  %v4099_v19 = vld [vmem:[#allocation5 + $0x210] sm:$0xff] }
 0x58a   : > { %v3503_v45 = vpop.permute.xlu0 %3502  ;;  %3126 = vst.msk [vmem:[#allocation5 + $0x228] sm:$0xff] %vm3102_vm15, %v3053_v23 }
 0x58b   : > { %3575 = vst.msk [vmem:[#allocation5 + $0x230] sm:$0xff] %vm2909_vm14, %v3503_v45 }
 0x58d   : > { %v8127_v46 = vpop.f32.mrb[32].mxu0  ;;  %v3246_v31 = vpop.permute.xlu1 %3245 }
 0x58e   : > { %v3696_v5 = vpop.permute.xlu0 %3695  ;;  %v4100_v6 = vld [vmem:[#allocation5 + $0x218] sm:$0xff]  ;;  %3319 = vst.msk [vmem:[#allocation5 + $0x228] sm:$0xff] %vm3295_vm0, %v3246_v31  ;;  %v4336_v3 = vpop.f32.mrb[33].mxu0 }
 0x58f   : > { %3768 = vst.msk [vmem:[#allocation5 + $0x230] sm:$0xff] %vm3102_vm15, %v3696_v5  ;;  %4442 = vmatprep.mubr.f32.mxu1 %v4100_v6 }
 0x590   : > { %4443 = vmatmul.mubr.f32.gmra.mrb[32].mxu1 %v4099_v19 }
 0x591   : > { %v2862_v52 = vpop.permute.xlu1 %2861 }
 0x592   : > { %v3888_v22 = vpop.permute.xlu0 %3887  ;;  %2934 = vst.msk [vmem:[#allocation5 + $0x240] sm:$0xff] %vm2909_vm14, %v2862_v52 }
 0x593   : > { %3960 = vst.msk [vmem:[#allocation5 + $0x230] sm:$0xff] %vm3295_vm0, %v3888_v22 }
 0x595   : > { %v3055_v7 = vpop.permute.xlu1 %3054  ;;  %v4102_v63 = vld [vmem:[#allocation5 + $0x228] sm:$0xff] }
 0x596   : > { %v3505_v27 = vpop.permute.xlu0 %3504  ;;  %3127 = vst.msk [vmem:[#allocation5 + $0x240] sm:$0xff] %vm3102_vm15, %v3055_v7 }
 0x597   : > { %3576 = vst.msk [vmem:[#allocation5 + $0x248] sm:$0xff] %vm2909_vm14, %v3505_v27  ;;  %v8131_v16 = vpop.f32.mrb[8].mxu1 }
 0x598   : > { %v4386_v59 = vpop.f32.mrb[9].mxu1 }
 0x599   : > { %v3248_v0 = vpop.permute.xlu1 %3247 }
 0x59a   : > { %v3698_v57 = vpop.permute.xlu0 %3697  ;;  %v4103_v9 = vld [vmem:[#allocation5 + $0x230] sm:$0xff]  ;;  %3320 = vst.msk [vmem:[#allocation5 + $0x240] sm:$0xff] %vm3295_vm0, %v3248_v0 }
 0x59b   : > { %3769 = vst.msk [vmem:[#allocation5 + $0x248] sm:$0xff] %vm3102_vm15, %v3698_v57  ;;  %4447 = vmatprep.mubr.f32.mxu1 %v4103_v9 }
 0x59c   : > { %4448 = vmatmul.mubr.f32.gmra.mrb[34].mxu1 %v4102_v63 }
 0x59d   : > { %v2864_v60 = vpop.permute.xlu1 %2863 }
 0x59e   : > { %v3890_v58 = vpop.permute.xlu0 %3889  ;;  %2935 = vst.msk [vmem:[#allocation5 + $0x258] sm:$0xff] %vm2909_vm14, %v2864_v60 }
 0x59f   : > { %3961 = vst.msk [vmem:[#allocation5 + $0x248] sm:$0xff] %vm3295_vm0, %v3890_v58 }
 0x5a1   : > { %v3057_v48 = vpop.permute.xlu1 %3056  ;;  %v4105_v56 = vld [vmem:[#allocation5 + $0x240] sm:$0xff] }
 0x5a2   : > { %v3507_v33 = vpop.permute.xlu0 %3506  ;;  %3128 = vst.msk [vmem:[#allocation5 + $0x258] sm:$0xff] %vm3102_vm15, %v3057_v48 }
 0x5a3   : > { %3577 = vst.msk [vmem:[#allocation5 + $0x260] sm:$0xff] %vm2909_vm14, %v3507_v33 }
 0x5a5   : > { %v8143_v28 = vpop.f32.mrb[34].mxu0  ;;  %v3250_v38 = vpop.permute.xlu1 %3249 }
 0x5a6   : > { %v3700_v29 = vpop.permute.xlu0 %3699  ;;  %v4106_v24 = vld [vmem:[#allocation5 + $0x248] sm:$0xff]  ;;  %3321 = vst.msk [vmem:[#allocation5 + $0x258] sm:$0xff] %vm3295_vm0, %v3250_v38  ;;  %v4341_v14 = vpop.f32.mrb[35].mxu0 }
 0x5a7   : > { %3770 = vst.msk [vmem:[#allocation5 + $0x260] sm:$0xff] %vm3102_vm15, %v3700_v29  ;;  %4452 = vmatprep.mubr.f32.mxu1 %v4106_v24 }
 0x5a8   : > { %4453 = vmatmul.mubr.f32.gmra.mrb[36].mxu1 %v4105_v56 }
 0x5a9   : > { %v2866_v47 = vpop.permute.xlu1 %2865 }
 0x5aa   : > { %v3892_v2 = vpop.permute.xlu0 %3891  ;;  %2936 = vst.msk [vmem:[#allocation5 + $0x270] sm:$0xff] %vm2909_vm14, %v2866_v47 }
 0x5ab   : > { %3962 = vst.msk [vmem:[#allocation5 + $0x260] sm:$0xff] %vm3295_vm0, %v3892_v2 }
 0x5ad   : > { %v3059_v32 = vpop.permute.xlu1 %3058  ;;  %v4108_v10 = vld [vmem:[#allocation5 + $0x258] sm:$0xff] }
 0x5ae   : > { %v3509_v53 = vpop.permute.xlu0 %3508  ;;  %3129 = vst.msk [vmem:[#allocation5 + $0x270] sm:$0xff] %vm3102_vm15, %v3059_v32 }
 0x5af   : > { %3578 = vst.msk [vmem:[#allocation5 + $0x278] sm:$0xff] %vm2909_vm14, %v3509_v53  ;;  %v8147_v37 = vpop.f32.mrb[10].mxu1 }
 0x5b0   : > { %v4391_v20 = vpop.f32.mrb[11].mxu1 }
 0x5b1   : > { %v3252_v54 = vpop.permute.xlu1 %3251 }
 0x5b2   : > { %v3702_v35 = vpop.permute.xlu0 %3701  ;;  %v4109_v36 = vld [vmem:[#allocation5 + $0x260] sm:$0xff]  ;;  %3322 = vst.msk [vmem:[#allocation5 + $0x270] sm:$0xff] %vm3295_vm0, %v3252_v54 }
 0x5b3   : > { %3771 = vst.msk [vmem:[#allocation5 + $0x278] sm:$0xff] %vm3102_vm15, %v3702_v35  ;;  %4457 = vmatprep.mubr.f32.mxu1 %v4109_v36 }
 0x5b4   : > { %4458 = vmatmul.mubr.f32.gmra.mrb[38].mxu1 %v4108_v10 }
 0x5b5   : > { %v2868_v18 = vpop.permute.xlu1 %2867 }
 0x5b6   : > { %v3894_v30 = vpop.permute.xlu0 %3893  ;;  %2937 = vst.msk [vmem:[#allocation5 + $0x288] sm:$0xff] %vm2909_vm14, %v2868_v18 }
 0x5b7   : > { %3963 = vst.msk [vmem:[#allocation5 + $0x278] sm:$0xff] %vm3295_vm0, %v3894_v30 }
 0x5b9   : > { %v3061_v25 = vpop.permute.xlu1 %3060  ;;  %v4111_v62 = vld [vmem:[#allocation5 + $0x270] sm:$0xff] }
 0x5ba   : > { %v3511_v49 = vpop.permute.xlu0 %3510  ;;  %3130 = vst.msk [vmem:[#allocation5 + $0x288] sm:$0xff] %vm3102_vm15, %v3061_v25 }
 0x5bb   : > { %3579 = vst.msk [vmem:[#allocation5 + $0x290] sm:$0xff] %vm2909_vm14, %v3511_v49  ;;  %v8193_v49 = vld [vmem:[%s8668_s4] ss:$0 sm:$0xff] }
 0x5bc   : > { %v4340_v18 = vadd.f32 %v8193_v49, %v8143_v28 }
 0x5bd   : > { %v3254_v55 = vpop.permute.xlu1 %3253  ;;  %v8159_v11 = vpop.f32.mrb[36].mxu0 }
 0x5be   : > { %v3704_v8 = vpop.permute.xlu0 %3703  ;;  %v4112_v4 = vld [vmem:[#allocation5 + $0x278] sm:$0xff]  ;;  %3323 = vst.msk [vmem:[#allocation5 + $0x288] sm:$0xff] %vm3295_vm0, %v3254_v55  ;;  %v4346_v50 = vpop.f32.mrb[37].mxu0 }
 0x5bf   : > { %3772 = vst.msk [vmem:[#allocation5 + $0x290] sm:$0xff] %vm3102_vm15, %v3704_v8  ;;  %4462 = vmatprep.mubr.f32.mxu1 %v4112_v4  ;;  %v4335_v8 = vadd.f32 %v8193_v49, %v8127_v46 }
 0x5c0   : > { %4463 = vmatmul.mubr.f32.gmra.mrb[40].mxu1 %v4111_v62 }
 0x5c1   : > { %v2870_v42 = vpop.permute.xlu1 %2869 }
 0x5c2   : > { %v3896_v44 = vpop.permute.xlu0 %3895  ;;  %2938 = vst.msk [vmem:[#allocation5 + $0x2a0] sm:$0xff] %vm2909_vm14, %v2870_v42  ;;  %v4345_v42 = vadd.f32 %v8193_v49, %v8159_v11  ;;  %v4365_v11 = vadd.f32 %v8193_v49, %v8036_v13  ;;  %v4390_v13 = vadd.f32 %v8193_v49, %v8147_v37 }
 0x5c3   : > { %3964 = vst.msk [vmem:[#allocation5 + $0x290] sm:$0xff] %vm3295_vm0, %v3896_v44 }
 0x5c5   : > { %v3063_v26 = vpop.permute.xlu1 %3062  ;;  %v4114_v41 = vld [vmem:[#allocation5 + $0x288] sm:$0xff] }
 0x5c6   : > { %v3513_v15 = vpop.permute.xlu0 %3512  ;;  %3131 = vst.msk [vmem:[#allocation5 + $0x2a0] sm:$0xff] %vm3102_vm15, %v3063_v26 }
 0x5c7   : > { %3580 = vst.msk [vmem:[#allocation5 + $0x2a8] sm:$0xff] %vm2909_vm14, %v3513_v15  ;;  %v8163_v40 = vpop.f32.mrb[12].mxu1 }
 0x5c8   : > { %v4396_v12 = vpop.f32.mrb[13].mxu1 }
 0x5c9   : > { %v3256_v34 = vpop.permute.xlu1 %3255 }
 0x5ca   : > { %v3706_v21 = vpop.permute.xlu0 %3705  ;;  %v4115_v61 = vld [vmem:[#allocation5 + $0x290] sm:$0xff]  ;;  %3324 = vst.msk [vmem:[#allocation5 + $0x2a0] sm:$0xff] %vm3295_vm0, %v3256_v34 }
 0x5cb   : > { %3773 = vst.msk [vmem:[#allocation5 + $0x2a8] sm:$0xff] %vm3102_vm15, %v3706_v21  ;;  %4467 = vmatprep.mubr.f32.mxu1 %v4115_v61 }
 0x5cc   : > { %4468 = vmatmul.mubr.f32.gmra.mrb[42].mxu1 %v4114_v41 }
 0x5cd   : > { %v2872_v51 = vpop.permute.xlu1 %2871 }
 0x5ce   : > { %v3898_v39 = vpop.permute.xlu0 %3897  ;;  %2939 = vst.msk [vmem:[#allocation5 + $0x2b8] sm:$0xff] %vm2909_vm14, %v2872_v51  ;;  %v4370_v51 = vadd.f32 %v8193_v49, %v8064_v17 }
 0x5cf   : > { %3965 = vst.msk [vmem:[#allocation5 + $0x2a8] sm:$0xff] %vm3295_vm0, %v3898_v39 }
 0x5d1   : > { %v3065_v23 = vpop.permute.xlu1 %3064  ;;  %v4117_v19 = vld [vmem:[#allocation5 + $0x2a0] sm:$0xff] }
 0x5d2   : > { %v3515_v45 = vpop.permute.xlu0 %3514  ;;  %3132 = vst.msk [vmem:[#allocation5 + $0x2b8] sm:$0xff] %vm3102_vm15, %v3065_v23 }
 0x5d3   : > { %3581 = vst.msk [vmem:[#allocation5 + $0x2c0] sm:$0xff] %vm2909_vm14, %v3515_v45 }
 0x5d5   : > { %v3258_v31 = vpop.permute.xlu1 %3257  ;;  %v4349_v3 = vpop.f32.mrb[38].mxu0 }
 0x5d6   : > { %v3708_v5 = vpop.permute.xlu0 %3707  ;;  %v4118_v6 = vld [vmem:[#allocation5 + $0x2a8] sm:$0xff]  ;;  %3325 = vst.msk [vmem:[#allocation5 + $0x2b8] sm:$0xff] %vm3295_vm0, %v3258_v31  ;;  %v4351_v27 = vpop.f32.mrb[39].mxu0  ;;  %v4350_v15 = vadd.f32 %v8193_v49, %v4349_v3  ;;  %v4380_v3 = vadd.f32 %v8193_v49, %v8112_v43 }
 0x5d7   : > { %3774 = vst.msk [vmem:[#allocation5 + $0x2c0] sm:$0xff] %vm3102_vm15, %v3708_v5  ;;  %4472 = vmatprep.mubr.f32.mxu1 %v4118_v6  ;;  %v4375_v27 = vadd.f32 %v8193_v49, %v8091_v1 }
 0x5d8   : > { %4473 = vmatmul.mubr.f32.gmra.mrb[44].mxu1 %v4117_v19 }
 0x5d9   : > { %v2874_v59 = vpop.permute.xlu1 %2873 }
 0x5da   : > { %v3900_v22 = vpop.permute.xlu0 %3899  ;;  %2940 = vst.msk [vmem:[#allocation5 + $0x2d0] sm:$0xff] %vm2909_vm14, %v2874_v59 }
 0x5db   : > { %3966 = vst.msk [vmem:[#allocation5 + $0x2c0] sm:$0xff] %vm3295_vm0, %v3900_v22 }
 0x5dd   : > { %v3067_v58 = vpop.permute.xlu1 %3066  ;;  %v4120_v0 = vld [vmem:[#allocation5 + $0x2b8] sm:$0xff] }
 0x5de   : > { %v3517_v52 = vpop.permute.xlu0 %3516  ;;  %3133 = vst.msk [vmem:[#allocation5 + $0x2d0] sm:$0xff] %vm3102_vm15, %v3067_v58 }
 0x5df   : > { %3582 = vst.msk [vmem:[#allocation5 + $0x2d8] sm:$0xff] %vm2909_vm14, %v3517_v52  ;;  %v8177_v57 = vpop.f32.mrb[14].mxu1 }
 0x5e0   : > { %v4401_v9 = vpop.f32.mrb[15].mxu1  ;;  %v4400_v1 = vadd.f32 %v8193_v49, %v8177_v57 }
 0x5e1   : > { %v3260_v60 = vpop.permute.xlu1 %3259 }
 0x5e2   : > { %v3710_v7 = vpop.permute.xlu0 %3709  ;;  %v4121_v63 = vld [vmem:[#allocation5 + $0x2c0] sm:$0xff]  ;;  %3326 = vst.msk [vmem:[#allocation5 + $0x2d0] sm:$0xff] %vm3295_vm0, %v3260_v60 }
 0x5e3   : > { %3775 = vst.msk [vmem:[#allocation5 + $0x2d8] sm:$0xff] %vm3102_vm15, %v3710_v7  ;;  %4477 = vmatprep.mubr.f32.mxu1 %v4121_v63  ;;  %v4385_v7 = vadd.f32 %v8193_v49, %v8131_v16 }
 0x5e4   : > { %4478 = vmatmul.mubr.f32.gmra.mrb[46].mxu1 %v4120_v0 }
 0x5e5   : > { %v2876_v24 = vpop.permute.xlu1 %2875 }
 0x5e6   : > { %v3902_v33 = vpop.permute.xlu0 %3901  ;;  %2941 = vst.msk [vmem:[#allocation5 + $0x2e8] sm:$0xff] %vm2909_vm14, %v2876_v24 }
 0x5e7   : > { %3967 = vst.msk [vmem:[#allocation5 + $0x2d8] sm:$0xff] %vm3295_vm0, %v3902_v33  ;;  %v4395_v33 = vadd.f32 %v8193_v49, %v8163_v40 }
 0x5e9   : > { %v3069_v2 = vpop.permute.xlu1 %3068  ;;  %v4123_v38 = vld [vmem:[#allocation5 + $0x2d0] sm:$0xff] }
 0x5ea   : > { %v3519_v29 = vpop.permute.xlu0 %3518  ;;  %3134 = vst.msk [vmem:[#allocation5 + $0x2e8] sm:$0xff] %vm3102_vm15, %v3069_v2 }
 0x5eb   : > { %3583 = vst.msk [vmem:[#allocation5 + $0x2f0] sm:$0xff] %vm2909_vm14, %v3519_v29 }
 0x5ed   : > { %v3262_v53 = vpop.permute.xlu1 %3261  ;;  %v4354_v47 = vpop.f32.mrb[40].mxu0 }
 0x5ee   : > { %v3712_v48 = vpop.permute.xlu0 %3711  ;;  %v4124_v56 = vld [vmem:[#allocation5 + $0x2d8] sm:$0xff]  ;;  %3327 = vst.msk [vmem:[#allocation5 + $0x2e8] sm:$0xff] %vm3295_vm0, %v3262_v53  ;;  %v4356_v20 = vpop.f32.mrb[41].mxu0  ;;  %v4355_v26 = vadd.f32 %v8193_v49, %v4354_v47 }
 0x5ef   : > { %3776 = vst.msk [vmem:[#allocation5 + $0x2f0] sm:$0xff] %vm3102_vm15, %v3712_v48  ;;  %4482 = vmatprep.mubr.f32.mxu1 %v4124_v56 }
 0x5f0   : > { %4483 = vmatmul.mubr.f32.gmra.mrb[48].mxu1 %v4123_v38 }
 0x5f2   : > { %v3904_v14 = vpop.permute.xlu0 %3903 }
 0x5f3   : > { %3968 = vst.msk [vmem:[#allocation5 + $0x2f0] sm:$0xff] %vm3295_vm0, %v3904_v14 }
 0x5f5   : > { %v4126_v10 = vld [vmem:[#allocation5 + $0x2e8] sm:$0xff] }
 0x5f7   : > { %v4404_v35 = vpop.f32.mrb[16].mxu1 }
 0x5f8   : > { %v4406_v36 = vpop.f32.mrb[17].mxu1  ;;  %v4405_v2 = vadd.f32 %v8193_v49, %v4404_v35 }
 0x5fa   : > { %v4127_v32 = vld [vmem:[#allocation5 + $0x2f0] sm:$0xff] }
 0x5fb   : > { %4487 = vmatprep.mubr.f32.mxu1 %v4127_v32 }
 0x5fc   : > { %4488 = vmatmul.mubr.f32.gmra.mrb[50].mxu1 %v4126_v10 }
 0x605   : > { %v4359_v30 = vpop.f32.mrb[42].mxu0 }
 0x606   : > { %v4361_v54 = vpop.f32.mrb[43].mxu0  ;;  %v4360_v46 = vadd.f32 %v8193_v49, %v4359_v30 }
 0x609   : > { %v5336_v4 = vpop.f32.mrb[44].mxu0 }
 0x60a   : > { %v8199_v25 = vadd.f32 %v5336_v4, %v4340_v18  ;;  %v4559_v44 = vpop.f32.mrb[45].mxu0 }
 0x60b   : > { %v8201_v55 = vadd.f32 %v4559_v44, %v4335_v8 }
 0x60d   : > { %v5339_v12 = vpop.f32.mrb[46].mxu0 }
 0x60e   : > { %v8206_v21 = vadd.f32 %v5339_v12, %v4350_v15  ;;  %v4569_v28 = vpop.f32.mrb[47].mxu0 }
 0x60f   : > { %v4409_v62 = vpop.f32.mrb[18].mxu1  ;;  %v8208_v61 = vadd.f32 %v4569_v28, %v4345_v42 }
 0x610   : > { %v4411_v50 = vpop.f32.mrb[19].mxu1  ;;  %v4410_v56 = vadd.f32 %v8193_v49, %v4409_v62 }
 0x611   : > { %v5342_v41 = vpop.f32.mrb[48].mxu0 }
 0x612   : > { %v8212_v39 = vadd.f32 %v5342_v41, %v4360_v46  ;;  %v4579_v34 = vpop.f32.mrb[49].mxu0 }
 0x613   : > { %v8214_v45 = vadd.f32 %v4579_v34, %v4355_v26 }
 0x615   : > { %v5345_v5 = vpop.f32.mrb[50].mxu0 }
 0x616   : > { %v8220_v6 = vadd.f32 %v5345_v5, %v4370_v51  ;;  %v4589_v19 = vpop.f32.mrb[51].mxu0 }
 0x617   : > { %v8222_v22 = vadd.f32 %v4589_v19, %v4365_v11 }
 0x619   : > { %v5348_v52 = vpop.f32.mrb[52].mxu0 }
 0x61a   : > { %v8228_v59 = vadd.f32 %v5348_v52, %v4380_v3  ;;  %v4599_v17 = vpop.f32.mrb[53].mxu0 }
 0x61b   : > { %v4414_v23 = vpop.f32.mrb[20].mxu1  ;;  %v8230_v9 = vadd.f32 %v4599_v17, %v4375_v27 }
 0x61c   : > { %v4416_v31 = vpop.f32.mrb[21].mxu1  ;;  %v4415_v47 = vadd.f32 %v8193_v49, %v4414_v23 }
 0x61d   : > { %v5351_v63 = vpop.f32.mrb[54].mxu0 }
 0x61e   : > { %v8236_v58 = vadd.f32 %v5351_v63, %v4390_v13  ;;  %v4609_v0 = vpop.f32.mrb[55].mxu0 }
 0x61f   : > { %v8238_v43 = vadd.f32 %v4609_v0, %v4385_v7 }
 0x621   : > { %v5354_v60 = vpop.f32.mrb[56].mxu0 }
 0x622   : > { %v8244_v29 = vadd.f32 %v5354_v60, %v4400_v1  ;;  %v4619_v37 = vpop.f32.mrb[57].mxu0  ;;  %v4719_v1 = vsel %vm2325_vm12, %v8199_v25, 0.0 }
 0x623   : > { %v8246_v48 = vadd.f32 %v4619_v37, %v4395_v33  ;;  %v4718_v33 = vsel %vm2325_vm12, %v8201_v55, 0.0  ;;  %v4721_v37 = vsel %vm2325_vm12, %v8208_v61, 0.0 }
 0x625   : > { %v5357_v38 = vpop.f32.mrb[58].mxu0 }
 0x626   : > { %v8250_v14 = vadd.f32 %v5357_v38, %v4410_v56  ;;  %v4629_v53 = vpop.f32.mrb[59].mxu0  ;;  %v4720_v56 = vadd.f32 %v4719_v1, %v4718_v33  ;;  %v4723_v38 = vsel %vm2325_vm12, %v8206_v21, 0.0 }
 0x627   : > { %v4419_v24 = vpop.f32.mrb[22].mxu1  ;;  %v8252_v57 = vadd.f32 %v4629_v53, %v4405_v2 }
 0x628   : > { %v4421_v16 = vpop.f32.mrb[23].mxu1  ;;  %v4420_v40 = vadd.f32 %v8193_v49, %v4419_v24  ;;  %v4722_v2 = vadd.f32 %v4721_v37, %v4720_v56  ;;  %v4741_v37 = vsel %vm2325_vm12, %v8246_v48, 0.0 }
 0x629   : > { %v5360_v20 = vpop.f32.mrb[60].mxu0 }
 0x62a   : > { %v8256_v36 = vadd.f32 %v5360_v20, %v4420_v40  ;;  %v4639_v32 = vpop.f32.mrb[61].mxu0  ;;  %v4724_v53 = vadd.f32 %v4723_v38, %v4722_v2  ;;  %v4725_v40 = vsel %vm2325_vm12, %v8214_v45, 0.0  ;;  %v4743_v38 = vsel %vm2325_vm12, %v8244_v29, 0.0 }
 0x62b   : > { %v8258_v10 = vadd.f32 %v4639_v32, %v4415_v47 }
 0x62d   : > { %v5363_v30 = vpop.f32.mrb[62].mxu0 }
 0x62e   : > { %v4649_v18 = vpop.f32.mrb[63].mxu0 }
 0x631   : > { %v5366_v62 = vpop.f32.mrb[64].mxu0 }
 0x632   : > { %v4659_v44 = vpop.f32.mrb[65].mxu0 }
 0x633   : > { %v4424_v54 = vpop.f32.mrb[24].mxu1 }
 0x634   : > { %v4425_v35 = vadd.f32 %v8193_v49, %v4424_v54  ;;  %v4426_v8 = vpop.f32.mrb[25].mxu1 }
 0x635   : > { %v5369_v50 = vpop.f32.mrb[66].mxu0  ;;  %v4729_v8 = vsel %vm2325_vm12, %v8222_v22, 0.0 }
 0x636   : > { %v8261_v4 = vadd.f32 %v4649_v18, %v4425_v35  ;;  %v4669_v15 = vpop.f32.mrb[67].mxu0  ;;  %v4727_v18 = vsel %vm2325_vm12, %v8212_v39, 0.0 }
 0x639   : > { %v5372_v42 = vpop.f32.mrb[68].mxu0 }
 0x63a   : > { %v4679_v28 = vpop.f32.mrb[69].mxu0 }
 0x63d   : > { %v8266_v34 = vpop.f32.mrb[70].mxu0 }
 0x63e   : > { %v4689_v51 = vpop.f32.mrb[71].mxu0 }
 0x63f   : > { %v4429_v12 = vpop.f32.mrb[26].mxu1 }
 0x640   : > { %v4430_v46 = vadd.f32 %v8193_v49, %v4429_v12  ;;  %v4431_v26 = vpop.f32.mrb[27].mxu1 }
 0x641   : > { %v8268_v11 = vpop.f32.mrb[72].mxu0 }
 0x642   : > { %v8264_v41 = vadd.f32 %v5363_v30, %v4430_v46  ;;  %v8270_v5 = vpop.f32.mrb[73].mxu0  ;;  %v4726_v30 = vadd.f32 %v4725_v40, %v4724_v53 }
 0x644   : > { %v4728_v35 = vadd.f32 %v4727_v18, %v4726_v30  ;;  %v4747_v30 = vsel %vm2325_vm12, %v8250_v14, 0.0 }
 0x645   : > { %v8273_v3 = vpop.f32.mrb[74].mxu0 }
 0x646   : > { %v8277_v52 = vpop.f32.mrb[75].mxu0 }
 0x64b   : > { %v4434_v23 = vpop.f32.mrb[28].mxu1 }
 0x64c   : > { %v4435_v19 = vadd.f32 %v8193_v49, %v4434_v23  ;;  %v4436_v31 = vpop.f32.mrb[29].mxu1 }
 0x64d   : > { %v4735_v31 = vsel %vm2325_vm12, %v8228_v59, 0.0 }
 0x64e   : > { %v8275_v27 = vadd.f32 %v4659_v44, %v4435_v19 }
 0x657   : > { %v4439_v17 = vpop.f32.mrb[30].mxu1 }
 0x658   : > { %v4440_v13 = vadd.f32 %v8193_v49, %v4439_v17  ;;  %v4441_v7 = vpop.f32.mrb[31].mxu1 }
 0x65a   : > { %v8280_v63 = vadd.f32 %v5366_v62, %v4440_v13  ;;  %v4730_v62 = vadd.f32 %v4729_v8, %v4728_v35  ;;  %v4737_v13 = vsel %vm2325_vm12, %v8238_v43, 0.0  ;;  %v4749_v35 = vsel %vm2325_vm12, %v8258_v10, 0.0 }
 0x663   : > { %v4444_v0 = vpop.f32.mrb[32].mxu1 }
 0x664   : > { %v4445_v60 = vadd.f32 %v8193_v49, %v4444_v0  ;;  %v4446_v24 = vpop.f32.mrb[33].mxu1 }
 0x665   : > { %v4739_v24 = vsel %vm2325_vm12, %v8236_v58, 0.0 }
 0x666   : > { %v8289_v16 = vadd.f32 %v4669_v15, %v4445_v60  ;;  %v4731_v15 = vsel %vm2325_vm12, %v8220_v6, 0.0 }
 0x667   : > { %v4732_v26 = vadd.f32 %v4731_v15, %v4730_v62 }
 0x66f   : > { %v4449_v47 = vpop.f32.mrb[34].mxu1 }
 0x670   : > { %v4450_v20 = vadd.f32 %v8193_v49, %v4449_v47  ;;  %v4451_v32 = vpop.f32.mrb[35].mxu1 }
 0x672   : > { %v8296_v54 = vadd.f32 %v5369_v50, %v4450_v20  ;;  %v4733_v50 = vsel %vm2325_vm12, %v8230_v9, 0.0 }
 0x673   : > { %v4734_v19 = vadd.f32 %v4733_v50, %v4732_v26  ;;  %v4755_v50 = vsel %vm2325_vm12, %v8264_v41, 0.0 }
 0x675   : > { %v4736_v17 = vadd.f32 %v4735_v31, %v4734_v19  ;;  %v4757_v31 = vsel %vm2325_vm12, %v8275_v27, 0.0 }
 0x677   : > { %v4738_v33 = vadd.f32 %v4737_v13, %v4736_v17  ;;  %v4759_v13 = vsel %vm2325_vm12, %v8280_v63, 0.0 }
 0x67b   : > { %v4454_v44 = vpop.f32.mrb[36].mxu1 }
 0x67c   : > { %v4455_v12 = vadd.f32 %v8193_v49, %v4454_v44  ;;  %v4456_v46 = vpop.f32.mrb[37].mxu1 }
 0x67d   : > { %v4753_v46 = vsel %vm2325_vm12, %v8261_v4, 0.0 }
 0x67e   : > { %v8307_v23 = vadd.f32 %v4679_v28, %v4455_v12  ;;  %v4740_v28 = vadd.f32 %v4739_v24, %v4738_v33 }
 0x680   : > { %v4742_v56 = vadd.f32 %v4741_v37, %v4740_v28  ;;  %v4763_v28 = vsel %vm2325_vm12, %v8296_v54, 0.0 }
 0x682   : > { %v4744_v47 = vadd.f32 %v4743_v38, %v4742_v56 }
 0x687   : > { %v4459_v7 = vpop.f32.mrb[38].mxu1 }
 0x688   : > { %v4460_v0 = vadd.f32 %v8193_v49, %v4459_v7  ;;  %v4461_v1 = vpop.f32.mrb[39].mxu1 }
 0x68a   : > { %v8314_v60 = vadd.f32 %v5372_v42, %v4460_v0  ;;  %v4745_v42 = vsel %vm2325_vm12, %v8252_v57, 0.0  ;;  %v4761_v0 = vsel %vm2325_vm12, %v8289_v16, 0.0 }
 0x68b   : > { %v4746_v32 = vadd.f32 %v4745_v42, %v4744_v47 }
 0x68d   : > { %v4748_v18 = vadd.f32 %v4747_v30, %v4746_v32 }
 0x68f   : > { %v4750_v15 = vadd.f32 %v4749_v35, %v4748_v18 }
 0x693   : > { %v4464_v2 = vpop.f32.mrb[40].mxu1 }
 0x694   : > { %v4465_v53 = vadd.f32 %v8193_v49, %v4464_v2  ;;  %v4466_v40 = vpop.f32.mrb[41].mxu1  ;;  %v4765_v2 = vsel %vm2325_vm12, %v8307_v23, 0.0 }
 0x696   : > { %v8325_v20 = vadd.f32 %v4689_v51, %v4465_v53  ;;  %v4751_v51 = vsel %vm2325_vm12, %v8256_v36, 0.0  ;;  %v4767_v53 = vsel %vm2325_vm12, %v8314_v60, 0.0 }
 0x697   : > { %v4752_v26 = vadd.f32 %v4751_v51, %v4750_v15 }
 0x698   : > { %v4769_v47 = vsel %vm2325_vm12, %v8325_v20, 0.0 }
 0x699   : > { %v4754_v19 = vadd.f32 %v4753_v46, %v4752_v26 }
 0x69b   : > { %v4756_v17 = vadd.f32 %v4755_v50, %v4754_v19 }
 0x69f   : > { %v4469_v8 = vpop.f32.mrb[42].mxu1 }
 0x6a0   : > { %v4470_v62 = vadd.f32 %v8193_v49, %v4469_v8  ;;  %v4471_v44 = vpop.f32.mrb[43].mxu1 }
 0x6a2   : > { %v8333_v12 = vadd.f32 %v8266_v34, %v4470_v62  ;;  %v4758_v34 = vadd.f32 %v4757_v31, %v4756_v17 }
 0x6a4   : > { %v4760_v24 = vadd.f32 %v4759_v13, %v4758_v34  ;;  %v4771_v32 = vsel %vm2325_vm12, %v8333_v12, 0.0 }
 0x6a6   : > { %v4762_v56 = vadd.f32 %v4761_v0, %v4760_v24 }
 0x6a8   : > { %v4764_v38 = vadd.f32 %v4763_v28, %v4762_v56 }
 0x6aa   : > { %v4766_v40 = vadd.f32 %v4765_v2, %v4764_v38 }
 0x6ab   : > { %v4474_v7 = vpop.f32.mrb[44].mxu1 }
 0x6ac   : > { %v4475_v1 = vadd.f32 %v8193_v49, %v4474_v7  ;;  %v4476_v33 = vpop.f32.mrb[45].mxu1  ;;  %v4768_v42 = vadd.f32 %v4767_v53, %v4766_v40 }
 0x6ae   : > { %v4700_v37 = vadd.f32 %v8270_v5, %v4475_v1  ;;  %v4770_v30 = vadd.f32 %v4769_v47, %v4768_v42 }
 0x6b0   : > { %v4773_v5 = vsel %vm2325_vm12, %v4700_v37, 0.0  ;;  %v4772_v62 = vadd.f32 %v4771_v32, %v4770_v30 }
 0x6b2   : > { %v4774_v15 = vadd.f32 %v4773_v5, %v4772_v62 }
 0x6b7   : > { %v4479_v18 = vpop.f32.mrb[46].mxu1 }
 0x6b8   : > { %v4480_v35 = vadd.f32 %v8193_v49, %v4479_v18  ;;  %v4481_v8 = vpop.f32.mrb[47].mxu1 }
 0x6ba   : > { %v4705_v44 = vadd.f32 %v8268_v11, %v4480_v35 }
 0x6bc   : > { %v4775_v51 = vsel %vm2325_vm12, %v4705_v44, 0.0 }
 0x6bd   : > { %v4776_v46 = vadd.f32 %v4775_v51, %v4774_v15 }
 0x6c3   : > { %v4484_v26 = vpop.f32.mrb[48].mxu1 }
 0x6c4   : > { %v4485_v50 = vadd.f32 %v8193_v49, %v4484_v26  ;;  %v4486_v19 = vpop.f32.mrb[49].mxu1 }
 0x6c6   : > { %v4710_v31 = vadd.f32 %v8277_v52, %v4485_v50 }
 0x6c8   : > { %v4777_v17 = vsel %vm2325_vm12, %v4710_v31, 0.0 }
 0x6c9   : > { %v4778_v13 = vadd.f32 %v4777_v17, %v4776_v46 }
 0x6cf   : > { %v4489_v34 = vpop.f32.mrb[50].mxu1 }
 0x6d0   : > { %v4490_v7 = vadd.f32 %v8193_v49, %v4489_v34  ;;  %v4491_v0 = vpop.f32.mrb[51].mxu1 }
 0x6d2   : > { %v4715_v1 = vadd.f32 %v8273_v3, %v4490_v7 }
 0x6d4   : > { %v4779_v11 = vsel %vm2325_vm12, %v4715_v1, 0.0 }
 0x6d5   : > { %v4780_v33 = vadd.f32 %v4779_v11, %v4778_v13 }
 0x6d7   : > { %v4781_v24 = vrot.slane %v4780_v33, 4 }
 0x6d9   : > { %v4782_v28 = vadd.f32 %v4781_v24, %v4780_v33 }
 0x6db   : > { %v4783_v56 = vrot.slane %v4782_v28, 2 }
 0x6dd   : > { %v4784_v2 = vadd.f32 %v4783_v56, %v4782_v28 }
 0x6df   : > { %v4785_v38 = vrot.slane %v4784_v2, 1 }
 0x6e1   : > { %v4786_v53 = vadd.f32 %v4785_v38, %v4784_v2 }
 0x6e3   : > { %v8369_v40 = vmul.f32 0.00390625, %v4786_v53 }
 0x6e5   : > { %v8372_v52 = vsub.f32 %v4700_v37, %v8369_v40  ;;  %v8375_v47 = vsub.f32 %v4705_v44, %v8369_v40  ;;  %v8378_v49 = vsub.f32 %v4710_v31, %v8369_v40  ;;  %v8381_v3 = vsub.f32 %v4715_v1, %v8369_v40 }
 0x6e6   : > { %v8385_v42 = vsub.f32 %v8201_v55, %v8369_v40  ;;  %v8389_v32 = vsub.f32 %v8199_v25, %v8369_v40  ;;  %v8393_v37 = vsub.f32 %v8208_v61, %v8369_v40  ;;  %v8397_v30 = vsub.f32 %v8206_v21, %v8369_v40 }
 0x6e7   : > { %v8405_v55 = vsub.f32 %v8214_v45, %v8369_v40  ;;  %v8411_v61 = vsub.f32 %v8212_v39, %v8369_v40  ;;  %v8419_v44 = vsub.f32 %v8222_v22, %v8369_v40  ;;  %v8426_v39 = vsub.f32 %v8220_v6, %v8369_v40 }
 0x6e8   : > { %v4820_v18 = vmul.f32 %v8385_v42, %v8385_v42  ;;  %v4821_v5 = vmul.f32 %v8389_v32, %v8389_v32  ;;  %v4822_v25 = vmul.f32 %v8393_v37, %v8393_v37  ;;  %v4823_v21 = vmul.f32 %v8397_v30, %v8397_v30 }
 0x6e9   : > { %v4824_v45 = vmul.f32 %v8405_v55, %v8405_v55  ;;  %v4825_v46 = vmul.f32 %v8411_v61, %v8411_v61  ;;  %v8433_v22 = vsub.f32 %v8230_v9, %v8369_v40  ;;  %v4826_v19 = vmul.f32 %v8419_v44, %v8419_v44 }
 0x6ea   : > { %v4852_v35 = vsel %vm2325_vm12, %v4820_v18, 0.0  ;;  %v4853_v8 = vsel %vm2325_vm12, %v4821_v5, 0.0  ;;  %v4855_v15 = vsel %vm2325_vm12, %v4822_v25, 0.0  ;;  %v4857_v26 = vsel %vm2325_vm12, %v4823_v21, 0.0 }
 0x6eb   : > { %v4854_v62 = vadd.f32 %v4853_v8, %v4852_v35  ;;  %v4859_v31 = vsel %vm2325_vm12, %v4824_v45, 0.0  ;;  %v8440_v6 = vsub.f32 %v8228_v59, %v8369_v40  ;;  %v4827_v13 = vmul.f32 %v8426_v39, %v8426_v39 }
 0x6ec   : > { %v4861_v34 = vsel %vm2325_vm12, %v4825_v46, 0.0  ;;  %v8447_v9 = vsub.f32 %v8238_v43, %v8369_v40  ;;  %v4828_v0 = vmul.f32 %v8433_v22, %v8433_v22  ;;  %v4863_v1 = vsel %vm2325_vm12, %v4826_v19, 0.0 }
 0x6ed   : > { %v4856_v51 = vadd.f32 %v4855_v15, %v4854_v62  ;;  %v8454_v59 = vsub.f32 %v8236_v58, %v8369_v40  ;;  %v4829_v33 = vmul.f32 %v8440_v6, %v8440_v6  ;;  %v4865_v24 = vsel %vm2325_vm12, %v4827_v13, 0.0 }
 0x6ee   : > { %v8461_v43 = vsub.f32 %v8246_v48, %v8369_v40  ;;  %v4830_v56 = vmul.f32 %v8447_v9, %v8447_v9  ;;  %v4867_v2 = vsel %vm2325_vm12, %v4828_v0, 0.0  ;;  %v8468_v58 = vsub.f32 %v8244_v29, %v8369_v40 }
 0x6ef   : > { %v4858_v50 = vadd.f32 %v4857_v26, %v4856_v51  ;;  %v4831_v53 = vmul.f32 %v8454_v59, %v8454_v59  ;;  %v4869_v18 = vsel %vm2325_vm12, %v4829_v33, 0.0  ;;  %v8475_v48 = vsub.f32 %v8252_v57, %v8369_v40 }
 0x6f0   : > { %v4832_v25 = vmul.f32 %v8461_v43, %v8461_v43  ;;  %v4871_v21 = vsel %vm2325_vm12, %v4830_v56, 0.0  ;;  %v8482_v29 = vsub.f32 %v8250_v14, %v8369_v40  ;;  %v4833_v8 = vmul.f32 %v8468_v58, %v8468_v58 }
 0x6f1   : > { %v4860_v17 = vadd.f32 %v4859_v31, %v4858_v50  ;;  %v4873_v62 = vsel %vm2325_vm12, %v4831_v53, 0.0  ;;  %v8489_v57 = vsub.f32 %v8258_v10, %v8369_v40  ;;  %v4834_v15 = vmul.f32 %v8475_v48, %v8475_v48 }
 0x6f2   : > { %v4875_v51 = vsel %vm2325_vm12, %v4832_v25, 0.0  ;;  %v8496_v14 = vsub.f32 %v8256_v36, %v8369_v40  ;;  %v4835_v26 = vmul.f32 %v8482_v29, %v8482_v29  ;;  %v4877_v50 = vsel %vm2325_vm12, %v4833_v8, 0.0 }
 0x6f3   : > { %v4862_v7 = vadd.f32 %v4861_v34, %v4860_v17  ;;  %v8503_v10 = vsub.f32 %v8261_v4, %v8369_v40  ;;  %v4836_v31 = vmul.f32 %v8489_v57, %v8489_v57  ;;  %v4879_v17 = vsel %vm2325_vm12, %v4834_v15, 0.0 }
 0x6f4   : > { %v8510_v36 = vsub.f32 %v8264_v41, %v8369_v40  ;;  %v4837_v34 = vmul.f32 %v8496_v14, %v8496_v14  ;;  %v8517_v4 = vsub.f32 %v8275_v27, %v8369_v40  ;;  %v8524_v41 = vsub.f32 %v8280_v63, %v8369_v40 }
 0x6f5   : > { %v4864_v11 = vadd.f32 %v4863_v1, %v4862_v7  ;;  %v4881_v7 = vsel %vm2325_vm12, %v4835_v26, 0.0  ;;  %v4838_v1 = vmul.f32 %v8503_v10, %v8503_v10  ;;  %v8531_v27 = vsub.f32 %v8289_v16, %v8369_v40 }
 0x6f6   : > { %v8538_v63 = vsub.f32 %v8296_v54, %v8369_v40  ;;  %v8545_v16 = vsub.f32 %v8307_v23, %v8369_v40  ;;  %v8552_v54 = vsub.f32 %v8314_v60, %v8369_v40  ;;  %v8559_v23 = vsub.f32 %v8325_v20, %v8369_v40 }
 0x6f7   : > { %v4866_v28 = vadd.f32 %v4865_v24, %v4864_v11  ;;  %v4883_v11 = vsel %vm2325_vm12, %v4836_v31, 0.0  ;;  %v4839_v24 = vmul.f32 %v8510_v36, %v8510_v36  ;;  %v8566_v60 = vsub.f32 %v8333_v12, %v8369_v40 }
 0x6f8   : > { %v4846_v20 = vmul.f32 %v8559_v23, %v8559_v23  ;;  %v4848_v12 = vmul.f32 %v8372_v52, %v8372_v52 }
 0x6f9   : > { %v4868_v38 = vadd.f32 %v4867_v2, %v4866_v28  ;;  %v4885_v28 = vsel %vm2325_vm12, %v4837_v34, 0.0  ;;  %v4840_v2 = vmul.f32 %v8517_v4, %v8517_v4  ;;  %v4847_v34 = vmul.f32 %v8566_v60, %v8566_v60 }
 0x6fa   : > { %v4903_v40 = vsel %vm2325_vm12, %v4846_v20, 0.0 }
 0x6fb   : > { %v4870_v5 = vadd.f32 %v4869_v18, %v4868_v38  ;;  %v4887_v38 = vsel %vm2325_vm12, %v4838_v1, 0.0  ;;  %v4841_v18 = vmul.f32 %v8524_v41, %v8524_v41 }
 0x6fd   : > { %v4872_v35 = vadd.f32 %v4871_v21, %v4870_v5  ;;  %v4889_v5 = vsel %vm2325_vm12, %v4839_v24, 0.0  ;;  %v4842_v21 = vmul.f32 %v8531_v27, %v8531_v27 }
 0x6ff   : > { %v4874_v45 = vadd.f32 %v4873_v62, %v4872_v35  ;;  %v4891_v35 = vsel %vm2325_vm12, %v4840_v2, 0.0  ;;  %v4843_v62 = vmul.f32 %v8538_v63, %v8538_v63 }
 0x701   : > { %v4876_v46 = vadd.f32 %v4875_v51, %v4874_v45  ;;  %v4893_v45 = vsel %vm2325_vm12, %v4841_v18, 0.0  ;;  %v4844_v51 = vmul.f32 %v8545_v16, %v8545_v16 }
 0x703   : > { %v4878_v19 = vadd.f32 %v4877_v50, %v4876_v46  ;;  %v4895_v46 = vsel %vm2325_vm12, %v4842_v21, 0.0  ;;  %v4845_v50 = vmul.f32 %v8552_v54, %v8552_v54 }
 0x705   : > { %v4880_v13 = vadd.f32 %v4879_v17, %v4878_v19  ;;  %v4897_v19 = vsel %vm2325_vm12, %v4843_v62, 0.0  ;;  %v4899_v17 = vsel %vm2325_vm12, %v4844_v51, 0.0 }
 0x707   : > { %v4882_v0 = vadd.f32 %v4881_v7, %v4880_v13  ;;  %v4901_v7 = vsel %vm2325_vm12, %v4845_v50, 0.0 }
 0x709   : > { %v4884_v33 = vadd.f32 %v4883_v11, %v4882_v0  ;;  %v4849_v11 = vmul.f32 %v8375_v47, %v8375_v47 }
 0x70b   : > { %v4886_v56 = vadd.f32 %v4885_v28, %v4884_v33  ;;  %v4905_v33 = vsel %vm2325_vm12, %v4847_v34, 0.0  ;;  %v4850_v28 = vmul.f32 %v8378_v49, %v8378_v49 }
 0x70d   : > { %v4888_v53 = vadd.f32 %v4887_v38, %v4886_v56  ;;  %v4907_v56 = vsel %vm2325_vm12, %v4848_v12, 0.0  ;;  %v4851_v38 = vmul.f32 %v8381_v3, %v8381_v3 }
 0x70f   : > { %v4890_v25 = vadd.f32 %v4889_v5, %v4888_v53  ;;  %v4909_v53 = vsel %vm2325_vm12, %v4849_v11, 0.0  ;;  %v4911_v5 = vsel %vm2325_vm12, %v4850_v28, 0.0  ;;  %v4913_v21 = vsel %vm2325_vm12, %v4851_v38, 0.0 }
 0x711   : > { %v4892_v8 = vadd.f32 %v4891_v35, %v4890_v25 }
 0x713   : > { %v4894_v15 = vadd.f32 %v4893_v45, %v4892_v8 }
 0x715   : > { %v4896_v26 = vadd.f32 %v4895_v46, %v4894_v15 }
 0x717   : > { %v4898_v31 = vadd.f32 %v4897_v19, %v4896_v26 }
 0x719   : > { %v4900_v13 = vadd.f32 %v4899_v17, %v4898_v31 }
 0x71b   : > { %v4902_v0 = vadd.f32 %v4901_v7, %v4900_v13 }
 0x71d   : > { %v4904_v1 = vadd.f32 %v4903_v40, %v4902_v0 }
 0x71f   : > { %v4906_v24 = vadd.f32 %v4905_v33, %v4904_v1 }
 0x721   : > { %v4908_v2 = vadd.f32 %v4907_v56, %v4906_v24 }
 0x723   : > { %v4910_v18 = vadd.f32 %v4909_v53, %v4908_v2 }
 0x725   : > { %v4912_v25 = vadd.f32 %v4911_v5, %v4910_v18 }
 0x727   : > { %v4914_v35 = vadd.f32 %v4913_v21, %v4912_v25 }
 0x729   : > { %v4915_v8 = vrot.slane %v4914_v35, 4 }
 0x72b   : > { %v4916_v62 = vadd.f32 %v4915_v8, %v4914_v35 }
 0x72d   : > { %v4917_v45 = vrot.slane %v4916_v62, 2 }
 0x72f   : > { %v4918_v15 = vadd.f32 %v4917_v45, %v4916_v62 }
 0x731   : > { %v4919_v51 = vrot.slane %v4918_v15, 1 }
 0x733   : > { %v4920_v46 = vadd.f32 %v4919_v51, %v4918_v15 }
 0x735   : > { %v4921_v26 = vmul.f32 0.00390625, %v4920_v46 }
 0x737   : > { %v4922_v50 = vadd.f32 1e-05, %v4921_v26 }
 0x739   : > { %5500 = vrsqrt.f32 %v4922_v50 }
 0x743   : > { %v8591_v19 = vpop.eup %5500 }
 0x744   : > { %v4940_v31 = vmul.f32 %v8591_v19, %v8489_v57  ;;  %v4924_v20 = vmul.f32 %v8591_v19, %v8385_v42  ;;  %v4941_v17 = vmul.f32 %v8591_v19, %v8496_v14  ;;  %v4925_v7 = vmul.f32 %v8591_v19, %v8389_v32 }
 0x745   : > { %v4942_v40 = vmul.f32 %v8591_v19, %v8503_v10  ;;  %v4926_v57 = vmul.f32 %v8591_v19, %v8393_v37  ;;  %v4943_v14 = vmul.f32 %v8591_v19, %v8510_v36  ;;  %v4927_v32 = vmul.f32 %v8591_v19, %v8397_v30 }
 0x746   : > { %v4972_v13 = vmax.f32 %v4940_v31, 0.0  ;;  %v4956_v34 = vmax.f32 %v4924_v20, 0.0  ;;  %v4973_v0 = vmax.f32 %v4941_v17, 0.0  ;;  %v4957_v12 = vmax.f32 %v4925_v7, 0.0 }
 0x747   : > { %v4974_v42 = vmax.f32 %v4942_v40, 0.0  ;;  %v4958_v1 = vmax.f32 %v4926_v57, 0.0  ;;  %v4975_v11 = vmax.f32 %v4943_v14, 0.0  ;;  %v4959_v33 = vmax.f32 %v4927_v32, 0.0 }
 0x748   : > { %5020 = vxpose.xlu1.b32.start [1/16] (narrow) %v4972_v13, 32  ;;  %4988 = vxpose.xlu0.b32.start [1/16] (narrow) %v4956_v34, 32  ;;  %v4944_v10 = vmul.f32 %v8591_v19, %v8517_v4  ;;  %v4928_v37 = vmul.f32 %v8591_v19, %v8405_v55  ;;  %v4945_v36 = vmul.f32 %v8591_v19, %v8524_v41 }
 0x749   : > { %v4929_v30 = vmul.f32 %v8591_v19, %v8411_v61  ;;  %v4946_v4 = vmul.f32 %v8591_v19, %v8531_v27  ;;  %v4930_v55 = vmul.f32 %v8591_v19, %v8419_v44  ;;  %v4947_v41 = vmul.f32 %v8591_v19, %v8538_v63 }
 0x74a   : > { %v4976_v24 = vmax.f32 %v4944_v10, 0.0  ;;  %v4960_v28 = vmax.f32 %v4928_v37, 0.0  ;;  %v4977_v56 = vmax.f32 %v4945_v36, 0.0  ;;  %v4931_v61 = vmul.f32 %v8591_v19, %v8426_v39 }
 0x74b   : > { %v4961_v2 = vmax.f32 %v4929_v30, 0.0  ;;  %v4978_v38 = vmax.f32 %v4946_v4, 0.0  ;;  %v4962_v53 = vmax.f32 %v4930_v55, 0.0  ;;  %v4979_v18 = vmax.f32 %v4947_v41, 0.0 }
 0x74c   : > { %5021 = vxpose.xlu1.b32.cont [2/16] (narrow) %v4973_v0, 32  ;;  %4989 = vxpose.xlu0.b32.cont [2/16] (narrow) %v4957_v12, 32  ;;  %v4963_v5 = vmax.f32 %v4931_v61, 0.0  ;;  %v4948_v27 = vmul.f32 %v8591_v19, %v8545_v16  ;;  %v4932_v44 = vmul.f32 %v8591_v19, %v8433_v22  ;;  %v4949_v63 = vmul.f32 %v8591_v19, %v8552_v54 }
 0x74d   : > { %v4933_v39 = vmul.f32 %v8591_v19, %v8440_v6  ;;  %v4950_v16 = vmul.f32 %v8591_v19, %v8559_v23  ;;  %v4934_v22 = vmul.f32 %v8591_v19, %v8447_v9  ;;  %v4951_v54 = vmul.f32 %v8591_v19, %v8566_v60 }
 0x74e   : > { %v4980_v25 = vmax.f32 %v4948_v27, 0.0  ;;  %v4964_v21 = vmax.f32 %v4932_v44, 0.0  ;;  %v4981_v35 = vmax.f32 %v4949_v63, 0.0  ;;  %v4935_v6 = vmul.f32 %v8591_v19, %v8454_v59 }
 0x74f   : > { %v4965_v8 = vmax.f32 %v4933_v39, 0.0  ;;  %v4982_v62 = vmax.f32 %v4950_v16, 0.0  ;;  %v4966_v45 = vmax.f32 %v4934_v22, 0.0  ;;  %v4983_v15 = vmax.f32 %v4951_v54, 0.0 }
 0x750   : > { %5022 = vxpose.xlu1.b32.cont [3/16] (narrow) %v4974_v42, 32  ;;  %4990 = vxpose.xlu0.b32.cont [3/16] (narrow) %v4958_v1, 32  ;;  %v4967_v51 = vmax.f32 %v4935_v6, 0.0  ;;  %v4952_v23 = vmul.f32 %v8591_v19, %v8372_v52  ;;  %v4936_v9 = vmul.f32 %v8591_v19, %v8461_v43  ;;  %v4953_v60 = vmul.f32 %v8591_v19, %v8375_v47 }
 0x751   : > { %v4937_v59 = vmul.f32 %v8591_v19, %v8468_v58  ;;  %v4954_v52 = vmul.f32 %v8591_v19, %v8378_v49  ;;  %v4938_v43 = vmul.f32 %v8591_v19, %v8475_v48  ;;  %v4955_v47 = vmul.f32 %v8591_v19, %v8381_v3 }
 0x752   : > { %v4984_v46 = vmax.f32 %v4952_v23, 0.0  ;;  %v4968_v26 = vmax.f32 %v4936_v9, 0.0  ;;  %v4985_v50 = vmax.f32 %v4953_v60, 0.0  ;;  %v4939_v58 = vmul.f32 %v8591_v19, %v8482_v29 }
 0x753   : > { %v4969_v31 = vmax.f32 %v4937_v59, 0.0  ;;  %v4986_v20 = vmax.f32 %v4954_v52, 0.0  ;;  %v4970_v17 = vmax.f32 %v4938_v43, 0.0  ;;  %v4987_v13 = vmax.f32 %v4955_v47, 0.0 }
 0x754   : > { %5023 = vxpose.xlu1.b32.cont [4/16] (narrow) %v4975_v11, 32  ;;  %4991 = vxpose.xlu0.b32.cont [4/16] (narrow) %v4959_v33, 32  ;;  %v4971_v34 = vmax.f32 %v4939_v58, 0.0 }
 0x758   : > { %5024 = vxpose.xlu1.b32.cont [5/16] (narrow) %v4976_v24, 32  ;;  %4992 = vxpose.xlu0.b32.cont [5/16] (narrow) %v4960_v28, 32 }
 0x75c   : > { %5025 = vxpose.xlu1.b32.cont [6/16] (narrow) %v4977_v56, 32  ;;  %4993 = vxpose.xlu0.b32.cont [6/16] (narrow) %v4961_v2, 32 }
 0x760   : > { %5026 = vxpose.xlu1.b32.cont [7/16] (narrow) %v4978_v38, 32  ;;  %4994 = vxpose.xlu0.b32.cont [7/16] (narrow) %v4962_v53, 32 }
 0x764   : > { %5027 = vxpose.xlu1.b32.cont [8/16] (narrow) %v4979_v18, 32  ;;  %4995 = vxpose.xlu0.b32.cont [8/16] (narrow) %v4963_v5, 32 }
 0x768   : > { %5028 = vxpose.xlu1.b32.cont [9/16] (narrow) %v4980_v25, 32  ;;  %4996 = vxpose.xlu0.b32.cont [9/16] (narrow) %v4964_v21, 32 }
 0x76c   : > { %5029 = vxpose.xlu1.b32.cont [10/16] (narrow) %v4981_v35, 32  ;;  %4997 = vxpose.xlu0.b32.cont [10/16] (narrow) %v4965_v8, 32 }
 0x770   : > { %5030 = vxpose.xlu1.b32.cont [11/16] (narrow) %v4982_v62, 32  ;;  %4998 = vxpose.xlu0.b32.cont [11/16] (narrow) %v4966_v45, 32 }
 0x774   : > { %5031 = vxpose.xlu1.b32.cont [12/16] (narrow) %v4983_v15, 32  ;;  %4999 = vxpose.xlu0.b32.cont [12/16] (narrow) %v4967_v51, 32 }
 0x778   : > { %5032 = vxpose.xlu1.b32.cont [13/16] (narrow) %v4984_v46, 32  ;;  %5000 = vxpose.xlu0.b32.cont [13/16] (narrow) %v4968_v26, 32 }
 0x77c   : > { %5033 = vxpose.xlu1.b32.cont [14/16] (narrow) %v4985_v50, 32  ;;  %5001 = vxpose.xlu0.b32.cont [14/16] (narrow) %v4969_v31, 32 }
 0x780   : > { %5034 = vxpose.xlu1.b32.cont [15/16] (narrow) %v4986_v20, 32  ;;  %5002 = vxpose.xlu0.b32.cont [15/16] (narrow) %v4970_v17, 32 }
 0x784   : > { %5035 = vxpose.xlu1.b32.end [16/16] (narrow) %v4987_v13, 32  ;;  %5003 = vxpose.xlu0.b32.end [16/16] (narrow) %v4971_v34, 32 }
 0x7c8   : > { %v5036_v49 = vpop.trf.xlu1  ;;  %v5004_v48 = vpop.trf.xlu0 }
 0x7c9   : > { %5053 = vst [vmem:[%s224_s8 + $0x8] sm:$0xff] %v5036_v49  ;;  %5052 = vst [vmem:[%s224_s8] sm:$0xff] %v5004_v48 }
 0x7cc   : > { %v5037_v7 = vpop.trf.xlu1  ;;  %v5005_v3 = vpop.trf.xlu0 }
 0x7cd   : > { %5055 = vst [vmem:[%s224_s8 + $0x18] sm:$0xff] %v5037_v7  ;;  %5054 = vst [vmem:[%s224_s8 + $0x10] sm:$0xff] %v5005_v3 }
 0x7d0   : > { %v5038_v29 = vpop.trf.xlu1  ;;  %v5006_v19 = vpop.trf.xlu0 }
 0x7d1   : > { %5057 = vst [vmem:[%s224_s8 + $0x28] sm:$0xff] %v5038_v29  ;;  %5056 = vst [vmem:[%s224_s8 + $0x20] sm:$0xff] %v5006_v19 }
 0x7d4   : > { %v5039_v0 = vpop.trf.xlu1  ;;  %v5007_v12 = vpop.trf.xlu0 }
 0x7d5   : > { %5059 = vst [vmem:[%s224_s8 + $0x38] sm:$0xff] %v5039_v0  ;;  %5058 = vst [vmem:[%s224_s8 + $0x30] sm:$0xff] %v5007_v12 }
 0x7d6 PF: > { %s15_s18 = sadd.s32 1, %s5508_s18  }
 0x7d7   : > { %p12_p4 = scmp.ge.s32.totalorder %s15_s18, 4  }
 0x7d9   :  { %14 = sbr.rel (!%p12_p4) target bundleno = 1 (0x1), region = 74 }

</bundles_post_ra>
